<compile_context>
chip_gen: v5e
topology: v5e:2x2
jax: 0.10.0
libtpu: 0.0.40
codegen_flags: <defaults>
</compile_context>

<pallas_src>
import functools

import jax
import jax.numpy as jnp
from jax import lax
from jax.experimental import pallas as pl
from jax.experimental.pallas import tpu as pltpu


def _round_up(x, m):
    return ((x + m - 1) // m) * m


# ---------------------------------------------------------------------------
# Tiled matmul + bias: out = a @ b + bias (bf16 MXU operands, f32 accumulate)
# ---------------------------------------------------------------------------
def _matmul_bias_kernel_1k(a_ref, b_ref, bias_ref, o_ref):
    # Single-K-step specialization: no accumulator scratch / zero-fill / copy.
    o_ref[...] = (jnp.dot(a_ref[...], b_ref[...],
                          preferred_element_type=jnp.float32)
                  + bias_ref[...]).astype(o_ref.dtype)


def _matmul_bias_kernel(a_ref, b_ref, bias_ref, o_ref, acc_ref):
    k = pl.program_id(2)

    @pl.when(k == 0)
    def _():
        acc_ref[...] = jnp.zeros_like(acc_ref)

    acc_ref[...] += jnp.dot(a_ref[...], b_ref[...],
                            preferred_element_type=jnp.float32)

    @pl.when(k == pl.num_programs(2) - 1)
    def _():
        o_ref[...] = (acc_ref[...] + bias_ref[...]).astype(o_ref.dtype)


def pallas_matmul_bias(a, b, bias, *, out_dtype=jnp.bfloat16):
    """a: (M, K), b: (K, N), bias: (N,)."""
    M, K = a.shape
    K2, N = b.shape
    assert K == K2
    # 512 tiles when the dim is large enough (~85% of HBM roofline vs ~63% at
    # 256); tm kept a multiple of 16 (bf16 sublane packing), tn of 128 (lane).
    tm = 512 if M > 512 else _round_up(M, 16)
    tn = 512 if N > 512 else _round_up(N, 128)
    tk = 512 if K > 512 else _round_up(K, 8)
    Mp, Np, Kp = _round_up(M, tm), _round_up(N, tn), _round_up(K, tk)

    a = a.astype(jnp.bfloat16)
    b = b.astype(jnp.bfloat16)
    bias = bias.astype(jnp.float32).reshape(1, -1)
    if (Mp, Kp) != (M, K):
        a = jnp.pad(a, ((0, Mp - M), (0, Kp - K)))
    if (Kp, Np) != (K, N):
        b = jnp.pad(b, ((0, Kp - K), (0, Np - N)))
    if Np != N:
        bias = jnp.pad(bias, ((0, 0), (0, Np - N)))

    nk = Kp // tk
    if nk == 1:
        out = pl.pallas_call(
            _matmul_bias_kernel_1k,
            out_shape=jax.ShapeDtypeStruct((Mp, Np), out_dtype),
            grid=(Mp // tm, Np // tn),
            in_specs=[
                pl.BlockSpec((tm, Kp), lambda i, j: (i, 0)),
                pl.BlockSpec((Kp, tn), lambda i, j: (0, j)),
                pl.BlockSpec((1, tn), lambda i, j: (0, j)),
            ],
            out_specs=pl.BlockSpec((tm, tn), lambda i, j: (i, j)),
            compiler_params=pltpu.CompilerParams(
                dimension_semantics=("parallel", "parallel")),
        )(a, b, bias)
    else:
        out = pl.pallas_call(
            _matmul_bias_kernel,
            out_shape=jax.ShapeDtypeStruct((Mp, Np), out_dtype),
            grid=(Mp // tm, Np // tn, nk),
            in_specs=[
                pl.BlockSpec((tm, tk), lambda i, j, k: (i, k)),
                pl.BlockSpec((tk, tn), lambda i, j, k: (k, j)),
                pl.BlockSpec((1, tn), lambda i, j, k: (0, j)),
            ],
            out_specs=pl.BlockSpec((tm, tn), lambda i, j, k: (i, j)),
            scratch_shapes=[pltpu.VMEM((tm, tn), jnp.float32)],
            compiler_params=pltpu.CompilerParams(
                dimension_semantics=("parallel", "parallel", "arbitrary")),
        )(a, b, bias)
    if (Mp, Np) != (M, N):
        out = out[:M, :N]
    return out


# ---------------------------------------------------------------------------
# LSTM recurrence: one grid step = one T-chunk (unrolled) for one batch shard.
# ---------------------------------------------------------------------------
def _lstm_recurrence_kernel(xw_ref, whh_ref, h_out_ref, h_sc, c_sc):
    """xw_ref   : (Tc, Bb, 4Hp) bf16 -- precomputed x_t @ W_ih + b (time-major)
       whh_ref  : (Hp, 4Hp)     bf16 -- resident recurrent weights
       h_out_ref: (Bb, Tc, Hp)  bf16 -- batch-major hidden output chunk
       h_sc     : (Bb, Hp)      bf16 -- carried hidden state (MXU operand dtype)
       c_sc     : (Bb, Hp)      f32  -- carried cell state"""
    Hp = h_sc.shape[-1]
    Tc = xw_ref.shape[0]

    @pl.when(pl.program_id(1) == 0)     # new batch shard -> reset the carry
    def _():
        h_sc[...] = jnp.zeros_like(h_sc)
        c_sc[...] = jnp.zeros_like(c_sc)

    h = h_sc[...]
    c = c_sc[...]
    hs = []
    for j in range(Tc):  # static unroll (Tc <= 8): no per-step grid overhead
        gates = xw_ref[j].astype(jnp.float32) + jnp.dot(
            h, whh_ref[...], preferred_element_type=jnp.float32)
        # Lane-aligned gate slices (Hp multiple of 128); PyTorch order i,f,g,o.
        i_g = jax.nn.sigmoid(gates[:, 0 * Hp:1 * Hp])
        f_g = jax.nn.sigmoid(gates[:, 1 * Hp:2 * Hp])
        g_g = jnp.tanh(gates[:, 2 * Hp:3 * Hp])
        o_g = jax.nn.sigmoid(gates[:, 3 * Hp:4 * Hp])
        c = f_g * c + i_g * g_g
        h = (o_g * jnp.tanh(c)).astype(jnp.bfloat16)
        hs.append(h)
    h_out_ref[...] = jnp.stack(hs, axis=1)   # one dense, lane-aligned store
    h_sc[...] = h
    c_sc[...] = c


# ---------------------------------------------------------------------------
# One-time parameter prep (padding / dtype) and the forward wrapper
# ---------------------------------------------------------------------------
def _pad_gate_cols(w, H, Hp):
    """(..., 4H) -> (..., 4Hp): each gate block placed at [g*Hp : g*Hp + H]."""
    lead = w.shape[:-1]
    w4 = w.reshape(lead + (4, H))
    w4p = jnp.pad(w4, [(0, 0)] * len(lead) + [(0, 0), (0, Hp - H)])
    return w4p.reshape(lead + (4 * Hp,))


def prepare_decoder_params(params):
    """Pad / cast weights once, outside the per-call forward path."""
    H = params["w_hh_t"].shape[0]
    V = params["w_fc_t"].shape[1]
    Hp = _round_up(H, 128)
    Vp = _round_up(V, 128)
    return {
        "embed_w": params["embed_w"].astype(jnp.bfloat16),                 # (V, E)
        "w_ih_p": _pad_gate_cols(params["w_ih_t"], H, Hp).astype(jnp.bfloat16),
        "w_hh_p": jnp.pad(_pad_gate_cols(params["w_hh_t"], H, Hp),
                          ((0, Hp - H), (0, 0))).astype(jnp.bfloat16),     # (Hp,4Hp)
        "b_g_p": _pad_gate_cols(params["b_gates"], H, Hp)[0].astype(jnp.float32),
        "w_fc_p": jnp.pad(params["w_fc_t"],
                          ((0, Hp - H), (0, Vp - V))).astype(jnp.bfloat16),  # (Hp,Vp)
        "b_fc_p": jnp.pad(params["b_fc"][0], (0, Vp - V)).astype(jnp.float32),
    }


def decoder_rnn_forward(features, captions, prepped, *, vocab_size):
    embed_w = prepped["embed_w"]
    w_ih_p = prepped["w_ih_p"]
    w_hh_p = prepped["w_hh_p"]
    b_g_p = prepped["b_g_p"]
    w_fc_p = prepped["w_fc_p"]
    b_fc_p = prepped["b_fc_p"]

    B, E = features.shape
    Hp = w_hh_p.shape[0]
    Vp = w_fc_p.shape[1]
    V = vocab_size

    # Embedding lookup of captions[:, :-1]; features become timestep 0 (bf16).
    cap_emb = jnp.take(embed_w, captions[:, :-1], axis=0)              # (B,L-1,E)
    x = jnp.concatenate(
        [features.astype(jnp.bfloat16)[:, None, :], cap_emb], axis=1)  # (B,T,E)
    T = x.shape[1]

    Bp = _round_up(B, 16)            # bf16 sublane-packing aligned batch
    Tc = min(8, T)                   # timesteps unrolled per grid step
    Tp = _round_up(T, Tc)
    n_b = 2 if Bp >= 32 else 1       # v7x: split batch across the 2 TensorCores
    Bb = Bp // n_b

    x_tm = jnp.transpose(x, (1, 0, 2))                                 # (T,B,E)
    x_tm = jnp.pad(x_tm, ((0, Tp - T), (0, Bp - B), (0, 0)))           # (Tp,Bp,E)

    # 1) Hoisted input projection over all timesteps: one MXU matmul, bf16 out
    #    (halves xw writeback + the per-step DMA into the recurrence).
    xw = pallas_matmul_bias(x_tm.reshape(Tp * Bp, E), w_ih_p, b_g_p,
                            out_dtype=jnp.bfloat16)                    # (Tp*Bp,4Hp)
    xw = xw.reshape(Tp, Bp, 4 * Hp)

    # 2) LSTM recurrence: batch shards "parallel", T-chunks "arbitrary";
    #    h/c carry lives in persistent VMEM scratch, reset whenever the
    #    (outer) batch-shard index advances (program_id(1) == 0).
    h_all = pl.pallas_call(
        _lstm_recurrence_kernel,
        out_shape=jax.ShapeDtypeStruct((Bp, Tp, Hp), jnp.bfloat16),    # batch-major
        grid=(n_b, Tp // Tc),
        in_specs=[
            pl.BlockSpec((Tc, Bb, 4 * Hp), lambda b, t: (t, b, 0)),
            pl.BlockSpec((Hp, 4 * Hp), lambda b, t: (0, 0)),
        ],
        out_specs=pl.BlockSpec((Bb, Tc, Hp), lambda b, t: (b, t, 0)),
        scratch_shapes=[pltpu.VMEM((Bb, Hp), jnp.bfloat16),
                        pltpu.VMEM((Bb, Hp), jnp.float32)],
        compiler_params=pltpu.CompilerParams(
            dimension_semantics=("parallel", "arbitrary")),
    )(xw, w_hh_p)

    # 3) FC projection on batch-major h_all: full-tile parallel matmul, bf16
    #    logits, and NO final (T,B,V) transpose.
    # TODO(synk): nn.Dropout uses torch RNG in train mode; identity here (eval).
    logits = pallas_matmul_bias(h_all.reshape(Bp * Tp, Hp), w_fc_p, b_fc_p,
                                out_dtype=jnp.bfloat16)                # (Bp*Tp,Vp)
    return logits.reshape(Bp, Tp, Vp)[:B, :T, :V]                      # (B,T,V) bf16


# ---------------------------------------------------------------------------
# Parameters (PyTorch layout -> pre-transposed) and pure-JAX f32 reference
# ---------------------------------------------------------------------------
def init_params(key, embed_size, hidden_size, vocab_size):
    ks = jax.random.split(key, 7)
    E, H, V = embed_size, hidden_size, vocab_size
    scale = 0.1
    embed_w = scale * jax.random.normal(ks[0], (V, E), jnp.float32)
    w_ih = scale * jax.random.normal(ks[1], (4 * H, E), jnp.float32)
    w_hh = scale * jax.random.normal(ks[2], (4 * H, H), jnp.float32)
    b_ih = scale * jax.random.normal(ks[3], (4 * H,), jnp.float32)
    b_hh = scale * jax.random.normal(ks[4], (4 * H,), jnp.float32)
    w_fc = scale * jax.random.normal(ks[5], (V, H), jnp.float32)
    b_fc = scale * jax.random.normal(ks[6], (V,), jnp.float32)
    return {
        "embed_w": embed_w,
        "w_ih_t": jnp.transpose(w_ih),                    # (E, 4H)
        "w_hh_t": jnp.transpose(w_hh),                    # (H, 4H)
        "b_gates": (b_ih + b_hh)[None, :],                # (1, 4H)
        "w_fc_t": jnp.transpose(w_fc),                    # (H, V)
        "b_fc": b_fc[None, :],                            # (1, V)
    }


def _reference_forward(features, captions, params):
    """Pure-JAX f32 reference mirroring the PyTorch module (dropout=identity)."""
    embed_w = params["embed_w"]
    H = params["w_hh_t"].shape[0]
    cap_emb = jnp.take(embed_w, captions[:, :-1], axis=0)
    x = jnp.concatenate([features[:, None, :], cap_emb], axis=1)  # (B, T, E)
    B = x.shape[0]

    def step(carry, x_t):
        h, c = carry
        gates = x_t @ params["w_ih_t"] + h @ params["w_hh_t"] + params["b_gates"]
        i_g = jax.nn.sigmoid(gates[:, 0 * H:1 * H])
        f_g = jax.nn.sigmoid(gates[:, 1 * H:2 * H])
        g_g = jnp.tanh(gates[:, 2 * H:3 * H])
        o_g = jax.nn.sigmoid(gates[:, 3 * H:4 * H])
        c = f_g * c + i_g * g_g
        h = o_g * jnp.tanh(c)
        return (h, c), h

    h0 = jnp.zeros((B, H), jnp.float32)
    (_, _), hs = lax.scan(step, (h0, h0), jnp.transpose(x, (1, 0, 2)))
    hs = jnp.transpose(hs, (1, 0, 2))                              # (B, T, H)
    return hs @ params["w_fc_t"] + params["b_fc"]


if __name__ == "__main__":
    # Small, forward-consistent shapes.
    B = 2            # batch
    L = 8            # caption length -> LSTM sequence length T = L
    E = 32           # embed_size
    H = 32           # hidden_size
    V = 128          # vocab_size

    key = jax.random.PRNGKey(0)
    k_feat, k_cap, k_par = jax.random.split(key, 3)

    features = jax.random.normal(k_feat, (B, E), jnp.float32)
    captions = jax.random.randint(k_cap, (B, L), 0, V, jnp.int32)
    params = init_params(k_par, E, H, V)

    prepped = prepare_decoder_params(params)          # one-time layout prep
    fwd = jax.jit(functools.partial(decoder_rnn_forward, vocab_size=V))

    out = fwd(features, captions, prepped)
    out = jax.block_until_ready(out)

    ref = _reference_forward(features, captions, params)
    assert out.shape == (B, L, V), out.shape
    # bf16 activations / logits (f32 accumulation) vs f32 reference.
    assert jnp.allclose(out.astype(jnp.float32), ref, atol=5e-2, rtol=5e-2), \
        "mismatch vs reference"

    print("KERNEL_OK")
</pallas_src>

<mosaic_0001>
module attributes {stable_mosaic.version = 11 : i64} {
  func.func @_matmul_bias_kernel_1k(%arg0: i32, %arg1: i32, %arg2: memref<128x32xbf16, #tpu.memory_space<vmem>>, %arg3: memref<32x512xbf16, #tpu.memory_space<vmem>>, %arg4: memref<1x512xf32, #tpu.memory_space<vmem>>, %arg5: memref<128x512xbf16, #tpu.memory_space<vmem>>) attributes {dimension_semantics = [#tpu.dimension_semantics<parallel>, #tpu.dimension_semantics<parallel>], iteration_bounds = array<i64: 1, 1>, scalar_prefetch = 0 : i64, scratch_operands = 0 : i64, tpu.core_type = #tpu.core_type<tc>, window_params = [{transform_indices = @transform_0, window_bounds = array<i64: 128, 32>}, {transform_indices = @transform_1, window_bounds = array<i64: 32, 512>}, {transform_indices = @transform_2, window_bounds = array<i64: 1, 512>}, {transform_indices = @transform_3, window_bounds = array<i64: 128, 512>}]} {
    %c0 = arith.constant 0 : index
    %c0_0 = arith.constant 0 : index
    %0 = vector.load %arg2[%c0, %c0_0] : memref<128x32xbf16, #tpu.memory_space<vmem>>, vector<128x32xbf16>
    %c0_1 = arith.constant 0 : index
    %c0_2 = arith.constant 0 : index
    %1 = vector.load %arg3[%c0_1, %c0_2] : memref<32x512xbf16, #tpu.memory_space<vmem>>, vector<32x512xbf16>
    %cst = arith.constant dense<0.000000e+00> : vector<128x512xf32>
    %2 = tpu.matmul %0, %1, %cst {dimension_numbers = #tpu.dot_dimension_numbers<[1], [0], [0], [1], [0, 0, 1, 1], [], []>} : vector<128x32xbf16>, vector<32x512xbf16>, vector<128x512xf32> -> vector<128x512xf32>
    %c0_3 = arith.constant 0 : index
    %c0_4 = arith.constant 0 : index
    %3 = vector.load %arg4[%c0_3, %c0_4] : memref<1x512xf32, #tpu.memory_space<vmem>>, vector<1x512xf32>
    %4 = vector.broadcast %3 : vector<1x512xf32> to vector<128x512xf32>
    %5 = arith.addf %2, %4 : vector<128x512xf32>
    %6 = arith.truncf %5 : vector<128x512xf32> to vector<128x512xbf16>
    %c0_5 = arith.constant 0 : index
    %c0_6 = arith.constant 0 : index
    %7 = vector.load %arg5[%c0_5, %c0_6] : memref<128x512xbf16, #tpu.memory_space<vmem>>, vector<128x512xbf16>
    tpu.vector_store %arg5[%c0_5, %c0_6], %6 {strides = array<i32>} : memref<128x512xbf16, #tpu.memory_space<vmem>>, vector<128x512xbf16>,
    return
  }
  func.func @transform_0(%arg0: i32, %arg1: i32) -> (i32, i32) {
    %c0_i32 = arith.constant 0 : i32
    %c0_i32_0 = arith.constant 0 : i32
    return %arg0, %c0_i32 : i32, i32
  }
  func.func @transform_1(%arg0: i32, %arg1: i32) -> (i32, i32) {
    %c0_i32 = arith.constant 0 : i32
    %c0_i32_0 = arith.constant 0 : i32
    return %c0_i32, %arg1 : i32, i32
  }
  func.func @transform_2(%arg0: i32, %arg1: i32) -> (i32, i32) {
    %c0_i32 = arith.constant 0 : i32
    %c0_i32_0 = arith.constant 0 : i32
    return %c0_i32, %arg1 : i32, i32
  }
  func.func @transform_3(%arg0: i32, %arg1: i32) -> (i32, i32) {
    %c0_i32 = arith.constant 0 : i32
    return %arg0, %arg1 : i32, i32
  }
}

module attributes {stable_mosaic.version = 11 : i64} {
  func.func @_lstm_recurrence_kernel(%arg0: i32, %arg1: i32, %arg2: memref<8x16x512xbf16, #tpu.memory_space<vmem>>, %arg3: memref<128x512xbf16, #tpu.memory_space<vmem>>, %arg4: memref<16x8x128xbf16, #tpu.memory_space<vmem>>, %arg5: memref<16x128xbf16, #tpu.memory_space<vmem>>, %arg6: memref<16x128xf32, #tpu.memory_space<vmem>>) attributes {dimension_semantics = [#tpu.dimension_semantics<parallel>, #tpu.dimension_semantics<arbitrary>], iteration_bounds = array<i64: 1, 1>, scalar_prefetch = 0 : i64, scratch_operands = 2 : i64, tpu.core_type = #tpu.core_type<tc>, window_params = [{transform_indices = @transform_0, window_bounds = array<i64: 8, 16, 512>}, {pipeline_mode = #tpu.pipeline_mode<synchronous>, transform_indices = @transform_1, window_bounds = array<i64: 128, 512>}, {transform_indices = @transform_2, window_bounds = array<i64: 16, 8, 128>}]} {
    %c0_i32 = arith.constant 0 : i32
    %0 = arith.cmpi eq, %arg1, %c0_i32 : i32
    %1 = arith.extui %0 : i1 to i32
    %c0_i32_0 = arith.constant 0 : i32
    %2 = arith.cmpi ne, %1, %c0_i32_0 : i32
    scf.if %2 {
      %cst_75 = arith.constant 0.000000e+00 : bf16
      %273 = vector.broadcast %cst_75 : bf16 to vector<16x128xbf16>
      %c0_76 = arith.constant 0 : index
      %c0_77 = arith.constant 0 : index
      %274 = vector.load %arg5[%c0_76, %c0_77] : memref<16x128xbf16, #tpu.memory_space<vmem>>, vector<16x128xbf16>
      tpu.vector_store %arg5[%c0_76, %c0_77], %273 {strides = array<i32>} : memref<16x128xbf16, #tpu.memory_space<vmem>>, vector<16x128xbf16>,
      %cst_78 = arith.constant 0.000000e+00 : f32
      %275 = vector.broadcast %cst_78 : f32 to vector<16x128xf32>
      %c0_79 = arith.constant 0 : index
      %c0_80 = arith.constant 0 : index
      %276 = vector.load %arg6[%c0_79, %c0_80] : memref<16x128xf32, #tpu.memory_space<vmem>>, vector<16x128xf32>
      tpu.vector_store %arg6[%c0_79, %c0_80], %275 {strides = array<i32>} : memref<16x128xf32, #tpu.memory_space<vmem>>, vector<16x128xf32>,
    } else {
    }
    %c0 = arith.constant 0 : index
    %c0_1 = arith.constant 0 : index
    %3 = vector.load %arg5[%c0, %c0_1] : memref<16x128xbf16, #tpu.memory_space<vmem>>, vector<16x128xbf16>
    %c0_2 = arith.constant 0 : index
    %c0_3 = arith.constant 0 : index
    %4 = vector.load %arg6[%c0_2, %c0_3] : memref<16x128xf32, #tpu.memory_space<vmem>>, vector<16x128xf32>
    %c0_4 = arith.constant 0 : index
    %c0_5 = arith.constant 0 : index
    %c0_6 = arith.constant 0 : index
    %5 = vector.load %arg2[%c0_4, %c0_5, %c0_6] : memref<8x16x512xbf16, #tpu.memory_space<vmem>>, vector<1x16x512xbf16>
    %6 = vector.shape_cast %5 : vector<1x16x512xbf16> to vector<16x512xbf16>
    %7 = arith.extf %6 : vector<16x512xbf16> to vector<16x512xf32>
    %c0_7 = arith.constant 0 : index
    %c0_8 = arith.constant 0 : index
    %8 = vector.load %arg3[%c0_7, %c0_8] : memref<128x512xbf16, #tpu.memory_space<vmem>>, vector<128x512xbf16>
    %cst = arith.constant dense<0.000000e+00> : vector<16x512xf32>
    %9 = tpu.matmul %3, %8, %cst {dimension_numbers = #tpu.dot_dimension_numbers<[1], [0], [0], [1], [0, 0, 1, 1], [], []>} : vector<16x128xbf16>, vector<128x512xbf16>, vector<16x512xf32> -> vector<16x512xf32>
    %10 = arith.addf %7, %9 : vector<16x512xf32>
    %11 = vector.extract_strided_slice %10 {offsets = [0, 0], sizes = [16, 128], strides = [1, 1]} : vector<16x512xf32> to vector<16x128xf32>
    %12 = arith.negf %11 : vector<16x128xf32>
    %13 = math.exp %12 : vector<16x128xf32>
    %cst_9 = arith.constant 1.000000e+00 : f32
    %14 = vector.broadcast %cst_9 : f32 to vector<16x128xf32>
    %15 = arith.addf %14, %13 : vector<16x128xf32>
    %16 = arith.divf %14, %15 : vector<16x128xf32>
    %17 = vector.extract_strided_slice %10 {offsets = [0, 128], sizes = [16, 128], strides = [1, 1]} : vector<16x512xf32> to vector<16x128xf32>
    %18 = arith.negf %17 : vector<16x128xf32>
    %19 = math.exp %18 : vector<16x128xf32>
    %cst_10 = arith.constant 1.000000e+00 : f32
    %20 = vector.broadcast %cst_10 : f32 to vector<16x128xf32>
    %21 = arith.addf %20, %19 : vector<16x128xf32>
    %22 = arith.divf %20, %21 : vector<16x128xf32>
    %23 = vector.extract_strided_slice %10 {offsets = [0, 256], sizes = [16, 128], strides = [1, 1]} : vector<16x512xf32> to vector<16x128xf32>
    %24 = math.tanh %23 : vector<16x128xf32>
    %25 = vector.extract_strided_slice %10 {offsets = [0, 384], sizes = [16, 128], strides = [1, 1]} : vector<16x512xf32> to vector<16x128xf32>
    %26 = arith.negf %25 : vector<16x128xf32>
    %27 = math.exp %26 : vector<16x128xf32>
    %cst_11 = arith.constant 1.000000e+00 : f32
    %28 = vector.broadcast %cst_11 : f32 to vector<16x128xf32>
    %29 = arith.addf %28, %27 : vector<16x128xf32>
    %30 = arith.divf %28, %29 : vector<16x128xf32>
    %31 = arith.mulf %22, %4 : vector<16x128xf32>
    %32 = arith.mulf %16, %24 : vector<16x128xf32>
    %33 = arith.addf %31, %32 : vector<16x128xf32>
    %34 = math.tanh %33 : vector<16x128xf32>
    %35 = arith.mulf %30, %34 : vector<16x128xf32>
    %36 = arith.truncf %35 : vector<16x128xf32> to vector<16x128xbf16>
    %c1 = arith.constant 1 : index
    %c0_12 = arith.constant 0 : index
    %c0_13 = arith.constant 0 : index
    %37 = vector.load %arg2[%c1, %c0_12, %c0_13] : memref<8x16x512xbf16, #tpu.memory_space<vmem>>, vector<1x16x512xbf16>
    %38 = vector.shape_cast %37 : vector<1x16x512xbf16> to vector<16x512xbf16>
    %39 = arith.extf %38 : vector<16x512xbf16> to vector<16x512xf32>
    %c0_14 = arith.constant 0 : index
    %c0_15 = arith.constant 0 : index
    %40 = vector.load %arg3[%c0_14, %c0_15] : memref<128x512xbf16, #tpu.memory_space<vmem>>, vector<128x512xbf16>
    %cst_16 = arith.constant dense<0.000000e+00> : vector<16x512xf32>
    %41 = tpu.matmul %36, %40, %cst_16 {dimension_numbers = #tpu.dot_dimension_numbers<[1], [0], [0], [1], [0, 0, 1, 1], [], []>} : vector<16x128xbf16>, vector<128x512xbf16>, vector<16x512xf32> -> vector<16x512xf32>
    %42 = arith.addf %39, %41 : vector<16x512xf32>
    %43 = vector.extract_strided_slice %42 {offsets = [0, 0], sizes = [16, 128], strides = [1, 1]} : vector<16x512xf32> to vector<16x128xf32>
    %44 = arith.negf %43 : vector<16x128xf32>
    %45 = math.exp %44 : vector<16x128xf32>
    %cst_17 = arith.constant 1.000000e+00 : f32
    %46 = vector.broadcast %cst_17 : f32 to vector<16x128xf32>
    %47 = arith.addf %46, %45 : vector<16x128xf32>
    %48 = arith.divf %46, %47 : vector<16x128xf32>
    %49 = vector.extract_strided_slice %42 {offsets = [0, 128], sizes = [16, 128], strides = [1, 1]} : vector<16x512xf32> to vector<16x128xf32>
    %50 = arith.negf %49 : vector<16x128xf32>
    %51 = math.exp %50 : vector<16x128xf32>
    %cst_18 = arith.constant 1.000000e+00 : f32
    %52 = vector.broadcast %cst_18 : f32 to vector<16x128xf32>
    %53 = arith.addf %52, %51 : vector<16x128xf32>
    %54 = arith.divf %52, %53 : vector<16x128xf32>
    %55 = vector.extract_strided_slice %42 {offsets = [0, 256], sizes = [16, 128], strides = [1, 1]} : vector<16x512xf32> to vector<16x128xf32>
    %56 = math.tanh %55 : vector<16x128xf32>
    %57 = vector.extract_strided_slice %42 {offsets = [0, 384], sizes = [16, 128], strides = [1, 1]} : vector<16x512xf32> to vector<16x128xf32>
    %58 = arith.negf %57 : vector<16x128xf32>
    %59 = math.exp %58 : vector<16x128xf32>
    %cst_19 = arith.constant 1.000000e+00 : f32
    %60 = vector.broadcast %cst_19 : f32 to vector<16x128xf32>
    %61 = arith.addf %60, %59 : vector<16x128xf32>
    %62 = arith.divf %60, %61 : vector<16x128xf32>
    %63 = arith.mulf %54, %33 : vector<16x128xf32>
    %64 = arith.mulf %48, %56 : vector<16x128xf32>
    %65 = arith.addf %63, %64 : vector<16x128xf32>
    %66 = math.tanh %65 : vector<16x128xf32>
    %67 = arith.mulf %62, %66 : vector<16x128xf32>
    %68 = arith.truncf %67 : vector<16x128xf32> to vector<16x128xbf16>
    %c2 = arith.constant 2 : index
    %c0_20 = arith.constant 0 : index
    %c0_21 = arith.constant 0 : index
    %69 = vector.load %arg2[%c2, %c0_20, %c0_21] : memref<8x16x512xbf16, #tpu.memory_space<vmem>>, vector<1x16x512xbf16>
    %70 = vector.shape_cast %69 : vector<1x16x512xbf16> to vector<16x512xbf16>
    %71 = arith.extf %70 : vector<16x512xbf16> to vector<16x512xf32>
    %c0_22 = arith.constant 0 : index
    %c0_23 = arith.constant 0 : index
    %72 = vector.load %arg3[%c0_22, %c0_23] : memref<128x512xbf16, #tpu.memory_space<vmem>>, vector<128x512xbf16>
    %cst_24 = arith.constant dense<0.000000e+00> : vector<16x512xf32>
    %73 = tpu.matmul %68, %72, %cst_24 {dimension_numbers = #tpu.dot_dimension_numbers<[1], [0], [0], [1], [0, 0, 1, 1], [], []>} : vector<16x128xbf16>, vector<128x512xbf16>, vector<16x512xf32> -> vector<16x512xf32>
    %74 = arith.addf %71, %73 : vector<16x512xf32>
    %75 = vector.extract_strided_slice %74 {offsets = [0, 0], sizes = [16, 128], strides = [1, 1]} : vector<16x512xf32> to vector<16x128xf32>
    %76 = arith.negf %75 : vector<16x128xf32>
    %77 = math.exp %76 : vector<16x128xf32>
    %cst_25 = arith.constant 1.000000e+00 : f32
    %78 = vector.broadcast %cst_25 : f32 to vector<16x128xf32>
    %79 = arith.addf %78, %77 : vector<16x128xf32>
    %80 = arith.divf %78, %79 : vector<16x128xf32>
    %81 = vector.extract_strided_slice %74 {offsets = [0, 128], sizes = [16, 128], strides = [1, 1]} : vector<16x512xf32> to vector<16x128xf32>
    %82 = arith.negf %81 : vector<16x128xf32>
    %83 = math.exp %82 : vector<16x128xf32>
    %cst_26 = arith.constant 1.000000e+00 : f32
    %84 = vector.broadcast %cst_26 : f32 to vector<16x128xf32>
    %85 = arith.addf %84, %83 : vector<16x128xf32>
    %86 = arith.divf %84, %85 : vector<16x128xf32>
    %87 = vector.extract_strided_slice %74 {offsets = [0, 256], sizes = [16, 128], strides = [1, 1]} : vector<16x512xf32> to vector<16x128xf32>
    %88 = math.tanh %87 : vector<16x128xf32>
    %89 = vector.extract_strided_slice %74 {offsets = [0, 384], sizes = [16, 128], strides = [1, 1]} : vector<16x512xf32> to vector<16x128xf32>
    %90 = arith.negf %89 : vector<16x128xf32>
    %91 = math.exp %90 : vector<16x128xf32>
    %cst_27 = arith.constant 1.000000e+00 : f32
    %92 = vector.broadcast %cst_27 : f32 to vector<16x128xf32>
    %93 = arith.addf %92, %91 : vector<16x128xf32>
    %94 = arith.divf %92, %93 : vector<16x128xf32>
    %95 = arith.mulf %86, %65 : vector<16x128xf32>
    %96 = arith.mulf %80, %88 : vector<16x128xf32>
    %97 = arith.addf %95, %96 : vector<16x128xf32>
    %98 = math.tanh %97 : vector<16x128xf32>
    %99 = arith.mulf %94, %98 : vector<16x128xf32>
    %100 = arith.truncf %99 : vector<16x128xf32> to vector<16x128xbf16>
    %c3 = arith.constant 3 : index
    %c0_28 = arith.constant 0 : index
    %c0_29 = arith.constant 0 : index
    %101 = vector.load %arg2[%c3, %c0_28, %c0_29] : memref<8x16x512xbf16, #tpu.memory_space<vmem>>, vector<1x16x512xbf16>
    %102 = vector.shape_cast %101 : vector<1x16x512xbf16> to vector<16x512xbf16>
    %103 = arith.extf %102 : vector<16x512xbf16> to vector<16x512xf32>
    %c0_30 = arith.constant 0 : index
    %c0_31 = arith.constant 0 : index
    %104 = vector.load %arg3[%c0_30, %c0_31] : memref<128x512xbf16, #tpu.memory_space<vmem>>, vector<128x512xbf16>
    %cst_32 = arith.constant dense<0.000000e+00> : vector<16x512xf32>
    %105 = tpu.matmul %100, %104, %cst_32 {dimension_numbers = #tpu.dot_dimension_numbers<[1], [0], [0], [1], [0, 0, 1, 1], [], []>} : vector<16x128xbf16>, vector<128x512xbf16>, vector<16x512xf32> -> vector<16x512xf32>
    %106 = arith.addf %103, %105 : vector<16x512xf32>
    %107 = vector.extract_strided_slice %106 {offsets = [0, 0], sizes = [16, 128], strides = [1, 1]} : vector<16x512xf32> to vector<16x128xf32>
    %108 = arith.negf %107 : vector<16x128xf32>
    %109 = math.exp %108 : vector<16x128xf32>
    %cst_33 = arith.constant 1.000000e+00 : f32
    %110 = vector.broadcast %cst_33 : f32 to vector<16x128xf32>
    %111 = arith.addf %110, %109 : vector<16x128xf32>
    %112 = arith.divf %110, %111 : vector<16x128xf32>
    %113 = vector.extract_strided_slice %106 {offsets = [0, 128], sizes = [16, 128], strides = [1, 1]} : vector<16x512xf32> to vector<16x128xf32>
    %114 = arith.negf %113 : vector<16x128xf32>
    %115 = math.exp %114 : vector<16x128xf32>
    %cst_34 = arith.constant 1.000000e+00 : f32
    %116 = vector.broadcast %cst_34 : f32 to vector<16x128xf32>
    %117 = arith.addf %116, %115 : vector<16x128xf32>
    %118 = arith.divf %116, %117 : vector<16x128xf32>
    %119 = vector.extract_strided_slice %106 {offsets = [0, 256], sizes = [16, 128], strides = [1, 1]} : vector<16x512xf32> to vector<16x128xf32>
    %120 = math.tanh %119 : vector<16x128xf32>
    %121 = vector.extract_strided_slice %106 {offsets = [0, 384], sizes = [16, 128], strides = [1, 1]} : vector<16x512xf32> to vector<16x128xf32>
    %122 = arith.negf %121 : vector<16x128xf32>
    %123 = math.exp %122 : vector<16x128xf32>
    %cst_35 = arith.constant 1.000000e+00 : f32
    %124 = vector.broadcast %cst_35 : f32 to vector<16x128xf32>
    %125 = arith.addf %124, %123 : vector<16x128xf32>
    %126 = arith.divf %124, %125 : vector<16x128xf32>
    %127 = arith.mulf %118, %97 : vector<16x128xf32>
    %128 = arith.mulf %112, %120 : vector<16x128xf32>
    %129 = arith.addf %127, %128 : vector<16x128xf32>
    %130 = math.tanh %129 : vector<16x128xf32>
    %131 = arith.mulf %126, %130 : vector<16x128xf32>
    %132 = arith.truncf %131 : vector<16x128xf32> to vector<16x128xbf16>
    %c4 = arith.constant 4 : index
    %c0_36 = arith.constant 0 : index
    %c0_37 = arith.constant 0 : index
    %133 = vector.load %arg2[%c4, %c0_36, %c0_37] : memref<8x16x512xbf16, #tpu.memory_space<vmem>>, vector<1x16x512xbf16>
    %134 = vector.shape_cast %133 : vector<1x16x512xbf16> to vector<16x512xbf16>
    %135 = arith.extf %134 : vector<16x512xbf16> to vector<16x512xf32>
    %c0_38 = arith.constant 0 : index
    %c0_39 = arith.constant 0 : index
    %136 = vector.load %arg3[%c0_38, %c0_39] : memref<128x512xbf16, #tpu.memory_space<vmem>>, vector<128x512xbf16>
    %cst_40 = arith.constant dense<0.000000e+00> : vector<16x512xf32>
    %137 = tpu.matmul %132, %136, %cst_40 {dimension_numbers = #tpu.dot_dimension_numbers<[1], [0], [0], [1], [0, 0, 1, 1], [], []>} : vector<16x128xbf16>, vector<128x512xbf16>, vector<16x512xf32> -> vector<16x512xf32>
    %138 = arith.addf %135, %137 : vector<16x512xf32>
    %139 = vector.extract_strided_slice %138 {offsets = [0, 0], sizes = [16, 128], strides = [1, 1]} : vector<16x512xf32> to vector<16x128xf32>
    %140 = arith.negf %139 : vector<16x128xf32>
    %141 = math.exp %140 : vector<16x128xf32>
    %cst_41 = arith.constant 1.000000e+00 : f32
    %142 = vector.broadcast %cst_41 : f32 to vector<16x128xf32>
    %143 = arith.addf %142, %141 : vector<16x128xf32>
    %144 = arith.divf %142, %143 : vector<16x128xf32>
    %145 = vector.extract_strided_slice %138 {offsets = [0, 128], sizes = [16, 128], strides = [1, 1]} : vector<16x512xf32> to vector<16x128xf32>
    %146 = arith.negf %145 : vector<16x128xf32>
    %147 = math.exp %146 : vector<16x128xf32>
    %cst_42 = arith.constant 1.000000e+00 : f32
    %148 = vector.broadcast %cst_42 : f32 to vector<16x128xf32>
    %149 = arith.addf %148, %147 : vector<16x128xf32>
    %150 = arith.divf %148, %149 : vector<16x128xf32>
    %151 = vector.extract_strided_slice %138 {offsets = [0, 256], sizes = [16, 128], strides = [1, 1]} : vector<16x512xf32> to vector<16x128xf32>
    %152 = math.tanh %151 : vector<16x128xf32>
    %153 = vector.extract_strided_slice %138 {offsets = [0, 384], sizes = [16, 128], strides = [1, 1]} : vector<16x512xf32> to vector<16x128xf32>
    %154 = arith.negf %153 : vector<16x128xf32>
    %155 = math.exp %154 : vector<16x128xf32>
    %cst_43 = arith.constant 1.000000e+00 : f32
    %156 = vector.broadcast %cst_43 : f32 to vector<16x128xf32>
    %157 = arith.addf %156, %155 : vector<16x128xf32>
    %158 = arith.divf %156, %157 : vector<16x128xf32>
    %159 = arith.mulf %150, %129 : vector<16x128xf32>
    %160 = arith.mulf %144, %152 : vector<16x128xf32>
    %161 = arith.addf %159, %160 : vector<16x128xf32>
    %162 = math.tanh %161 : vector<16x128xf32>
    %163 = arith.mulf %158, %162 : vector<16x128xf32>
    %164 = arith.truncf %163 : vector<16x128xf32> to vector<16x128xbf16>
    %c5 = arith.constant 5 : index
    %c0_44 = arith.constant 0 : index
    %c0_45 = arith.constant 0 : index
    %165 = vector.load %arg2[%c5, %c0_44, %c0_45] : memref<8x16x512xbf16, #tpu.memory_space<vmem>>, vector<1x16x512xbf16>
    %166 = vector.shape_cast %165 : vector<1x16x512xbf16> to vector<16x512xbf16>
    %167 = arith.extf %166 : vector<16x512xbf16> to vector<16x512xf32>
    %c0_46 = arith.constant 0 : index
    %c0_47 = arith.constant 0 : index
    %168 = vector.load %arg3[%c0_46, %c0_47] : memref<128x512xbf16, #tpu.memory_space<vmem>>, vector<128x512xbf16>
    %cst_48 = arith.constant dense<0.000000e+00> : vector<16x512xf32>
    %169 = tpu.matmul %164, %168, %cst_48 {dimension_numbers = #tpu.dot_dimension_numbers<[1], [0], [0], [1], [0, 0, 1, 1], [], []>} : vector<16x128xbf16>, vector<128x512xbf16>, vector<16x512xf32> -> vector<16x512xf32>
    %170 = arith.addf %167, %169 : vector<16x512xf32>
    %171 = vector.extract_strided_slice %170 {offsets = [0, 0], sizes = [16, 128], strides = [1, 1]} : vector<16x512xf32> to vector<16x128xf32>
    %172 = arith.negf %171 : vector<16x128xf32>
    %173 = math.exp %172 : vector<16x128xf32>
    %cst_49 = arith.constant 1.000000e+00 : f32
    %174 = vector.broadcast %cst_49 : f32 to vector<16x128xf32>
    %175 = arith.addf %174, %173 : vector<16x128xf32>
    %176 = arith.divf %174, %175 : vector<16x128xf32>
    %177 = vector.extract_strided_slice %170 {offsets = [0, 128], sizes = [16, 128], strides = [1, 1]} : vector<16x512xf32> to vector<16x128xf32>
    %178 = arith.negf %177 : vector<16x128xf32>
    %179 = math.exp %178 : vector<16x128xf32>
    %cst_50 = arith.constant 1.000000e+00 : f32
    %180 = vector.broadcast %cst_50 : f32 to vector<16x128xf32>
    %181 = arith.addf %180, %179 : vector<16x128xf32>
    %182 = arith.divf %180, %181 : vector<16x128xf32>
    %183 = vector.extract_strided_slice %170 {offsets = [0, 256], sizes = [16, 128], strides = [1, 1]} : vector<16x512xf32> to vector<16x128xf32>
    %184 = math.tanh %183 : vector<16x128xf32>
    %185 = vector.extract_strided_slice %170 {offsets = [0, 384], sizes = [16, 128], strides = [1, 1]} : vector<16x512xf32> to vector<16x128xf32>
    %186 = arith.negf %185 : vector<16x128xf32>
    %187 = math.exp %186 : vector<16x128xf32>
    %cst_51 = arith.constant 1.000000e+00 : f32
    %188 = vector.broadcast %cst_51 : f32 to vector<16x128xf32>
    %189 = arith.addf %188, %187 : vector<16x128xf32>
    %190 = arith.divf %188, %189 : vector<16x128xf32>
    %191 = arith.mulf %182, %161 : vector<16x128xf32>
    %192 = arith.mulf %176, %184 : vector<16x128xf32>
    %193 = arith.addf %191, %192 : vector<16x128xf32>
    %194 = math.tanh %193 : vector<16x128xf32>
    %195 = arith.mulf %190, %194 : vector<16x128xf32>
    %196 = arith.truncf %195 : vector<16x128xf32> to vector<16x128xbf16>
    %c6 = arith.constant 6 : index
    %c0_52 = arith.constant 0 : index
    %c0_53 = arith.constant 0 : index
    %197 = vector.load %arg2[%c6, %c0_52, %c0_53] : memref<8x16x512xbf16, #tpu.memory_space<vmem>>, vector<1x16x512xbf16>
    %198 = vector.shape_cast %197 : vector<1x16x512xbf16> to vector<16x512xbf16>
    %199 = arith.extf %198 : vector<16x512xbf16> to vector<16x512xf32>
    %c0_54 = arith.constant 0 : index
    %c0_55 = arith.constant 0 : index
    %200 = vector.load %arg3[%c0_54, %c0_55] : memref<128x512xbf16, #tpu.memory_space<vmem>>, vector<128x512xbf16>
    %cst_56 = arith.constant dense<0.000000e+00> : vector<16x512xf32>
    %201 = tpu.matmul %196, %200, %cst_56 {dimension_numbers = #tpu.dot_dimension_numbers<[1], [0], [0], [1], [0, 0, 1, 1], [], []>} : vector<16x128xbf16>, vector<128x512xbf16>, vector<16x512xf32> -> vector<16x512xf32>
    %202 = arith.addf %199, %201 : vector<16x512xf32>
    %203 = vector.extract_strided_slice %202 {offsets = [0, 0], sizes = [16, 128], strides = [1, 1]} : vector<16x512xf32> to vector<16x128xf32>
    %204 = arith.negf %203 : vector<16x128xf32>
    %205 = math.exp %204 : vector<16x128xf32>
    %cst_57 = arith.constant 1.000000e+00 : f32
    %206 = vector.broadcast %cst_57 : f32 to vector<16x128xf32>
    %207 = arith.addf %206, %205 : vector<16x128xf32>
    %208 = arith.divf %206, %207 : vector<16x128xf32>
    %209 = vector.extract_strided_slice %202 {offsets = [0, 128], sizes = [16, 128], strides = [1, 1]} : vector<16x512xf32> to vector<16x128xf32>
    %210 = arith.negf %209 : vector<16x128xf32>
    %211 = math.exp %210 : vector<16x128xf32>
    %cst_58 = arith.constant 1.000000e+00 : f32
    %212 = vector.broadcast %cst_58 : f32 to vector<16x128xf32>
    %213 = arith.addf %212, %211 : vector<16x128xf32>
    %214 = arith.divf %212, %213 : vector<16x128xf32>
    %215 = vector.extract_strided_slice %202 {offsets = [0, 256], sizes = [16, 128], strides = [1, 1]} : vector<16x512xf32> to vector<16x128xf32>
    %216 = math.tanh %215 : vector<16x128xf32>
    %217 = vector.extract_strided_slice %202 {offsets = [0, 384], sizes = [16, 128], strides = [1, 1]} : vector<16x512xf32> to vector<16x128xf32>
    %218 = arith.negf %217 : vector<16x128xf32>
    %219 = math.exp %218 : vector<16x128xf32>
    %cst_59 = arith.constant 1.000000e+00 : f32
    %220 = vector.broadcast %cst_59 : f32 to vector<16x128xf32>
    %221 = arith.addf %220, %219 : vector<16x128xf32>
    %222 = arith.divf %220, %221 : vector<16x128xf32>
    %223 = arith.mulf %214, %193 : vector<16x128xf32>
    %224 = arith.mulf %208, %216 : vector<16x128xf32>
    %225 = arith.addf %223, %224 : vector<16x128xf32>
    %226 = math.tanh %225 : vector<16x128xf32>
    %227 = arith.mulf %222, %226 : vector<16x128xf32>
    %228 = arith.truncf %227 : vector<16x128xf32> to vector<16x128xbf16>
    %c7 = arith.constant 7 : index
    %c0_60 = arith.constant 0 : index
    %c0_61 = arith.constant 0 : index
    %229 = vector.load %arg2[%c7, %c0_60, %c0_61] : memref<8x16x512xbf16, #tpu.memory_space<vmem>>, vector<1x16x512xbf16>
    %230 = vector.shape_cast %229 : vector<1x16x512xbf16> to vector<16x512xbf16>
    %231 = arith.extf %230 : vector<16x512xbf16> to vector<16x512xf32>
    %c0_62 = arith.constant 0 : index
    %c0_63 = arith.constant 0 : index
    %232 = vector.load %arg3[%c0_62, %c0_63] : memref<128x512xbf16, #tpu.memory_space<vmem>>, vector<128x512xbf16>
    %cst_64 = arith.constant dense<0.000000e+00> : vector<16x512xf32>
    %233 = tpu.matmul %228, %232, %cst_64 {dimension_numbers = #tpu.dot_dimension_numbers<[1], [0], [0], [1], [0, 0, 1, 1], [], []>} : vector<16x128xbf16>, vector<128x512xbf16>, vector<16x512xf32> -> vector<16x512xf32>
    %234 = arith.addf %231, %233 : vector<16x512xf32>
    %235 = vector.extract_strided_slice %234 {offsets = [0, 0], sizes = [16, 128], strides = [1, 1]} : vector<16x512xf32> to vector<16x128xf32>
    %236 = arith.negf %235 : vector<16x128xf32>
    %237 = math.exp %236 : vector<16x128xf32>
    %cst_65 = arith.constant 1.000000e+00 : f32
    %238 = vector.broadcast %cst_65 : f32 to vector<16x128xf32>
    %239 = arith.addf %238, %237 : vector<16x128xf32>
    %240 = arith.divf %238, %239 : vector<16x128xf32>
    %241 = vector.extract_strided_slice %234 {offsets = [0, 128], sizes = [16, 128], strides = [1, 1]} : vector<16x512xf32> to vector<16x128xf32>
    %242 = arith.negf %241 : vector<16x128xf32>
    %243 = math.exp %242 : vector<16x128xf32>
    %cst_66 = arith.constant 1.000000e+00 : f32
    %244 = vector.broadcast %cst_66 : f32 to vector<16x128xf32>
    %245 = arith.addf %244, %243 : vector<16x128xf32>
    %246 = arith.divf %244, %245 : vector<16x128xf32>
    %247 = vector.extract_strided_slice %234 {offsets = [0, 256], sizes = [16, 128], strides = [1, 1]} : vector<16x512xf32> to vector<16x128xf32>
    %248 = math.tanh %247 : vector<16x128xf32>
    %249 = vector.extract_strided_slice %234 {offsets = [0, 384], sizes = [16, 128], strides = [1, 1]} : vector<16x512xf32> to vector<16x128xf32>
    %250 = arith.negf %249 : vector<16x128xf32>
    %251 = math.exp %250 : vector<16x128xf32>
    %cst_67 = arith.constant 1.000000e+00 : f32
    %252 = vector.broadcast %cst_67 : f32 to vector<16x128xf32>
    %253 = arith.addf %252, %251 : vector<16x128xf32>
    %254 = arith.divf %252, %253 : vector<16x128xf32>
    %255 = arith.mulf %246, %225 : vector<16x128xf32>
    %256 = arith.mulf %240, %248 : vector<16x128xf32>
    %257 = arith.addf %255, %256 : vector<16x128xf32>
    %258 = math.tanh %257 : vector<16x128xf32>
    %259 = arith.mulf %254, %258 : vector<16x128xf32>
    %260 = arith.truncf %259 : vector<16x128xf32> to vector<16x128xbf16>
    %261 = vector.shape_cast %36 : vector<16x128xbf16> to vector<16x1x128xbf16>
    %262 = vector.shape_cast %68 : vector<16x128xbf16> to vector<16x1x128xbf16>
    %263 = vector.shape_cast %100 : vector<16x128xbf16> to vector<16x1x128xbf16>
    %264 = vector.shape_cast %132 : vector<16x128xbf16> to vector<16x1x128xbf16>
    %265 = vector.shape_cast %164 : vector<16x128xbf16> to vector<16x1x128xbf16>
    %266 = vector.shape_cast %196 : vector<16x128xbf16> to vector<16x1x128xbf16>
    %267 = vector.shape_cast %228 : vector<16x128xbf16> to vector<16x1x128xbf16>
    %268 = vector.shape_cast %260 : vector<16x128xbf16> to vector<16x1x128xbf16>
    %269 = tpu.concatenate %261, %262, %263, %264, %265, %266, %267, %268 in 1 : vector<16x1x128xbf16>, vector<16x1x128xbf16>, vector<16x1x128xbf16>, vector<16x1x128xbf16>, vector<16x1x128xbf16>, vector<16x1x128xbf16>, vector<16x1x128xbf16>, vector<16x1x128xbf16> -> vector<16x8x128xbf16>
    %c0_68 = arith.constant 0 : index
    %c0_69 = arith.constant 0 : index
    %c0_70 = arith.constant 0 : index
    %270 = vector.load %arg4[%c0_68, %c0_69, %c0_70] : memref<16x8x128xbf16, #tpu.memory_space<vmem>>, vector<16x8x128xbf16>
    tpu.vector_store %arg4[%c0_68, %c0_69, %c0_70], %269 {strides = array<i32>} : memref<16x8x128xbf16, #tpu.memory_space<vmem>>, vector<16x8x128xbf16>,
    %c0_71 = arith.constant 0 : index
    %c0_72 = arith.constant 0 : index
    %271 = vector.load %arg5[%c0_71, %c0_72] : memref<16x128xbf16, #tpu.memory_space<vmem>>, vector<16x128xbf16>
    tpu.vector_store %arg5[%c0_71, %c0_72], %260 {strides = array<i32>} : memref<16x128xbf16, #tpu.memory_space<vmem>>, vector<16x128xbf16>,
    %c0_73 = arith.constant 0 : index
    %c0_74 = arith.constant 0 : index
    %272 = vector.load %arg6[%c0_73, %c0_74] : memref<16x128xf32, #tpu.memory_space<vmem>>, vector<16x128xf32>
    tpu.vector_store %arg6[%c0_73, %c0_74], %257 {strides = array<i32>} : memref<16x128xf32, #tpu.memory_space<vmem>>, vector<16x128xf32>,
    return
  }
  func.func @transform_0(%arg0: i32, %arg1: i32) -> (i32, i32, i32) {
    %c0_i32 = arith.constant 0 : i32
    %c0_i32_0 = arith.constant 0 : i32
    return %arg1, %arg0, %c0_i32 : i32, i32, i32
  }
  func.func @transform_1(%arg0: i32, %arg1: i32) -> (i32, i32) {
    %c0_i32 = arith.constant 0 : i32
    %c0_i32_0 = arith.constant 0 : i32
    %c0_i32_1 = arith.constant 0 : i32
    return %c0_i32, %c0_i32_0 : i32, i32
  }
  func.func @transform_2(%arg0: i32, %arg1: i32) -> (i32, i32, i32) {
    %c0_i32 = arith.constant 0 : i32
    %c0_i32_0 = arith.constant 0 : i32
    return %arg0, %arg1, %c0_i32 : i32, i32, i32
  }
}

module attributes {stable_mosaic.version = 11 : i64} {
  func.func @_matmul_bias_kernel_1k(%arg0: i32, %arg1: i32, %arg2: memref<128x128xbf16, #tpu.memory_space<vmem>>, %arg3: memref<128x128xbf16, #tpu.memory_space<vmem>>, %arg4: memref<1x128xf32, #tpu.memory_space<vmem>>, %arg5: memref<128x128xbf16, #tpu.memory_space<vmem>>) attributes {dimension_semantics = [#tpu.dimension_semantics<parallel>, #tpu.dimension_semantics<parallel>], iteration_bounds = array<i64: 1, 1>, scalar_prefetch = 0 : i64, scratch_operands = 0 : i64, tpu.core_type = #tpu.core_type<tc>, window_params = [{transform_indices = @transform_0, window_bounds = array<i64: 128, 128>}, {transform_indices = @transform_1, window_bounds = array<i64: 128, 128>}, {transform_indices = @transform_2, window_bounds = array<i64: 1, 128>}, {transform_indices = @transform_3, window_bounds = array<i64: 128, 128>}]} {
    %c0 = arith.constant 0 : index
    %c0_0 = arith.constant 0 : index
    %0 = vector.load %arg2[%c0, %c0_0] : memref<128x128xbf16, #tpu.memory_space<vmem>>, vector<128x128xbf16>
    %c0_1 = arith.constant 0 : index
    %c0_2 = arith.constant 0 : index
    %1 = vector.load %arg3[%c0_1, %c0_2] : memref<128x128xbf16, #tpu.memory_space<vmem>>, vector<128x128xbf16>
    %cst = arith.constant dense<0.000000e+00> : vector<128x128xf32>
    %2 = tpu.matmul %0, %1, %cst {dimension_numbers = #tpu.dot_dimension_numbers<[1], [0], [0], [1], [0, 0, 1, 1], [], []>} : vector<128x128xbf16>, vector<128x128xbf16>, vector<128x128xf32> -> vector<128x128xf32>
    %c0_3 = arith.constant 0 : index
    %c0_4 = arith.constant 0 : index
    %3 = vector.load %arg4[%c0_3, %c0_4] : memref<1x128xf32, #tpu.memory_space<vmem>>, vector<1x128xf32>
    %4 = vector.broadcast %3 : vector<1x128xf32> to vector<128x128xf32>
    %5 = arith.addf %2, %4 : vector<128x128xf32>
    %6 = arith.truncf %5 : vector<128x128xf32> to vector<128x128xbf16>
    %c0_5 = arith.constant 0 : index
    %c0_6 = arith.constant 0 : index
    %7 = vector.load %arg5[%c0_5, %c0_6] : memref<128x128xbf16, #tpu.memory_space<vmem>>, vector<128x128xbf16>
    tpu.vector_store %arg5[%c0_5, %c0_6], %6 {strides = array<i32>} : memref<128x128xbf16, #tpu.memory_space<vmem>>, vector<128x128xbf16>,
    return
  }
  func.func @transform_0(%arg0: i32, %arg1: i32) -> (i32, i32) {
    %c0_i32 = arith.constant 0 : i32
    %c0_i32_0 = arith.constant 0 : i32
    return %arg0, %c0_i32 : i32, i32
  }
  func.func @transform_1(%arg0: i32, %arg1: i32) -> (i32, i32) {
    %c0_i32 = arith.constant 0 : i32
    %c0_i32_0 = arith.constant 0 : i32
    return %c0_i32, %arg1 : i32, i32
  }
  func.func @transform_2(%arg0: i32, %arg1: i32) -> (i32, i32) {
    %c0_i32 = arith.constant 0 : i32
    %c0_i32_0 = arith.constant 0 : i32
    return %c0_i32, %arg1 : i32, i32
  }
  func.func @transform_3(%arg0: i32, %arg1: i32) -> (i32, i32) {
    %c0_i32 = arith.constant 0 : i32
    return %arg0, %arg1 : i32, i32
  }
}

</mosaic_0001>

<bundles_post_ra>
// kernel: decoder_rnn_forward.5
= control target key start
LH: loop header
LB: loop body
LE: loop exit
PB: predicated region body
PF: predicated region fallthrough
CT: control target
= control target key end

     0   :  { %8 = vsyncpa [#allocation3], 0  ;;  %s429_s15 = smov [#allocation2]   ;;  %s430_s17 = smov 64   ;;  %s506_s0 = inlined_call_operand.vmem [shape: bf16[128,128], index: 0, kind: input, shape index: {}]   ;;  %s507_s1 = inlined_call_operand.hbm [shape: bf16[128,128], index: 1, kind: input, shape index: {}]   ;;  %s508_s2 = inlined_call_operand.vmem [shape: f32[1,128], index: 2, kind: input, shape index: {}]   ;;  %s509_s3 = inlined_call_operand.vmem [shape: bf16[128,128], index: 3, kind: output, shape index: {}]  }
   0x1   :  { %s15_s14 = sshll.u32 %s507_s1, 4  ;;  %s17_s16 = sshll.u32 %s429_s15, 4  ;;  %s16_s14 = int_to_ptr.hbm [resolvable:$true] %s15_s14  ;;  %s18_s16 = int_to_ptr.vmem [resolvable:$true] %s17_s16 }
   0x2   :  { %s431_s18 = smov 4  }
   0x3   :  { %23 = dma.hbm_to_vmem [thread:$0]  %s16_s14, 1024, %s18_s16, [#allocation3], %s430_s17, %s430_s17, %s431_s18  }
   0x4   :  { %427 = dma.done.wait [#allocation3], 1024  }
   0x5   :  { %428 = vsyncadd [#allocation3], 4294966272  ;;  %v327_v0 = vld [vmem:[#allocation2 + $0x38] sm:$0xff]  ;;  %v326_v1 = vld [vmem:[#allocation2 + $0x30] sm:$0xff] }
   0x6   :  { %162 = vmatpush.bf16.msra.mxu0 %v327_v0  ;;  %375 = vmatpush.bf16.msra.mxu1 %v327_v0  ;;  %v325_v2 = vld [vmem:[#allocation2 + $0x28] sm:$0xff]  ;;  %v324_v3 = vld [vmem:[#allocation2 + $0x20] sm:$0xff]  ;;  %v323_v4 = vld [vmem:[#allocation2 + $0x18] sm:$0xff] }
   0x7   :  { %376 = vmatpush.bf16.msra.mxu2 %v327_v0  ;;  %377 = vmatpush.bf16.msra.mxu3 %v327_v0  ;;  %v322_v5 = vld [vmem:[#allocation2 + $0x10] sm:$0xff]  ;;  %v321_v6 = vld [vmem:[#allocation2 + $0x8] sm:$0xff]  ;;  %v320_v7 = vld [vmem:[#allocation2] sm:$0xff] }
   0x8   :  { %v312_v8 = vld [vmem:[%s506_s0] sm:$0xff]  ;;  %v314_v9 = vld [vmem:[%s506_s0 + $0x10] sm:$0xff]  ;;  %v313_v12 = vld [vmem:[%s506_s0 + $0x8] sm:$0xff] }
   0x9   :  { %v316_v10 = vld [vmem:[%s506_s0 + $0x20] sm:$0xff]  ;;  %v318_v11 = vld [vmem:[%s506_s0 + $0x30] sm:$0xff]  ;;  %v315_v13 = vld [vmem:[%s506_s0 + $0x18] sm:$0xff] }
   0xa   :  { %163 = vmatpush.bf16.msra.mxu0 %v326_v1  ;;  %378 = vmatpush.bf16.msra.mxu1 %v326_v1  ;;  %v317_v14 = vld [vmem:[%s506_s0 + $0x28] sm:$0xff]  ;;  %v319_v15 = vld [vmem:[%s506_s0 + $0x38] sm:$0xff]  ;;  %v402_v18 = vld [vmem:[%s508_s2] ss:$0 sm:$0xff] }
   0xb   :  { %379 = vmatpush.bf16.msra.mxu2 %v326_v1  ;;  %380 = vmatpush.bf16.msra.mxu3 %v326_v1 }
   0xe   :  { %164 = vmatpush.bf16.msra.mxu0 %v325_v2  ;;  %381 = vmatpush.bf16.msra.mxu1 %v325_v2 }
   0xf   :  { %382 = vmatpush.bf16.msra.mxu2 %v325_v2  ;;  %383 = vmatpush.bf16.msra.mxu3 %v325_v2 }
  0x12   :  { %165 = vmatpush.bf16.msra.mxu0 %v324_v3  ;;  %384 = vmatpush.bf16.msra.mxu1 %v324_v3 }
  0x13   :  { %385 = vmatpush.bf16.msra.mxu2 %v324_v3  ;;  %386 = vmatpush.bf16.msra.mxu3 %v324_v3 }
  0x16   :  { %166 = vmatpush.bf16.msra.mxu0 %v323_v4  ;;  %387 = vmatpush.bf16.msra.mxu1 %v323_v4 }
  0x17   :  { %388 = vmatpush.bf16.msra.mxu2 %v323_v4  ;;  %389 = vmatpush.bf16.msra.mxu3 %v323_v4 }
  0x1a   :  { %167 = vmatpush.bf16.msra.mxu0 %v322_v5  ;;  %390 = vmatpush.bf16.msra.mxu1 %v322_v5 }
  0x1b   :  { %391 = vmatpush.bf16.msra.mxu2 %v322_v5  ;;  %392 = vmatpush.bf16.msra.mxu3 %v322_v5 }
  0x1e   :  { %168 = vmatpush.bf16.msra.mxu0 %v321_v6  ;;  %393 = vmatpush.bf16.msra.mxu1 %v321_v6 }
  0x1f   :  { %394 = vmatpush.bf16.msra.mxu2 %v321_v6  ;;  %395 = vmatpush.bf16.msra.mxu3 %v321_v6 }
  0x22   :  { %169 = vmatpush.bf16.msra.mxu0 %v320_v7  ;;  %396 = vmatpush.bf16.msra.mxu1 %v320_v7 }
  0x23   :  { %397 = vmatpush.bf16.msra.mxu2 %v320_v7  ;;  %398 = vmatpush.bf16.msra.mxu3 %v320_v7 }
  0x25   :  { %170 = vmatmul.bf16.vlgmr.msra.gmra.mxu0 %v312_v8  ;;  %180 = vmatmul.bf16.vlgmr.msra.gmra.mxu1 %v314_v9 }
  0x26   :  { %190 = vmatmul.bf16.vlgmr.msra.gmra.mxu2 %v316_v10  ;;  %200 = vmatmul.bf16.vlgmr.msra.gmra.mxu3 %v318_v11 }
  0x35   :  { %175 = vmatmul.bf16.gmra.mxu0 %v313_v12  ;;  %185 = vmatmul.bf16.gmra.mxu1 %v315_v13 }
  0x36   :  { %195 = vmatmul.bf16.gmra.mxu2 %v317_v14  ;;  %205 = vmatmul.bf16.gmra.mxu3 %v319_v15 }
  0xa2   :  { %v171_v16 = vpop.f32.mrf.mxu0  ;;  %v181_v17 = vpop.f32.mrf.mxu1 }
  0xa3   :  { %v172_v23 = vadd.f32 %v402_v18, %v171_v16  ;;  %v182_v24 = vadd.f32 %v402_v18, %v181_v17 }
  0xa9   :  { %v191_v19 = vpop.f32.mrf.mxu2  ;;  %v201_v20 = vpop.f32.mrf.mxu3 }
  0xaa   :  { %v173_v21 = vpop.f32.mrf.mxu0  ;;  %v183_v22 = vpop.f32.mrf.mxu1  ;;  %v192_v31 = vadd.f32 %v402_v18, %v191_v19  ;;  %v202_v32 = vadd.f32 %v402_v18, %v201_v20 }
  0xab   :  { %v174_v25 = vadd.f32 %v402_v18, %v173_v21  ;;  %v184_v26 = vadd.f32 %v402_v18, %v183_v22 }
  0xad   :  { %v331_v27 = vpack.c.bf16 %v174_v25, %v172_v23  ;;  %v341_v28 = vpack.c.bf16 %v184_v26, %v182_v24 }
  0xaf   :  { %332 = vst [vmem:[%s509_s3] sm:$0xff] %v331_v27  }
  0xb0   :  { %369 = vst [vmem:[%s509_s3 + $0x10] sm:$0xff] %v341_v28  }
  0xb1   :  { %v193_v29 = vpop.f32.mrf.mxu2  ;;  %v203_v30 = vpop.f32.mrf.mxu3 }
  0xb2   :  { %v194_v33 = vadd.f32 %v402_v18, %v193_v29  ;;  %v204_v34 = vadd.f32 %v402_v18, %v203_v30  ;;  %v176_v35 = vpop.f32.mrf.mxu0  ;;  %v186_v36 = vpop.f32.mrf.mxu1 }
  0xb3   :  { %v177_v43 = vadd.f32 %v402_v18, %v176_v35  ;;  %v187_v44 = vadd.f32 %v402_v18, %v186_v36 }
  0xb4   :  { %v351_v37 = vpack.c.bf16 %v194_v33, %v192_v31  ;;  %v361_v38 = vpack.c.bf16 %v204_v34, %v202_v32 }
  0xb6   :  { %371 = vst [vmem:[%s509_s3 + $0x20] sm:$0xff] %v351_v37  }
  0xb7   :  { %373 = vst [vmem:[%s509_s3 + $0x30] sm:$0xff] %v361_v38  }
  0xb9   :  { %v196_v39 = vpop.f32.mrf.mxu2  ;;  %v206_v40 = vpop.f32.mrf.mxu3 }
  0xba   :  { %v178_v41 = vpop.f32.mrf.mxu0  ;;  %v188_v42 = vpop.f32.mrf.mxu1  ;;  %v197_v51 = vadd.f32 %v402_v18, %v196_v39  ;;  %v207_v52 = vadd.f32 %v402_v18, %v206_v40 }
  0xbb   :  { %v179_v45 = vadd.f32 %v402_v18, %v178_v41  ;;  %v189_v46 = vadd.f32 %v402_v18, %v188_v42 }
  0xbd   :  { %v336_v47 = vpack.c.bf16 %v179_v45, %v177_v43  ;;  %v346_v48 = vpack.c.bf16 %v189_v46, %v187_v44 }
  0xbf   :  { %368 = vst [vmem:[%s509_s3 + $0x8] sm:$0xff] %v336_v47  }
  0xc0   :  { %370 = vst [vmem:[%s509_s3 + $0x18] sm:$0xff] %v346_v48  }
  0xc1   :  { %v198_v49 = vpop.f32.mrf.mxu2  ;;  %v208_v50 = vpop.f32.mrf.mxu3 }
  0xc2   :  { %v199_v53 = vadd.f32 %v402_v18, %v198_v49  ;;  %v209_v54 = vadd.f32 %v402_v18, %v208_v50 }
  0xc4   :  { %v356_v55 = vpack.c.bf16 %v199_v53, %v197_v51  ;;  %v366_v56 = vpack.c.bf16 %v209_v54, %v207_v52 }
  0xc6   :  { %372 = vst [vmem:[%s509_s3 + $0x28] sm:$0xff] %v356_v55  }
  0xc7   :  { %374 = vst [vmem:[%s509_s3 + $0x38] sm:$0xff] %v366_v56  }
  0xc8   :  { %247 = vsyncpa [#allocation3], 1 }

// kernel: decoder_rnn_forward.3
= control target key start
LH: loop header
LB: loop body
LE: loop exit
PB: predicated region body
PF: predicated region fallthrough
CT: control target
= control target key end

     0   :  { %8 = vsyncpa [#allocation3], 0  ;;  %s576_s15 = smov [#allocation2]   ;;  %s577_s17 = smov 256   ;;  %s829_s0 = inlined_call_operand.vmem [shape: bf16[128,32], index: 0, kind: input, shape index: {}]   ;;  %s830_s1 = inlined_call_operand.hbm [shape: bf16[32,512], index: 1, kind: input, shape index: {}]   ;;  %s831_s2 = inlined_call_operand.vmem [shape: f32[1,512], index: 2, kind: input, shape index: {}]   ;;  %s832_s3 = inlined_call_operand.vmem [shape: bf16[128,512], index: 3, kind: output, shape index: {}]  }
   0x1   :  { %s15_s14 = sshll.u32 %s830_s1, 4  ;;  %s17_s16 = sshll.u32 %s576_s15, 4  ;;  %s16_s14 = int_to_ptr.hbm [resolvable:$true] %s15_s14  ;;  %s18_s16 = int_to_ptr.vmem [resolvable:$true] %s17_s16 }
   0x2   :  { %s578_s18 = smov 16  }
   0x3   :  { %23 = dma.hbm_to_vmem [thread:$0]  %s16_s14, 1024, %s18_s16, [#allocation3], %s577_s17, %s577_s17, %s578_s18  }
   0x4   :  { %574 = dma.done.wait [#allocation3], 1024  }
   0x5   :  { %575 = vsyncadd [#allocation3], 4294966272  ;;  %v485_v0 = vld [vmem:[#allocation2 + $0x20] sm:$0xf]  ;;  %v545_v1 = vld [vmem:[#allocation2 + $0x2c] sm:$0xf0] }
   0x6   :  { %v543_v2 = vld [vmem:[#allocation2 + $0x24] sm:$0xf]  ;;  %v486_v3 = vor.u32 %v545_v1, %v485_v0  ;;  %v487_v4 = vld [vmem:[#allocation2 + $0x30] sm:$0xf0]  ;;  %v493_v5 = vld [vmem:[#allocation2 + $0x28] sm:$0xf] }
   0x7   :  { %v546_v6 = vld [vmem:[#allocation2 + $0x34] sm:$0xf0]  ;;  %v490_v7 = vor.u32 %v543_v2, %v487_v4  ;;  %v544_v9 = vld [vmem:[#allocation2 + $0x2c] sm:$0xf]  ;;  %v495_v10 = vld [vmem:[#allocation2 + $0x38] sm:$0xf0] }
   0x8   :  { %v494_v8 = vor.u32 %v546_v6, %v493_v5  ;;  %v469_v11 = vld [vmem:[#allocation2] sm:$0xf]  ;;  %176 = vmatpush.bf16.msra.mxu0 %v486_v3  ;;  %v498_v12 = vor.u32 %v544_v9, %v495_v10  ;;  %v541_v13 = vld [vmem:[#allocation2 + $0xc] sm:$0xf0]  ;;  %v539_v14 = vld [vmem:[#allocation2 + $0x4] sm:$0xf] }
   0x9   :  { %v471_v15 = vld [vmem:[#allocation2 + $0x10] sm:$0xf0]  ;;  %225 = vmatpush.bf16.msra.mxu1 %v490_v7  ;;  %v470_v16 = vor.u32 %v541_v13, %v469_v11  ;;  %v477_v18 = vld [vmem:[#allocation2 + $0x8] sm:$0xf]  ;;  %v542_v19 = vld [vmem:[#allocation2 + $0x14] sm:$0xf0] }
   0xa   :  { %274 = vmatpush.bf16.msra.mxu2 %v494_v8  ;;  %v474_v17 = vor.u32 %v539_v14, %v471_v15  ;;  %v540_v20 = vld [vmem:[#allocation2 + $0xc] sm:$0xf]  ;;  %323 = vmatpush.bf16.msra.mxu3 %v498_v12  ;;  %v478_v21 = vor.u32 %v542_v19, %v477_v18  ;;  %v479_v22 = vld [vmem:[#allocation2 + $0x18] sm:$0xf0]  ;;  %v531_v24 = vld [vmem:[%s829_s0] sm:$0xff]  ;;  %vm145_vm0 = vcmask 261120  }
   0xb   :  { %v482_v23 = vor.u32 %v540_v20, %v479_v22  ;;  %v532_v25 = vld [vmem:[%s829_s0 + $0x8] sm:$0xff]  ;;  %v533_v26 = vld [vmem:[%s829_s0 + $0x10] sm:$0xff]  ;;  %v534_v27 = vld [vmem:[%s829_s0 + $0x18] sm:$0xff] }
   0xc   :  { %177 = vmatpush.bf16.msra.mxu0 %v470_v16  ;;  %v535_v28 = vld [vmem:[%s829_s0 + $0x20] sm:$0xff]  ;;  %v536_v29 = vld [vmem:[%s829_s0 + $0x28] sm:$0xff]  ;;  %v537_v30 = vld [vmem:[%s829_s0 + $0x30] sm:$0xff] }
   0xd   :  { %226 = vmatpush.bf16.msra.mxu1 %v474_v17  ;;  %v538_v31 = vld [vmem:[%s829_s0 + $0x38] sm:$0xff]  ;;  %v55_v32 = vld [vmem:[%s831_s2] sm:$0xf] }
   0xe   :  { %275 = vmatpush.bf16.msra.mxu2 %v478_v21  ;;  %324 = vmatpush.bf16.msra.mxu3 %v482_v23  ;;  %v661_v33 = vperm.slane %v55_v32, 0  ;;  %v663_v34 = vperm.slane %v55_v32, 1  ;;  %v667_v40 = vperm.slane %v55_v32, 2  ;;  %v669_v41 = vperm.slane %v55_v32, 3 }
   0xf   :  { %499 = vmatmul.msk.bf16.vlgmr.msra.gmra.mxu0 %vm145_vm0, %v531_v24 }
  0x10   :  { %507 = vmatmul.msk.bf16.vlgmr.msra.gmra.mxu1 %vm145_vm0, %v531_v24 }
  0x11   :  { %515 = vmatmul.msk.bf16.vlgmr.msra.gmra.mxu2 %vm145_vm0, %v531_v24  ;;  %523 = vmatmul.msk.bf16.vlgmr.msra.gmra.mxu3 %vm145_vm0, %v531_v24 }
  0x1f   :  { %500 = vmatmul.msk.bf16.gmra.mxu0 %vm145_vm0, %v532_v25 }
  0x20   :  { %508 = vmatmul.msk.bf16.gmra.mxu1 %vm145_vm0, %v532_v25 }
  0x21   :  { %516 = vmatmul.msk.bf16.gmra.mxu2 %vm145_vm0, %v532_v25  ;;  %524 = vmatmul.msk.bf16.gmra.mxu3 %vm145_vm0, %v532_v25 }
  0x2f   :  { %501 = vmatmul.msk.bf16.gmra.mxu0 %vm145_vm0, %v533_v26 }
  0x30   :  { %509 = vmatmul.msk.bf16.gmra.mxu1 %vm145_vm0, %v533_v26 }
  0x31   :  { %517 = vmatmul.msk.bf16.gmra.mxu2 %vm145_vm0, %v533_v26  ;;  %525 = vmatmul.msk.bf16.gmra.mxu3 %vm145_vm0, %v533_v26 }
  0x3f   :  { %502 = vmatmul.msk.bf16.gmra.mxu0 %vm145_vm0, %v534_v27 }
  0x40   :  { %510 = vmatmul.msk.bf16.gmra.mxu1 %vm145_vm0, %v534_v27 }
  0x41   :  { %518 = vmatmul.msk.bf16.gmra.mxu2 %vm145_vm0, %v534_v27  ;;  %526 = vmatmul.msk.bf16.gmra.mxu3 %vm145_vm0, %v534_v27 }
  0x4f   :  { %503 = vmatmul.msk.bf16.gmra.mxu0 %vm145_vm0, %v535_v28 }
  0x50   :  { %511 = vmatmul.msk.bf16.gmra.mxu1 %vm145_vm0, %v535_v28 }
  0x51   :  { %519 = vmatmul.msk.bf16.gmra.mxu2 %vm145_vm0, %v535_v28  ;;  %527 = vmatmul.msk.bf16.gmra.mxu3 %vm145_vm0, %v535_v28 }
  0x5f   :  { %504 = vmatmul.msk.bf16.gmra.mxu0 %vm145_vm0, %v536_v29 }
  0x60   :  { %512 = vmatmul.msk.bf16.gmra.mxu1 %vm145_vm0, %v536_v29 }
  0x61   :  { %520 = vmatmul.msk.bf16.gmra.mxu2 %vm145_vm0, %v536_v29  ;;  %528 = vmatmul.msk.bf16.gmra.mxu3 %vm145_vm0, %v536_v29 }
  0x6f   :  { %505 = vmatmul.msk.bf16.gmra.mxu0 %vm145_vm0, %v537_v30 }
  0x70   :  { %513 = vmatmul.msk.bf16.gmra.mxu1 %vm145_vm0, %v537_v30 }
  0x71   :  { %521 = vmatmul.msk.bf16.gmra.mxu2 %vm145_vm0, %v537_v30  ;;  %529 = vmatmul.msk.bf16.gmra.mxu3 %vm145_vm0, %v537_v30 }
  0x7f   :  { %506 = vmatmul.msk.bf16.gmra.mxu0 %vm145_vm0, %v538_v31 }
  0x80   :  { %514 = vmatmul.msk.bf16.gmra.mxu1 %vm145_vm0, %v538_v31 }
  0x81   :  { %522 = vmatmul.msk.bf16.gmra.mxu2 %vm145_vm0, %v538_v31  ;;  %530 = vmatmul.msk.bf16.gmra.mxu3 %vm145_vm0, %v538_v31 }
  0x8c   :  { %v179_v35 = vpop.f32.mrf.mxu0 }
  0x8d   :  { %v180_v36 = vadd.f32 %v179_v35, %v661_v33  ;;  %v228_v37 = vpop.f32.mrf.mxu1 }
  0x8e   :  { %v229_v38 = vadd.f32 %v228_v37, %v663_v34 }
  0x90   :  { %v366_v39 = vpack.c.bf16 %v229_v38, %v180_v36 }
  0x92   :  { %398 = vst [vmem:[%s832_s3] sm:$0xff] %v366_v39 }
  0x94   :  { %v277_v42 = vpop.f32.mrf.mxu2  ;;  %v326_v44 = vpop.f32.mrf.mxu3 }
  0x95   :  { %v278_v43 = vadd.f32 %v277_v42, %v667_v40  ;;  %v181_v45 = vpop.f32.mrf.mxu0  ;;  %v327_v46 = vadd.f32 %v326_v44, %v669_v41  ;;  %v230_v48 = vpop.f32.mrf.mxu1 }
  0x96   :  { %v182_v47 = vadd.f32 %v181_v45, %v661_v33  ;;  %v231_v49 = vadd.f32 %v230_v48, %v663_v34 }
  0x97   :  { %v367_v50 = vpack.c.bf16 %v327_v46, %v278_v43 }
  0x98   :  { %v368_v51 = vpack.c.bf16 %v231_v49, %v182_v47 }
  0x99   :  { %399 = vst [vmem:[%s832_s3 + $0x8] sm:$0xff] %v367_v50 }
  0x9a   :  { %400 = vst [vmem:[%s832_s3 + $0x10] sm:$0xff] %v368_v51 }
  0x9c   :  { %v279_v52 = vpop.f32.mrf.mxu2  ;;  %v328_v54 = vpop.f32.mrf.mxu3 }
  0x9d   :  { %v280_v53 = vadd.f32 %v279_v52, %v667_v40  ;;  %v184_v55 = vpop.f32.mrf.mxu0  ;;  %v329_v56 = vadd.f32 %v328_v54, %v669_v41  ;;  %v233_v58 = vpop.f32.mrf.mxu1 }
  0x9e   :  { %v185_v57 = vadd.f32 %v184_v55, %v661_v33  ;;  %v234_v59 = vadd.f32 %v233_v58, %v663_v34 }
  0x9f   :  { %v369_v60 = vpack.c.bf16 %v329_v56, %v280_v53 }
  0xa0   :  { %v370_v61 = vpack.c.bf16 %v234_v59, %v185_v57 }
  0xa1   :  { %401 = vst [vmem:[%s832_s3 + $0x18] sm:$0xff] %v369_v60 }
  0xa2   :  { %402 = vst [vmem:[%s832_s3 + $0x20] sm:$0xff] %v370_v61 }
  0xa4   :  { %v282_v62 = vpop.f32.mrf.mxu2  ;;  %v331_v0 = vpop.f32.mrf.mxu3 }
  0xa5   :  { %v283_v63 = vadd.f32 %v282_v62, %v667_v40  ;;  %v186_v1 = vpop.f32.mrf.mxu0  ;;  %v332_v2 = vadd.f32 %v331_v0, %v669_v41  ;;  %v235_v4 = vpop.f32.mrf.mxu1 }
  0xa6   :  { %v187_v3 = vadd.f32 %v186_v1, %v661_v33  ;;  %v236_v5 = vadd.f32 %v235_v4, %v663_v34 }
  0xa7   :  { %v371_v6 = vpack.c.bf16 %v332_v2, %v283_v63 }
  0xa8   :  { %v372_v7 = vpack.c.bf16 %v236_v5, %v187_v3 }
  0xa9   :  { %403 = vst [vmem:[%s832_s3 + $0x28] sm:$0xff] %v371_v6 }
  0xaa   :  { %404 = vst [vmem:[%s832_s3 + $0x30] sm:$0xff] %v372_v7 }
  0xac   :  { %v284_v8 = vpop.f32.mrf.mxu2  ;;  %v333_v10 = vpop.f32.mrf.mxu3 }
  0xad   :  { %v285_v9 = vadd.f32 %v284_v8, %v667_v40  ;;  %v189_v11 = vpop.f32.mrf.mxu0  ;;  %v334_v12 = vadd.f32 %v333_v10, %v669_v41  ;;  %v238_v14 = vpop.f32.mrf.mxu1 }
  0xae   :  { %v190_v13 = vadd.f32 %v189_v11, %v661_v33  ;;  %v239_v15 = vadd.f32 %v238_v14, %v663_v34 }
  0xaf   :  { %v373_v16 = vpack.c.bf16 %v334_v12, %v285_v9 }
  0xb0   :  { %v374_v17 = vpack.c.bf16 %v239_v15, %v190_v13 }
  0xb1   :  { %405 = vst [vmem:[%s832_s3 + $0x38] sm:$0xff] %v373_v16 }
  0xb2   :  { %406 = vst [vmem:[%s832_s3 + $0x40] sm:$0xff] %v374_v17 }
  0xb4   :  { %v287_v18 = vpop.f32.mrf.mxu2  ;;  %v336_v20 = vpop.f32.mrf.mxu3 }
  0xb5   :  { %v288_v19 = vadd.f32 %v287_v18, %v667_v40  ;;  %v191_v21 = vpop.f32.mrf.mxu0  ;;  %v337_v22 = vadd.f32 %v336_v20, %v669_v41  ;;  %v240_v24 = vpop.f32.mrf.mxu1 }
  0xb6   :  { %v192_v23 = vadd.f32 %v191_v21, %v661_v33  ;;  %v241_v25 = vadd.f32 %v240_v24, %v663_v34 }
  0xb7   :  { %v375_v26 = vpack.c.bf16 %v337_v22, %v288_v19 }
  0xb8   :  { %v376_v27 = vpack.c.bf16 %v241_v25, %v192_v23 }
  0xb9   :  { %407 = vst [vmem:[%s832_s3 + $0x48] sm:$0xff] %v375_v26 }
  0xba   :  { %408 = vst [vmem:[%s832_s3 + $0x50] sm:$0xff] %v376_v27 }
  0xbc   :  { %v289_v28 = vpop.f32.mrf.mxu2  ;;  %v338_v30 = vpop.f32.mrf.mxu3 }
  0xbd   :  { %v290_v29 = vadd.f32 %v289_v28, %v667_v40  ;;  %v194_v31 = vpop.f32.mrf.mxu0  ;;  %v339_v32 = vadd.f32 %v338_v30, %v669_v41  ;;  %v243_v36 = vpop.f32.mrf.mxu1 }
  0xbe   :  { %v195_v35 = vadd.f32 %v194_v31, %v661_v33  ;;  %v244_v37 = vadd.f32 %v243_v36, %v663_v34 }
  0xbf   :  { %v377_v38 = vpack.c.bf16 %v339_v32, %v290_v29 }
  0xc0   :  { %v378_v39 = vpack.c.bf16 %v244_v37, %v195_v35 }
  0xc1   :  { %409 = vst [vmem:[%s832_s3 + $0x58] sm:$0xff] %v377_v38 }
  0xc2   :  { %410 = vst [vmem:[%s832_s3 + $0x60] sm:$0xff] %v378_v39 }
  0xc4   :  { %v292_v42 = vpop.f32.mrf.mxu2  ;;  %v341_v44 = vpop.f32.mrf.mxu3 }
  0xc5   :  { %v293_v43 = vadd.f32 %v292_v42, %v667_v40  ;;  %v196_v45 = vpop.f32.mrf.mxu0  ;;  %v342_v46 = vadd.f32 %v341_v44, %v669_v41  ;;  %v245_v48 = vpop.f32.mrf.mxu1 }
  0xc6   :  { %v197_v47 = vadd.f32 %v196_v45, %v661_v33  ;;  %v246_v49 = vadd.f32 %v245_v48, %v663_v34 }
  0xc7   :  { %v379_v50 = vpack.c.bf16 %v342_v46, %v293_v43 }
  0xc8   :  { %v380_v51 = vpack.c.bf16 %v246_v49, %v197_v47 }
  0xc9   :  { %411 = vst [vmem:[%s832_s3 + $0x68] sm:$0xff] %v379_v50 }
  0xca   :  { %412 = vst [vmem:[%s832_s3 + $0x70] sm:$0xff] %v380_v51 }
  0xcc   :  { %v294_v52 = vpop.f32.mrf.mxu2  ;;  %v343_v54 = vpop.f32.mrf.mxu3 }
  0xcd   :  { %v295_v53 = vadd.f32 %v294_v52, %v667_v40  ;;  %v199_v55 = vpop.f32.mrf.mxu0  ;;  %v344_v56 = vadd.f32 %v343_v54, %v669_v41  ;;  %v248_v58 = vpop.f32.mrf.mxu1 }
  0xce   :  { %v200_v57 = vadd.f32 %v199_v55, %v661_v33  ;;  %v249_v59 = vadd.f32 %v248_v58, %v663_v34 }
  0xcf   :  { %v381_v60 = vpack.c.bf16 %v344_v56, %v295_v53 }
  0xd0   :  { %v382_v61 = vpack.c.bf16 %v249_v59, %v200_v57 }
  0xd1   :  { %413 = vst [vmem:[%s832_s3 + $0x78] sm:$0xff] %v381_v60 }
  0xd2   :  { %414 = vst [vmem:[%s832_s3 + $0x80] sm:$0xff] %v382_v61 }
  0xd4   :  { %v297_v62 = vpop.f32.mrf.mxu2  ;;  %v346_v0 = vpop.f32.mrf.mxu3 }
  0xd5   :  { %v298_v63 = vadd.f32 %v297_v62, %v667_v40  ;;  %v201_v1 = vpop.f32.mrf.mxu0  ;;  %v347_v2 = vadd.f32 %v346_v0, %v669_v41  ;;  %v250_v4 = vpop.f32.mrf.mxu1 }
  0xd6   :  { %v202_v3 = vadd.f32 %v201_v1, %v661_v33  ;;  %v251_v5 = vadd.f32 %v250_v4, %v663_v34 }
  0xd7   :  { %v383_v6 = vpack.c.bf16 %v347_v2, %v298_v63 }
  0xd8   :  { %v384_v7 = vpack.c.bf16 %v251_v5, %v202_v3 }
  0xd9   :  { %415 = vst [vmem:[%s832_s3 + $0x88] sm:$0xff] %v383_v6 }
  0xda   :  { %416 = vst [vmem:[%s832_s3 + $0x90] sm:$0xff] %v384_v7 }
  0xdc   :  { %v299_v8 = vpop.f32.mrf.mxu2  ;;  %v348_v10 = vpop.f32.mrf.mxu3 }
  0xdd   :  { %v300_v9 = vadd.f32 %v299_v8, %v667_v40  ;;  %v204_v11 = vpop.f32.mrf.mxu0  ;;  %v349_v12 = vadd.f32 %v348_v10, %v669_v41  ;;  %v253_v14 = vpop.f32.mrf.mxu1 }
  0xde   :  { %v205_v13 = vadd.f32 %v204_v11, %v661_v33  ;;  %v254_v15 = vadd.f32 %v253_v14, %v663_v34 }
  0xdf   :  { %v385_v16 = vpack.c.bf16 %v349_v12, %v300_v9 }
  0xe0   :  { %v386_v17 = vpack.c.bf16 %v254_v15, %v205_v13 }
  0xe1   :  { %417 = vst [vmem:[%s832_s3 + $0x98] sm:$0xff] %v385_v16 }
  0xe2   :  { %418 = vst [vmem:[%s832_s3 + $0xa0] sm:$0xff] %v386_v17 }
  0xe4   :  { %v302_v18 = vpop.f32.mrf.mxu2  ;;  %v351_v20 = vpop.f32.mrf.mxu3 }
  0xe5   :  { %v303_v19 = vadd.f32 %v302_v18, %v667_v40  ;;  %v206_v21 = vpop.f32.mrf.mxu0  ;;  %v352_v22 = vadd.f32 %v351_v20, %v669_v41  ;;  %v255_v24 = vpop.f32.mrf.mxu1 }
  0xe6   :  { %v207_v23 = vadd.f32 %v206_v21, %v661_v33  ;;  %v256_v25 = vadd.f32 %v255_v24, %v663_v34 }
  0xe7   :  { %v387_v26 = vpack.c.bf16 %v352_v22, %v303_v19 }
  0xe8   :  { %v388_v27 = vpack.c.bf16 %v256_v25, %v207_v23 }
  0xe9   :  { %419 = vst [vmem:[%s832_s3 + $0xa8] sm:$0xff] %v387_v26 }
  0xea   :  { %420 = vst [vmem:[%s832_s3 + $0xb0] sm:$0xff] %v388_v27 }
  0xec   :  { %v304_v28 = vpop.f32.mrf.mxu2  ;;  %v353_v30 = vpop.f32.mrf.mxu3 }
  0xed   :  { %v305_v29 = vadd.f32 %v304_v28, %v667_v40  ;;  %v209_v31 = vpop.f32.mrf.mxu0  ;;  %v354_v32 = vadd.f32 %v353_v30, %v669_v41  ;;  %v258_v36 = vpop.f32.mrf.mxu1 }
  0xee   :  { %v210_v35 = vadd.f32 %v209_v31, %v661_v33  ;;  %v259_v37 = vadd.f32 %v258_v36, %v663_v34 }
  0xef   :  { %v389_v38 = vpack.c.bf16 %v354_v32, %v305_v29 }
  0xf0   :  { %v390_v39 = vpack.c.bf16 %v259_v37, %v210_v35 }
  0xf1   :  { %421 = vst [vmem:[%s832_s3 + $0xb8] sm:$0xff] %v389_v38 }
  0xf2   :  { %422 = vst [vmem:[%s832_s3 + $0xc0] sm:$0xff] %v390_v39 }
  0xf4   :  { %v307_v42 = vpop.f32.mrf.mxu2  ;;  %v356_v44 = vpop.f32.mrf.mxu3 }
  0xf5   :  { %v308_v43 = vadd.f32 %v307_v42, %v667_v40  ;;  %v211_v45 = vpop.f32.mrf.mxu0  ;;  %v357_v46 = vadd.f32 %v356_v44, %v669_v41  ;;  %v260_v48 = vpop.f32.mrf.mxu1 }
  0xf6   :  { %v212_v47 = vadd.f32 %v211_v45, %v661_v33  ;;  %v261_v49 = vadd.f32 %v260_v48, %v663_v34 }
  0xf7   :  { %v391_v50 = vpack.c.bf16 %v357_v46, %v308_v43 }
  0xf8   :  { %v392_v51 = vpack.c.bf16 %v261_v49, %v212_v47 }
  0xf9   :  { %423 = vst [vmem:[%s832_s3 + $0xc8] sm:$0xff] %v391_v50 }
  0xfa   :  { %424 = vst [vmem:[%s832_s3 + $0xd0] sm:$0xff] %v392_v51 }
  0xfc   :  { %v309_v52 = vpop.f32.mrf.mxu2  ;;  %v358_v54 = vpop.f32.mrf.mxu3 }
  0xfd   :  { %v310_v53 = vadd.f32 %v309_v52, %v667_v40  ;;  %v214_v55 = vpop.f32.mrf.mxu0  ;;  %v359_v56 = vadd.f32 %v358_v54, %v669_v41  ;;  %v263_v58 = vpop.f32.mrf.mxu1 }
  0xfe   :  { %v215_v57 = vadd.f32 %v214_v55, %v661_v33  ;;  %v264_v59 = vadd.f32 %v263_v58, %v663_v34 }
  0xff   :  { %v393_v60 = vpack.c.bf16 %v359_v56, %v310_v53 }
 0x100   :  { %v394_v61 = vpack.c.bf16 %v264_v59, %v215_v57 }
 0x101   :  { %425 = vst [vmem:[%s832_s3 + $0xd8] sm:$0xff] %v393_v60 }
 0x102   :  { %426 = vst [vmem:[%s832_s3 + $0xe0] sm:$0xff] %v394_v61 }
 0x104   :  { %v312_v62 = vpop.f32.mrf.mxu2  ;;  %v361_v0 = vpop.f32.mrf.mxu3 }
 0x105   :  { %v313_v63 = vadd.f32 %v312_v62, %v667_v40  ;;  %v216_v1 = vpop.f32.mrf.mxu0  ;;  %v362_v2 = vadd.f32 %v361_v0, %v669_v41  ;;  %v265_v4 = vpop.f32.mrf.mxu1 }
 0x106   :  { %v217_v3 = vadd.f32 %v216_v1, %v661_v33  ;;  %v266_v5 = vadd.f32 %v265_v4, %v663_v34 }
 0x107   :  { %v395_v6 = vpack.c.bf16 %v362_v2, %v313_v63 }
 0x108   :  { %v396_v7 = vpack.c.bf16 %v266_v5, %v217_v3 }
 0x109   :  { %427 = vst [vmem:[%s832_s3 + $0xe8] sm:$0xff] %v395_v6 }
 0x10a   :  { %428 = vst [vmem:[%s832_s3 + $0xf0] sm:$0xff] %v396_v7 }
 0x10c   :  { %v314_v8 = vpop.f32.mrf.mxu2  ;;  %v363_v10 = vpop.f32.mrf.mxu3 }
 0x10d   :  { %v315_v9 = vadd.f32 %v314_v8, %v667_v40  ;;  %v364_v11 = vadd.f32 %v363_v10, %v669_v41 }
 0x10f   :  { %v397_v33 = vpack.c.bf16 %v364_v11, %v315_v9 }
 0x111   :  { %429 = vst [vmem:[%s832_s3 + $0xf8] sm:$0xff] %v397_v33 }
 0x112   :  { %434 = vsyncpa [#allocation3], 1 }

// kernel: decoder_rnn_forward.4
= control target key start
LH: loop header
LB: loop body
LE: loop exit
PB: predicated region body
PF: predicated region fallthrough
CT: control target
= control target key end

     0   :  { %s5453_s1 = inlined_call_operand.vmem [shape: bf16[128,512], index: 1, kind: input, shape index: {}]   ;;  %s5454_s0 = inlined_call_operand.vmem [shape: bf16[8,16,512], index: 0, kind: input, shape index: {}]   ;;  %s5455_s2 = inlined_call_operand.vmem [shape: bf16[16,8,128], index: 2, kind: output, shape index: {}]  }
   0x1   :  { %v3009_v0 = vld [vmem:[%s5453_s1 + $0xe0] sm:$0xf]  ;;  %v3194_v1 = vld [vmem:[%s5453_s1 + $0xec] sm:$0xf0]  ;;  %v3192_v2 = vld [vmem:[%s5453_s1 + $0xe4] sm:$0xf] }
   0x2   :  { %v3483_v3 = vor.u32 %v3194_v1, %v3009_v0  ;;  %v3011_v4 = vld [vmem:[%s5453_s1 + $0xf0] sm:$0xf0]  ;;  %v3193_v5 = vld [vmem:[%s5453_s1 + $0xec] sm:$0xf]  ;;  %v3019_v6 = vld [vmem:[%s5453_s1 + $0xf8] sm:$0xf0] }
   0x3   :  { %v3494_v7 = vor.u32 %v3192_v2, %v3011_v4  ;;  %v3496_v8 = vor.u32 %v3193_v5, %v3019_v6  ;;  %v2993_v9 = vld [vmem:[%s5453_s1 + $0xc0] sm:$0xf]  ;;  %v3190_v10 = vld [vmem:[%s5453_s1 + $0xcc] sm:$0xf0]  ;;  %v3188_v11 = vld [vmem:[%s5453_s1 + $0xc4] sm:$0xf] }
   0x4   :  { %234 = vmatpush.bf16.msra.mxu0 %v3483_v3  ;;  %v3508_v12 = vor.u32 %v3190_v10, %v2993_v9  ;;  %v2995_v13 = vld [vmem:[%s5453_s1 + $0xd0] sm:$0xf0]  ;;  %v3189_v14 = vld [vmem:[%s5453_s1 + $0xcc] sm:$0xf]  ;;  %v3003_v15 = vld [vmem:[%s5453_s1 + $0xd8] sm:$0xf0] }
   0x5   :  { %248 = vmatpush.bf16.msra.mxu1 %v3494_v7  ;;  %276 = vmatpush.bf16.msra.mxu3 %v3496_v8  ;;  %v3521_v16 = vor.u32 %v3188_v11, %v2995_v13  ;;  %v3523_v17 = vor.u32 %v3189_v14, %v3003_v15  ;;  %v3017_v18 = vld [vmem:[%s5453_s1 + $0xe8] sm:$0xf]  ;;  %v3195_v19 = vld [vmem:[%s5453_s1 + $0xf4] sm:$0xf0]  ;;  %v2977_v20 = vld [vmem:[%s5453_s1 + $0xa0] sm:$0xf] }
   0x6   :  { %v3534_v21 = vor.u32 %v3195_v19, %v3017_v18  ;;  %v3186_v22 = vld [vmem:[%s5453_s1 + $0xac] sm:$0xf0]  ;;  %v3184_v23 = vld [vmem:[%s5453_s1 + $0xa4] sm:$0xf]  ;;  %v2979_v24 = vld [vmem:[%s5453_s1 + $0xb0] sm:$0xf0] }
   0x7   :  { %v3185_v25 = vld [vmem:[%s5453_s1 + $0xac] sm:$0xf]  ;;  %v2987_v26 = vld [vmem:[%s5453_s1 + $0xb8] sm:$0xf0]  ;;  %v3001_v27 = vld [vmem:[%s5453_s1 + $0xc8] sm:$0xf]  ;;  %v3556_v28 = vor.u32 %v3186_v22, %v2977_v20  ;;  %v3569_v32 = vor.u32 %v3184_v23, %v2979_v24 }
   0x8   :  { %235 = vmatpush.bf16.msra.mxu0 %v3508_v12  ;;  %262 = vmatpush.bf16.msra.mxu2 %v3534_v21  ;;  %v3191_v29 = vld [vmem:[%s5453_s1 + $0xd4] sm:$0xf0]  ;;  %v2961_v30 = vld [vmem:[%s5453_s1 + $0x80] sm:$0xf]  ;;  %v3182_v31 = vld [vmem:[%s5453_s1 + $0x8c] sm:$0xf0]  ;;  %v3571_v33 = vor.u32 %v3185_v25, %v2987_v26 }
   0x9   :  { %5514 = vst [vmem:[#allocation4_spill] sm:$0xff] %v3556_v28  ;;  %249 = vmatpush.bf16.msra.mxu1 %v3521_v16  ;;  %277 = vmatpush.bf16.msra.mxu3 %v3523_v17  ;;  %v3573_v34 = vor.u32 %v3191_v29, %v3001_v27  ;;  %v3180_v35 = vld [vmem:[%s5453_s1 + $0x84] sm:$0xf]  ;;  %v2963_v36 = vld [vmem:[%s5453_s1 + $0x90] sm:$0xf0]  ;;  %v3595_v41 = vor.u32 %v3182_v31, %v2961_v30  ;;  %v3458_v15 = vmov 0  }
   0xa   :  { %5515 = vst [vmem:[#allocation5_spill] sm:$0xff] %v3569_v32  ;;  %v3181_v37 = vld [vmem:[%s5453_s1 + $0x8c] sm:$0xf]  ;;  %v2971_v38 = vld [vmem:[%s5453_s1 + $0x98] sm:$0xf0]  ;;  %v3607_v45 = vor.u32 %v3180_v35, %v2963_v36 }
   0xb   :  { %5516 = vst [vmem:[#allocation6_spill] sm:$0xff] %v3571_v33  ;;  %v2985_v39 = vld [vmem:[%s5453_s1 + $0xa8] sm:$0xf]  ;;  %v3187_v40 = vld [vmem:[%s5453_s1 + $0xb4] sm:$0xf0]  ;;  %v3609_v46 = vor.u32 %v3181_v37, %v2971_v38 }
   0xc   :  { %236 = vmatpush.bf16.msra.mxu0 %v3556_v28  ;;  %263 = vmatpush.bf16.msra.mxu2 %v3573_v34  ;;  %5517 = vst [vmem:[#allocation7_spill] sm:$0xff] %v3595_v41  ;;  %v3597_v42 = vor.u32 %v3187_v40, %v2985_v39  ;;  %v2945_v43 = vld [vmem:[%s5453_s1 + $0x60] sm:$0xf]  ;;  %v3178_v44 = vld [vmem:[%s5453_s1 + $0x6c] sm:$0xf0] }
   0xd   :  { %250 = vmatpush.bf16.msra.mxu1 %v3569_v32  ;;  %278 = vmatpush.bf16.msra.mxu3 %v3571_v33  ;;  %5519 = vst [vmem:[#allocation9_spill] sm:$0xff] %v3607_v45  ;;  %v3176_v47 = vld [vmem:[%s5453_s1 + $0x64] sm:$0xf]  ;;  %v2969_v48 = vld [vmem:[%s5453_s1 + $0x88] sm:$0xf]  ;;  %v3631_v53 = vor.u32 %v3178_v44, %v2945_v43 }
   0xe   :  { %5518 = vst [vmem:[#allocation8_spill] sm:$0xff] %v3597_v42  ;;  %v3183_v49 = vld [vmem:[%s5453_s1 + $0x94] sm:$0xf0]  ;;  %v2947_v50 = vld [vmem:[%s5453_s1 + $0x70] sm:$0xf0] }
   0xf   :  { %5520 = vst [vmem:[#allocation10_spill] sm:$0xff] %v3609_v46  ;;  %v3177_v51 = vld [vmem:[%s5453_s1 + $0x6c] sm:$0xf]  ;;  %v2955_v52 = vld [vmem:[%s5453_s1 + $0x78] sm:$0xf0]  ;;  %v3633_v54 = vor.u32 %v3183_v49, %v2969_v48  ;;  %v3643_v57 = vor.u32 %v3176_v47, %v2947_v50  ;;  %v24_v49 = vld [vmem:[%s5454_s0] sm:$0xff] }
  0x10   :  { %237 = vmatpush.bf16.msra.mxu0 %v3595_v41  ;;  %264 = vmatpush.bf16.msra.mxu2 %v3597_v42  ;;  %5521 = vst [vmem:[#allocation11_spill] sm:$0xff] %v3631_v53  ;;  %v2929_v55 = vld [vmem:[%s5453_s1 + $0x40] sm:$0xf]  ;;  %v3174_v56 = vld [vmem:[%s5453_s1 + $0x4c] sm:$0xf0]  ;;  %v3645_v58 = vor.u32 %v3177_v51, %v2955_v52  ;;  %v28_v50 = vunpack.c.l.bf16 %v24_v49  ;;  %v29_v51 = vunpack.c.h.bf16 %v24_v49 }
  0x11   :  { %5522 = vst [vmem:[#allocation12_spill] sm:$0xff] %v3633_v54  ;;  %251 = vmatpush.bf16.msra.mxu1 %v3607_v45  ;;  %279 = vmatpush.bf16.msra.mxu3 %v3609_v46  ;;  %v3172_v59 = vld [vmem:[%s5453_s1 + $0x44] sm:$0xf]  ;;  %v2953_v60 = vld [vmem:[%s5453_s1 + $0x68] sm:$0xf]  ;;  %v3670_v2 = vor.u32 %v3174_v56, %v2929_v55 }
  0x12   :  { %5523 = vst [vmem:[#allocation13_spill] sm:$0xff] %v3643_v57  ;;  %v3179_v61 = vld [vmem:[%s5453_s1 + $0x74] sm:$0xf0]  ;;  %v2931_v62 = vld [vmem:[%s5453_s1 + $0x50] sm:$0xf0] }
  0x13   :  { %5524 = vst [vmem:[#allocation14_spill] sm:$0xff] %v3645_v58  ;;  %v3173_v63 = vld [vmem:[%s5453_s1 + $0x4c] sm:$0xf]  ;;  %v2939_v0 = vld [vmem:[%s5453_s1 + $0x58] sm:$0xf0]  ;;  %v3672_v4 = vor.u32 %v3179_v61, %v2953_v60  ;;  %v3685_v10 = vor.u32 %v3172_v59, %v2931_v62  ;;  %v26_v61 = vld [vmem:[%s5454_s0 + $0x10] sm:$0xff] }
  0x14   :  { %v2913_v1 = vld [vmem:[%s5453_s1 + $0x20] sm:$0xf]  ;;  %238 = vmatpush.bf16.msra.mxu0 %v3631_v53  ;;  %265 = vmatpush.bf16.msra.mxu2 %v3633_v54  ;;  %5525 = vst [vmem:[#allocation15_spill] sm:$0xff] %v3670_v2  ;;  %v3170_v5 = vld [vmem:[%s5453_s1 + $0x2c] sm:$0xf0]  ;;  %v3687_v11 = vor.u32 %v3173_v63, %v2939_v0  ;;  %v25_v59 = vld [vmem:[%s5454_s0 + $0x8] sm:$0xff] }
  0x15   :  { %5526 = vst [vmem:[#allocation16_spill] sm:$0xff] %v3672_v4  ;;  %v3168_v6 = vld [vmem:[%s5453_s1 + $0x24] sm:$0xf]  ;;  %v2915_v9 = vld [vmem:[%s5453_s1 + $0x30] sm:$0xf0]  ;;  %252 = vmatpush.bf16.msra.mxu1 %v3643_v57  ;;  %280 = vmatpush.bf16.msra.mxu3 %v3645_v58  ;;  %v3703_v20 = vor.u32 %v3170_v5, %v2913_v1  ;;  %v31_v0 = vunpack.c.h.bf16 %v25_v59  ;;  %v32_v1 = vunpack.c.l.bf16 %v26_v61  ;;  %v33_v5 = vunpack.c.h.bf16 %v26_v61 }
  0x16   :  { %5527 = vst [vmem:[#allocation17_spill] sm:$0xff] %v3685_v10  ;;  %v2937_v13 = vld [vmem:[%s5453_s1 + $0x48] sm:$0xf]  ;;  %v3175_v14 = vld [vmem:[%s5453_s1 + $0x54] sm:$0xf0]  ;;  %v3715_v25 = vor.u32 %v3168_v6, %v2915_v9  ;;  %v30_v49 = vunpack.c.l.bf16 %v25_v59 }
  0x17   :  { %5528 = vst [vmem:[#allocation18_spill] sm:$0xff] %v3687_v11  ;;  %v3169_v18 = vld [vmem:[%s5453_s1 + $0x2c] sm:$0xf]  ;;  %v2923_v19 = vld [vmem:[%s5453_s1 + $0x38] sm:$0xf0]  ;;  %v3705_v22 = vor.u32 %v3175_v14, %v2937_v13 }
  0x18   :  { %16 = vst [vmem:[#allocation2] sm:$0xf] %v3458_v15  ;;  %239 = vmatpush.bf16.msra.mxu0 %v3670_v2  ;;  %266 = vmatpush.bf16.msra.mxu2 %v3672_v4  ;;  %v2897_v23 = vld [vmem:[%s5453_s1] sm:$0xf]  ;;  %v3166_v24 = vld [vmem:[%s5453_s1 + $0xc] sm:$0xf0]  ;;  %v3717_v26 = vor.u32 %v3169_v18, %v2923_v19 }
  0x19   :  { %17 = vst [vmem:[#allocation2 + $0x4] sm:$0xf] %v3458_v15  ;;  %253 = vmatpush.bf16.msra.mxu1 %v3685_v10  ;;  %281 = vmatpush.bf16.msra.mxu3 %v3687_v11  ;;  %v3164_v27 = vld [vmem:[%s5453_s1 + $0x4] sm:$0xf]  ;;  %v2921_v29 = vld [vmem:[%s5453_s1 + $0x28] sm:$0xf]  ;;  %v3739_v37 = vor.u32 %v3166_v24, %v2897_v23 }
  0x1a   :  { %5529 = vst [vmem:[#allocation19_spill] sm:$0xff] %v3703_v20  ;;  %v3171_v30 = vld [vmem:[%s5453_s1 + $0x34] sm:$0xf0]  ;;  %v2899_v31 = vld [vmem:[%s5453_s1 + $0x10] sm:$0xf0] }
  0x1b   :  { %5530 = vst [vmem:[#allocation20_spill] sm:$0xff] %v3705_v22  ;;  %v3165_v35 = vld [vmem:[%s5453_s1 + $0xc] sm:$0xf]  ;;  %v2907_v36 = vld [vmem:[%s5453_s1 + $0x18] sm:$0xf0]  ;;  %v3741_v38 = vor.u32 %v3171_v30, %v2921_v29  ;;  %v3745_v39 = vor.u32 %v3164_v27, %v2899_v31 }
  0x1c   :  { %5531 = vst [vmem:[#allocation21_spill] sm:$0xff] %v3715_v25  ;;  %240 = vmatpush.bf16.msra.mxu0 %v3703_v20  ;;  %267 = vmatpush.bf16.msra.mxu2 %v3705_v22  ;;  %v3747_v40 = vor.u32 %v3165_v35, %v2907_v36  ;;  %v2905_v43 = vld [vmem:[%s5453_s1 + $0x8] sm:$0xf]  ;;  %v3167_v44 = vld [vmem:[%s5453_s1 + $0x14] sm:$0xf0] }
  0x1d   :  { %5532 = vst [vmem:[#allocation22_spill] sm:$0xff] %v3717_v26  ;;  %254 = vmatpush.bf16.msra.mxu1 %v3715_v25  ;;  %282 = vmatpush.bf16.msra.mxu3 %v3717_v26  ;;  %v3759_v48 = vor.u32 %v3167_v44, %v2905_v43  ;;  %v27_v27 = vld [vmem:[%s5454_s0 + $0x18] sm:$0xff] }
  0x1e   :  { %5533 = vst [vmem:[#allocation23_spill] sm:$0xff] %v3739_v37  ;;  %v35_v36 = vunpack.c.h.bf16 %v27_v27 }
  0x1f   :  { %5534 = vst [vmem:[#allocation24_spill] sm:$0xff] %v3741_v38 }
  0x20   :  { %5535 = vst [vmem:[#allocation25_spill] sm:$0xff] %v3745_v39  ;;  %v3163_v47 = vld [vmem:[#allocation2] sm:$0xff]  ;;  %241 = vmatpush.bf16.msra.mxu0 %v3739_v37  ;;  %268 = vmatpush.bf16.msra.mxu2 %v3741_v38 }
  0x21   :  { %5536 = vst [vmem:[#allocation26_spill] sm:$0xff] %v3747_v40  ;;  %255 = vmatpush.bf16.msra.mxu1 %v3745_v39  ;;  %283 = vmatpush.bf16.msra.mxu3 %v3747_v40 }
  0x22   :  { %5537 = vst [vmem:[#allocation27_spill] sm:$0xff] %v3759_v48 }
  0x23   :  { %242 = vmatmul.bf16.vlgmr.msra.gmra.mxu0 %v3163_v47 }
  0x24   :  { %445 = vmatpush.bf16.msrb.mxu0 %v3483_v3  ;;  %256 = vmatmul.bf16.vlgmr.msra.gmra.mxu1 %v3163_v47 }
  0x25   :  { %459 = vmatpush.bf16.msrb.mxu1 %v3494_v7  ;;  %487 = vmatpush.bf16.msrb.mxu3 %v3496_v8 }
  0x26   :  { %284 = vmatmul.bf16.vlgmr.msra.gmra.mxu3 %v3163_v47  ;;  %269 = vmatpush.bf16.msra.mxu2 %v3759_v48 }
  0x28   :  { %446 = vmatpush.bf16.msrb.mxu0 %v3508_v12 }
  0x29   :  { %460 = vmatpush.bf16.msrb.mxu1 %v3521_v16  ;;  %488 = vmatpush.bf16.msrb.mxu3 %v3523_v17 }
  0x2a   :  { %473 = vmatpush.bf16.msrb.mxu2 %v3534_v21 }
  0x2b   :  { %270 = vmatmul.bf16.vlgmr.msra.gmra.mxu2 %v3163_v47 }
  0x2c   :  { %447 = vmatpush.bf16.msrb.mxu0 %v3556_v28 }
  0x2d   :  { %461 = vmatpush.bf16.msrb.mxu1 %v3569_v32  ;;  %489 = vmatpush.bf16.msrb.mxu3 %v3571_v33 }
  0x2e   :  { %474 = vmatpush.bf16.msrb.mxu2 %v3573_v34 }
  0x30   :  { %448 = vmatpush.bf16.msrb.mxu0 %v3595_v41 }
  0x31   :  { %462 = vmatpush.bf16.msrb.mxu1 %v3607_v45  ;;  %490 = vmatpush.bf16.msrb.mxu3 %v3609_v46 }
  0x32   :  { %475 = vmatpush.bf16.msrb.mxu2 %v3597_v42 }
  0x34   :  { %449 = vmatpush.bf16.msrb.mxu0 %v3631_v53 }
  0x35   :  { %463 = vmatpush.bf16.msrb.mxu1 %v3643_v57  ;;  %491 = vmatpush.bf16.msrb.mxu3 %v3645_v58 }
  0x36   :  { %476 = vmatpush.bf16.msrb.mxu2 %v3633_v54 }
  0x38   :  { %450 = vmatpush.bf16.msrb.mxu0 %v3670_v2 }
  0x39   :  { %464 = vmatpush.bf16.msrb.mxu1 %v3685_v10  ;;  %492 = vmatpush.bf16.msrb.mxu3 %v3687_v11 }
  0x3a   :  { %477 = vmatpush.bf16.msrb.mxu2 %v3672_v4 }
  0x3c   :  { %451 = vmatpush.bf16.msrb.mxu0 %v3703_v20 }
  0x3d   :  { %465 = vmatpush.bf16.msrb.mxu1 %v3715_v25  ;;  %493 = vmatpush.bf16.msrb.mxu3 %v3717_v26 }
  0x3e   :  { %478 = vmatpush.bf16.msrb.mxu2 %v3705_v22 }
  0x40   :  { %452 = vmatpush.bf16.msrb.mxu0 %v3739_v37 }
  0x41   :  { %466 = vmatpush.bf16.msrb.mxu1 %v3745_v39  ;;  %494 = vmatpush.bf16.msrb.mxu3 %v3747_v40 }
  0x42   :  { %479 = vmatpush.bf16.msrb.mxu2 %v3741_v38 }
  0x44   :  { %656 = vmatpush.bf16.msra.mxu0 %v3483_v3 }
  0x45   :  { %670 = vmatpush.bf16.msra.mxu1 %v3494_v7  ;;  %698 = vmatpush.bf16.msra.mxu3 %v3496_v8 }
  0x46   :  { %480 = vmatpush.bf16.msrb.mxu2 %v3759_v48 }
  0x48   :  { %657 = vmatpush.bf16.msra.mxu0 %v3508_v12 }
  0x49   :  { %671 = vmatpush.bf16.msra.mxu1 %v3521_v16  ;;  %699 = vmatpush.bf16.msra.mxu3 %v3523_v17 }
  0x4a   :  { %684 = vmatpush.bf16.msra.mxu2 %v3534_v21 }
  0x4c   :  { %658 = vmatpush.bf16.msra.mxu0 %v3556_v28 }
  0x4d   :  { %672 = vmatpush.bf16.msra.mxu1 %v3569_v32  ;;  %700 = vmatpush.bf16.msra.mxu3 %v3571_v33 }
  0x4e   :  { %685 = vmatpush.bf16.msra.mxu2 %v3573_v34 }
  0x50   :  { %659 = vmatpush.bf16.msra.mxu0 %v3595_v41 }
  0x51   :  { %673 = vmatpush.bf16.msra.mxu1 %v3607_v45  ;;  %701 = vmatpush.bf16.msra.mxu3 %v3609_v46 }
  0x52   :  { %686 = vmatpush.bf16.msra.mxu2 %v3597_v42 }
  0x54   :  { %660 = vmatpush.bf16.msra.mxu0 %v3631_v53 }
  0x55   :  { %674 = vmatpush.bf16.msra.mxu1 %v3643_v57  ;;  %702 = vmatpush.bf16.msra.mxu3 %v3645_v58 }
  0x56   :  { %687 = vmatpush.bf16.msra.mxu2 %v3633_v54 }
  0x58   :  { %661 = vmatpush.bf16.msra.mxu0 %v3670_v2 }
  0x59   :  { %675 = vmatpush.bf16.msra.mxu1 %v3685_v10  ;;  %703 = vmatpush.bf16.msra.mxu3 %v3687_v11 }
  0x5a   :  { %688 = vmatpush.bf16.msra.mxu2 %v3672_v4 }
  0x5c   :  { %662 = vmatpush.bf16.msra.mxu0 %v3703_v20 }
  0x5d   :  { %676 = vmatpush.bf16.msra.mxu1 %v3715_v25  ;;  %704 = vmatpush.bf16.msra.mxu3 %v3717_v26 }
  0x5e   :  { %689 = vmatpush.bf16.msra.mxu2 %v3705_v22 }
  0x60   :  { %663 = vmatpush.bf16.msra.mxu0 %v3739_v37 }
  0x61   :  { %677 = vmatpush.bf16.msra.mxu1 %v3745_v39  ;;  %705 = vmatpush.bf16.msra.mxu3 %v3747_v40 }
  0x62   :  { %690 = vmatpush.bf16.msra.mxu2 %v3741_v38 }
  0x66   :  { %691 = vmatpush.bf16.msra.mxu2 %v3759_v48 }
  0xa0   :  { %v243_v52 = vpop.f32.mrf.mxu0 }
  0xa1   :  { %v290_v55 = vadd.f32 %v243_v52, %v28_v50  ;;  %v257_v56 = vpop.f32.mrf.mxu1 }
  0xa2   :  { %v291_v60 = vadd.f32 %v257_v56, %v29_v51 }
  0xa3   :  { %v3023_v62 = vmul.f32 -1.442695, %v290_v55 }
  0xa4   :  { %v3025_v63 = vmul.f32 -1.442695, %v291_v60 }
  0xa5   :  { %3202 = vpow2.f32 %v3023_v62 }
  0xa6   :  { %3204 = vpow2.f32 %v3025_v63 }
  0xa8   :  { %v245_v13 = vpop.f32.mrf.mxu0 }
  0xa9   :  { %v285_v6 = vpop.f32.mrf.mxu3  ;;  %v294_v14 = vadd.f32 %v245_v13, %v32_v1  ;;  %v259_v15 = vpop.f32.mrf.mxu1 }
  0xaa   :  { %v293_v9 = vadd.f32 %v285_v6, %v31_v0  ;;  %v295_v19 = vadd.f32 %v259_v15, %v33_v5 }
  0xab   :  { %v3203_v23 = vpop.eup %3202  ;;  %v3024_v24 = vmul.f32 -1.442695, %v294_v14 }
  0xac   :  { %v3027_v18 = vmul.f32 -1.442695, %v293_v9  ;;  %v3205_v29 = vpop.eup %3204  ;;  %v304_v30 = vadd.f32 1.0, %v3203_v23  ;;  %v3026_v31 = vmul.f32 -1.442695, %v295_v19  ;;  %v34_v9 = vunpack.c.l.bf16 %v27_v27 }
  0xad   :  { %v342_v35 = vadd.f32 1.0, %v3205_v29 }
  0xae   :  { %3206 = vpow2.f32 %v3027_v18  ;;  %v271_v43 = vpop.f32.mrf.mxu2  ;;  %v317_v18 = vand.u32 2147483648, %v304_v30  ;;  %vm311_vm2 = vweird.f32 %v304_v30 }
  0xaf   :  { %3208 = vpow2.f32 %v3024_v24  ;;  %v292_v1 = vadd.f32 %v271_v43, %v30_v49  ;;  %v355_v19 = vand.u32 2147483648, %v342_v35  ;;  %v315_v24 = vand.u32 2147483647, %v304_v30 }
  0xb0   :  { %3210 = vrcp.f32 %v304_v30  ;;  %vm349_vm3 = vweird.f32 %v342_v35 }
  0xb1   :  { %3212 = vrcp.f32 %v342_v35  ;;  %v287_v44 = vpop.f32.mrf.mxu3  ;;  %vm316_vm6 = vcmp.eq.f32.partialorder %v315_v24, 8.507059e+37 }
  0xb2   :  { %3214 = vpow2.f32 %v3026_v31  ;;  %v297_v50 = vadd.f32 %v287_v44, %v35_v36  ;;  %v353_v36 = vand.u32 2147483647, %v342_v35 }
  0xb4   :  { %v3207_v47 = vpop.eup %3206  ;;  %v3028_v60 = vmul.f32 -1.442695, %v297_v50  ;;  %vm354_vm7 = vcmp.eq.f32.partialorder %v353_v36, 8.507059e+37 }
  0xb5   :  { %v3209_v51 = vpop.eup %3208  ;;  %v3838_v52 = vadd.f32 1.0, %v3207_v47 }
  0xb6   :  { %v3211_v55 = vpop.eup %3210  ;;  %v3840_v56 = vadd.f32 1.0, %v3209_v51  ;;  %v273_v14 = vpop.f32.mrf.mxu2  ;;  %v318_v51 = vor.u32 1.1754944e-38, %v317_v18 }
  0xb7   :  { %v3213_v61 = vpop.eup %3212  ;;  %v307_v62 = vmul.f32 %v3211_v55, %v304_v30  ;;  %vm312_vm0 = vweird.f32 %v3211_v55  ;;  %v296_v43 = vadd.f32 %v273_v14, %v34_v9 }
  0xb8   :  { %v3215_v63 = vpop.eup %3214  ;;  %v345_v0 = vmul.f32 %v3213_v61, %v342_v35  ;;  %3216 = vrcp.f32 %v3840_v56  ;;  %vm350_vm1 = vweird.f32 %v3213_v61  ;;  %vm3847_vm4 = vmor %vm311_vm2, %vm312_vm0  ;;  %v356_v35 = vor.u32 1.1754944e-38, %v355_v19 }
  0xb9   :  { %v308_v5 = vsub.f32 1.0, %v307_v62  ;;  %3218 = vrcp.f32 %v3838_v52  ;;  %v3844_v6 = vadd.f32 1.0, %v3215_v63  ;;  %vm3857_vm5 = vmor %vm349_vm3, %vm350_vm1  ;;  %vm326_vm9 = vweird.f32 %v3840_v56 }
  0xba   :  { %v346_v59 = vsub.f32 1.0, %v345_v0  ;;  %3220 = vpow2.f32 %v3028_v60  ;;  %vm389_vm1 = vweird.f32 %v3838_v52 }
  0xbb   :  { %3222 = vrcp.f32 %v3844_v6  ;;  %v309_v13 = vmul.f32 %v3211_v55, %v308_v5  ;;  %v370_v18 = vand.u32 2147483648, %v3844_v6  ;;  %vm364_vm12 = vweird.f32 %v3844_v6 }
  0xbc   :  { %v347_v15 = vmul.f32 %v3213_v61, %v346_v59  ;;  %3224 = vtanh.f32 %v292_v1 }
  0xbd   :  { %v310_v23 = vadd.f32 %v3211_v55, %v309_v13  ;;  %3226 = vtanh.f32 %v296_v43 }
  0xbe   :  { %v3217_v29 = vpop.eup %3216  ;;  %v348_v27 = vadd.f32 %v3213_v61, %v347_v15  ;;  %v330_v15 = vand.u32 2147483647, %v3840_v56 }
  0xbf   :  { %v3851_v44 = vpop.eup %3218  ;;  %v322_v47 = vmul.f32 %v3217_v29, %v3840_v56  ;;  %v314_v49 = vsel %vm3847_vm4, %v3211_v55, %v310_v23  ;;  %vm327_vm8 = vweird.f32 %v3217_v29  ;;  %v368_v23 = vand.u32 2147483647, %v3844_v6 }
  0xc0   :  { %v3221_v30 = vpop.eup %3220  ;;  %v352_v60 = vsel %vm3857_vm5, %v3213_v61, %v348_v27  ;;  %v319_v55 = vsel %vm316_vm6, %v318_v51, %v314_v49  ;;  %v385_v59 = vmul.f32 %v3851_v44, %v3838_v52  ;;  %v332_v61 = vand.u32 2147483648, %v3840_v56  ;;  %vm328_vm11 = vmor %vm326_vm9, %vm327_vm8 }
  0xc1   :  { %v3223_v62 = vpop.eup %3222  ;;  %v323_v63 = vsub.f32 1.0, %v322_v47  ;;  %v3863_v0 = vadd.f32 1.0, %v3221_v30  ;;  %v357_v9 = vsel %vm354_vm7, %v356_v35, %v352_v60  ;;  %vm331_vm13 = vcmp.eq.f32.partialorder %v330_v15, 8.507059e+37 }
  0xc2   :  { %v3225_v1 = vpop.eup %3224  ;;  %v360_v5 = vmul.f32 %v3223_v62, %v3844_v6  ;;  %v414_v31 = vmul.f32 0.0, %v357_v9  ;;  %vm365_vm10 = vweird.f32 %v3223_v62  ;;  %v386_v36 = vsub.f32 1.0, %v385_v59 }
  0xc3   :  { %3228 = vrcp.f32 %v3863_v0  ;;  %v324_v14 = vmul.f32 %v3217_v29, %v323_v63  ;;  %v416_v19 = vmul.f32 %v3225_v1, %v319_v55  ;;  %v333_v43 = vor.u32 1.1754944e-38, %v332_v61  ;;  %v3227_v47 = vpop.eup %3226  ;;  %vm366_vm14 = vmor %vm364_vm12, %vm365_vm10 }
  0xc4   :  { %v361_v13 = vsub.f32 1.0, %v360_v5  ;;  %v371_v51 = vor.u32 1.1754944e-38, %v370_v18  ;;  %vm369_vm15 = vcmp.eq.f32.partialorder %v368_v23, 8.507059e+37  ;;  %v387_v5 = vmul.f32 %v3851_v44, %v386_v36 }
  0xc5   :  { %v325_v27 = vadd.f32 %v3217_v29, %v324_v14  ;;  %v3875_v56 = vadd.f32 %v416_v19, %v414_v31  ;;  %vm390_vm0 = vweird.f32 %v3851_v44  ;;  %v410_v15 = vand.u32 2147483648, %v3863_v0 }
  0xc6   :  { %v362_v24 = vmul.f32 %v3223_v62, %v361_v13  ;;  %v388_v61 = vadd.f32 %v3851_v44, %v387_v5  ;;  %v395_v13 = vand.u32 2147483648, %v3838_v52  ;;  %vm391_vm3 = vmor %vm389_vm1, %vm390_vm0  ;;  %vm404_vm4 = vweird.f32 %v3863_v0 }
  0xc7   :  { %v329_v49 = vsel %vm328_vm11, %v3217_v29, %v325_v27  ;;  %3230 = vtanh.f32 %v3875_v56  ;;  %v408_v19 = vand.u32 2147483647, %v3863_v0  ;;  %vm1910_vm8 = vcmask 1041409  }
  0xc8   :  { %v363_v50 = vadd.f32 %v3223_v62, %v362_v24  ;;  %v334_v60 = vsel %vm331_vm13, %v333_v43, %v329_v49  ;;  %v392_v18 = vsel %vm391_vm3, %v3851_v44, %v388_v61  ;;  %v396_v24 = vor.u32 1.1754944e-38, %v395_v13 }
  0xc9   :  { %v3229_v30 = vpop.eup %3228  ;;  %v417_v1 = vmul.f32 %v3227_v47, %v334_v60  ;;  %v411_v43 = vor.u32 1.1754944e-38, %v410_v15  ;;  %vm409_vm7 = vcmp.eq.f32.partialorder %v408_v19, 8.507059e+37  ;;  %vm1914_vm9 = vcmask 1042434  }
  0xca   :  { %v400_v35 = vmul.f32 %v3229_v30, %v3863_v0  ;;  %v367_v63 = vsel %vm366_vm14, %v3223_v62, %v363_v50  ;;  %v393_v62 = vand.u32 2147483647, %v3838_v52  ;;  %vm405_vm2 = vweird.f32 %v3229_v30 }
  0xcb   :  { %v372_v55 = vsel %vm369_vm15, %v371_v51, %v367_v63  ;;  %vm406_vm5 = vmor %vm404_vm4, %vm405_vm2  ;;  %vm1918_vm10 = vcmask 1043459   ;;  %vm1905_vm11 = vcmask 1040384  }
  0xcc   :  { %v401_v59 = vsub.f32 1.0, %v400_v35  ;;  %v415_v9 = vmul.f32 0.0, %v372_v55  ;;  %vm394_vm6 = vcmp.eq.f32.partialorder %v393_v62, 8.507059e+37 }
  0xcd   :  { %v3231_v23 = vpop.eup %3230  ;;  %v397_v36 = vsel %vm394_vm6, %v396_v24, %v392_v18 }
  0xce   :  { %v402_v6 = vmul.f32 %v3229_v30, %v401_v59  ;;  %v3880_v29 = vadd.f32 %v417_v1, %v415_v9  ;;  %v422_v52 = vmul.f32 %v3231_v23, %v397_v36  ;;  %v3030_v9 = vld [vmem:[%s5454_s0 + $0x28] sm:$0xff] }
  0xcf   :  { %v434_v62 = vunpack.c.h.bf16 %v3030_v9 }
  0xd0   :  { %3232 = vtanh.f32 %v3880_v29  ;;  %v403_v14 = vadd.f32 %v3229_v30, %v402_v6  ;;  %v3892_v50 = vpack.c.bf16 %v422_v52, %v422_v52  ;;  %v3031_v6 = vld [vmem:[%s5454_s0 + $0x30] sm:$0xff] }
  0xd1   :  { %v435_v15 = vunpack.c.l.bf16 %v3031_v6  ;;  %v436_v18 = vunpack.c.h.bf16 %v3031_v6 }
  0xd2   :  { %v407_v31 = vsel %vm406_vm5, %v3229_v30, %v403_v14  ;;  %v441_v0 = vunpack.c.l.b16 %v3892_v50  ;;  %v3029_v30 = vld [vmem:[%s5454_s0 + $0x20] sm:$0xff]  ;;  %v1903_v14 = vrot.slane %v3892_v50, 3 }
  0xd3   :  { %v412_v47 = vsel %vm409_vm7, %v411_v43, %v407_v31  ;;  %v431_v35 = vunpack.c.l.bf16 %v3029_v30  ;;  %v432_v63 = vunpack.c.h.bf16 %v3029_v30 }
  0xd4   :  { %v1915_v52 = vsel %vm1914_vm9, %v3892_v50, %v1903_v14 }
  0xd6   :  { %v3233_v27 = vpop.eup %3232 }
  0xd7   :  { %v423_v49 = vmul.f32 %v3233_v27, %v412_v47  ;;  %v1911_v27 = vsel %vm1910_vm8, %v3892_v50, %v1903_v14  ;;  %v1919_v47 = vsel %vm1918_vm10, %v3892_v50, %v1903_v14 }
  0xd9   :  { %v3894_v51 = vpack.c.bf16 %v423_v49, %v423_v49 }
  0xdb   :  { %v442_v44 = vunpack.c.l.b16 %v3894_v51 }
  0xdd   :  { %v443_v60 = vpack.c.b16 %v442_v44, %v441_v0  ;;  %v1908_v0 = vsel %vm1905_vm11, %v3892_v50, %v1903_v14 }
  0xde   :  { %v1936_v50 = vunpack.i.h.s16 %v1908_v0 }
  0xdf   :  { %453 = vmatmul.bf16.vlgmr.msrb.gmra.mxu0 %v443_v60  ;;  %467 = vmatmul.bf16.vlgmr.msrb.gmra.mxu1 %v443_v60 }
  0xe0   :  { %481 = vmatmul.bf16.vlgmr.msrb.gmra.mxu2 %v443_v60  ;;  %495 = vmatmul.bf16.vlgmr.msrb.gmra.mxu3 %v443_v60 }
  0xe1   :  { %867 = vmatpush.bf16.msrb.mxu0 %v3483_v3  ;;  %881 = vmatpush.bf16.msrb.mxu1 %v3494_v7 }
  0xe2   :  { %895 = vmatpush.bf16.msrb.mxu2 %v3534_v21  ;;  %909 = vmatpush.bf16.msrb.mxu3 %v3496_v8 }
  0xe5   :  { %868 = vmatpush.bf16.msrb.mxu0 %v3508_v12  ;;  %882 = vmatpush.bf16.msrb.mxu1 %v3521_v16 }
  0xe6   :  { %896 = vmatpush.bf16.msrb.mxu2 %v3573_v34  ;;  %910 = vmatpush.bf16.msrb.mxu3 %v3523_v17 }
  0xe9   :  { %869 = vmatpush.bf16.msrb.mxu0 %v3556_v28  ;;  %883 = vmatpush.bf16.msrb.mxu1 %v3569_v32 }
  0xea   :  { %897 = vmatpush.bf16.msrb.mxu2 %v3597_v42  ;;  %911 = vmatpush.bf16.msrb.mxu3 %v3571_v33 }
  0xed   :  { %870 = vmatpush.bf16.msrb.mxu0 %v3595_v41  ;;  %884 = vmatpush.bf16.msrb.mxu1 %v3607_v45 }
  0xee   :  { %898 = vmatpush.bf16.msrb.mxu2 %v3633_v54  ;;  %912 = vmatpush.bf16.msrb.mxu3 %v3609_v46 }
  0xf1   :  { %871 = vmatpush.bf16.msrb.mxu0 %v3631_v53  ;;  %885 = vmatpush.bf16.msrb.mxu1 %v3643_v57 }
  0xf2   :  { %899 = vmatpush.bf16.msrb.mxu2 %v3672_v4  ;;  %913 = vmatpush.bf16.msrb.mxu3 %v3645_v58 }
  0xf5   :  { %872 = vmatpush.bf16.msrb.mxu0 %v3670_v2  ;;  %886 = vmatpush.bf16.msrb.mxu1 %v3685_v10 }
  0xf6   :  { %900 = vmatpush.bf16.msrb.mxu2 %v3705_v22  ;;  %914 = vmatpush.bf16.msrb.mxu3 %v3687_v11 }
  0xf9   :  { %873 = vmatpush.bf16.msrb.mxu0 %v3703_v20  ;;  %887 = vmatpush.bf16.msrb.mxu1 %v3715_v25 }
  0xfa   :  { %901 = vmatpush.bf16.msrb.mxu2 %v3741_v38  ;;  %915 = vmatpush.bf16.msrb.mxu3 %v3717_v26 }
  0xfd   :  { %874 = vmatpush.bf16.msrb.mxu0 %v3739_v37  ;;  %888 = vmatpush.bf16.msrb.mxu1 %v3745_v39 }
  0xfe   :  { %902 = vmatpush.bf16.msrb.mxu2 %v3759_v48  ;;  %916 = vmatpush.bf16.msrb.mxu3 %v3747_v40 }
 0x15c   :  { %v454_v1 = vpop.f32.mrf.mxu0  ;;  %v468_v5 = vpop.f32.mrf.mxu1 }
 0x15d   :  { %v501_v55 = vadd.f32 %v454_v1, %v431_v35  ;;  %v502_v59 = vadd.f32 %v468_v5, %v432_v63  ;;  %v3948_v35 = vrot.slane %v1911_v27, 1  ;;  %v3032_v5 = vld [vmem:[%s5454_s0 + $0x38] sm:$0xff] }
 0x15f   :  { %v3033_v61 = vmul.f32 -1.442695, %v501_v55  ;;  %v3035_v13 = vmul.f32 -1.442695, %v502_v59  ;;  %v3955_v55 = vrot.slane %v1915_v52, 2  ;;  %v3957_v59 = vrot.slane %v1919_v47, 3 }
 0x160   :  { %v1938_v14 = vunpack.i.h.s16 %v3948_v35 }
 0x161   :  { %3234 = vpow2.f32 %v3033_v61  ;;  %v433_v61 = vunpack.c.l.bf16 %v3030_v9 }
 0x162   :  { %3236 = vpow2.f32 %v3035_v13 }
 0x163   :  { %v496_v19 = vpop.f32.mrf.mxu3  ;;  %v482_v13 = vpop.f32.mrf.mxu2 }
 0x164   :  { %v504_v23 = vadd.f32 %v496_v19, %v434_v62  ;;  %v456_v24 = vpop.f32.mrf.mxu0  ;;  %v470_v31 = vpop.f32.mrf.mxu1  ;;  %v438_v62 = vunpack.c.h.bf16 %v3032_v5  ;;  %v1940_v19 = vunpack.i.h.s16 %v3955_v55  ;;  %v503_v27 = vadd.f32 %v482_v13, %v433_v61 }
 0x165   :  { %v505_v36 = vadd.f32 %v456_v24, %v435_v15  ;;  %v506_v43 = vadd.f32 %v470_v31, %v436_v18  ;;  %v3099_v15 = vpack.i.b16 %v1908_v0, %v1908_v0  ;;  %v3966_v31 = vpack.i.b16 %v1936_v50, %v1936_v50 }
 0x166   :  { %v3037_v49 = vmul.f32 -1.442695, %v504_v23  ;;  %v1942_v23 = vunpack.i.h.s16 %v3957_v59  ;;  %v3982_v50 = vpack.i.b16 %v1940_v19, %v1940_v19 }
 0x167   :  { %v3235_v44 = vpop.eup %3234  ;;  %v3034_v60 = vmul.f32 -1.442695, %v505_v36  ;;  %v3036_v1 = vmul.f32 -1.442695, %v506_v43  ;;  %v5553_v2 = vperm.slane %v3966_v31, 0 }
 0x168   :  { %v3237_v30 = vpop.eup %3236  ;;  %v3950_v63 = vadd.f32 1.0, %v3235_v44  ;;  %3238 = vpow2.f32 %v3037_v49  ;;  %v3974_v44 = vpack.i.b16 %v1938_v14, %v1938_v14  ;;  %v3984_v61 = vpack.i.b16 %v1942_v23, %v1942_v23 }
 0x169   :  { %v3959_v6 = vadd.f32 1.0, %v3237_v30  ;;  %3240 = vpow2.f32 %v3034_v60  ;;  %v3978_v60 = vperm.slane %v3099_v15, 0  ;;  %v3989_v14 = vrot.slane %v3894_v51, 3 }
 0x16a   :  { %3242 = vrcp.f32 %v3950_v63  ;;  %v437_v15 = vunpack.c.l.bf16 %v3032_v5  ;;  %v526_v43 = vand.u32 2147483647, %v3950_v63  ;;  %v528_v9 = vand.u32 2147483648, %v3950_v63 }
 0x16b   :  { %3244 = vrcp.f32 %v3959_v6  ;;  %v498_v18 = vpop.f32.mrf.mxu3  ;;  %v566_v0 = vand.u32 2147483648, %v3959_v6  ;;  %v484_v40 = vpop.f32.mrf.mxu2  ;;  %v564_v39 = vand.u32 2147483647, %v3959_v6  ;;  %v4003_v5 = vsel %vm1910_vm8, %v3894_v51, %v3989_v14 }
 0x16c   :  { %3246 = vpow2.f32 %v3036_v1  ;;  %v508_v47 = vadd.f32 %v498_v18, %v438_v62  ;;  %vm522_vm14 = vweird.f32 %v3950_v63  ;;  %vm560_vm15 = vweird.f32 %v3959_v6 }
 0x16d   :  { %v529_v37 = vor.u32 1.1754944e-38, %v528_v9  ;;  %vm527_vm2 = vcmp.eq.f32.partialorder %v526_v43, 8.507059e+37  ;;  %vm565_vm3 = vcmp.eq.f32.partialorder %v564_v39, 8.507059e+37 }
 0x16e   :  { %v3239_v24 = vpop.eup %3238  ;;  %v3038_v19 = vmul.f32 -1.442695, %v508_v47 }
 0x16f   :  { %v3241_v36 = vpop.eup %3240  ;;  %v3972_v52 = vadd.f32 1.0, %v3239_v24 }
 0x170   :  { %v3243_v49 = vpop.eup %3242  ;;  %v3980_v30 = vadd.f32 1.0, %v3241_v36 }
 0x171   :  { %v3245_v1 = vpop.eup %3244  ;;  %v518_v13 = vmul.f32 %v3243_v49, %v3950_v63  ;;  %3248 = vrcp.f32 %v3972_v52  ;;  %vm523_vm12 = vweird.f32 %v3243_v49  ;;  %v606_v9 = vand.u32 2147483648, %v3972_v52 }
 0x172   :  { %v3247_v62 = vpop.eup %3246  ;;  %v556_v18 = vmul.f32 %v3245_v1, %v3959_v6  ;;  %3250 = vtanh.f32 %v503_v27  ;;  %v4008_v27 = vsel %vm1914_vm9, %v3894_v51, %v3989_v14  ;;  %vm561_vm13 = vweird.f32 %v3245_v1  ;;  %vm524_vm0 = vmor %vm522_vm14, %vm523_vm12 }
 0x173   :  { %v519_v24 = vsub.f32 1.0, %v518_v13  ;;  %3252 = vrcp.f32 %v3980_v30  ;;  %v3993_v36 = vadd.f32 1.0, %v3247_v62  ;;  %vm562_vm1 = vmor %vm560_vm15, %vm561_vm13  ;;  %vm537_vm4 = vweird.f32 %v3980_v30 }
 0x174   :  { %v557_v23 = vsub.f32 1.0, %v556_v18  ;;  %v507_v18 = vadd.f32 %v484_v40, %v437_v15  ;;  %vm600_vm12 = vweird.f32 %v3972_v52 }
 0x175   :  { %v520_v48 = vmul.f32 %v3243_v49, %v519_v24  ;;  %3254 = vrcp.f32 %v3993_v36  ;;  %vm575_vm15 = vweird.f32 %v3993_v36 }
 0x176   :  { %v558_v47 = vmul.f32 %v3245_v1, %v557_v23  ;;  %3256 = vpow2.f32 %v3038_v19  ;;  %v567_v23 = vor.u32 1.1754944e-38, %v566_v0  ;;  %v579_v0 = vand.u32 2147483647, %v3993_v36 }
 0x177   :  { %v4010_v13 = vpop.eup %3248  ;;  %v521_v62 = vadd.f32 %v3243_v49, %v520_v48  ;;  %3258 = vtanh.f32 %v507_v18 }
 0x178   :  { %v3251_v24 = vpop.eup %3250  ;;  %v559_v26 = vadd.f32 %v3245_v1, %v558_v47  ;;  %v596_v38 = vmul.f32 %v4010_v13, %v3972_v52  ;;  %vm601_vm6 = vweird.f32 %v4010_v13 }
 0x179   :  { %v3253_v25 = vpop.eup %3252  ;;  %v525_v20 = vsel %vm524_vm0, %v3243_v49, %v521_v62  ;;  %vm4038_vm14 = vmor %vm600_vm12, %vm601_vm6 }
 0x17a   :  { %v530_v48 = vsel %vm527_vm2, %v529_v37, %v525_v20  ;;  %v563_v11 = vsel %vm562_vm1, %v3245_v1, %v559_v26  ;;  %v597_v63 = vsub.f32 1.0, %v596_v38  ;;  %v533_v40 = vmul.f32 %v3253_v25, %v3980_v30 }
 0x17b   :  { %v3255_v15 = vpop.eup %3254  ;;  %v568_v19 = vsel %vm565_vm3, %v567_v23, %v563_v11  ;;  %v627_v6 = vmul.f32 %v3251_v24, %v530_v48  ;;  %v581_v20 = vand.u32 2147483648, %v3993_v36  ;;  %v541_v26 = vand.u32 2147483647, %v3980_v30 }
 0x17c   :  { %v625_v47 = vmul.f32 %v568_v19, %v3875_v56  ;;  %v598_v22 = vmul.f32 %v4010_v13, %v597_v63  ;;  %v534_v10 = vsub.f32 1.0, %v533_v40  ;;  %v571_v49 = vmul.f32 %v3255_v15, %v3993_v36  ;;  %v3257_v43 = vpop.eup %3256 }
 0x17d   :  { %v543_v11 = vand.u32 2147483648, %v3980_v30  ;;  %vm538_vm5 = vweird.f32 %v3253_v25  ;;  %v4030_v1 = vadd.f32 1.0, %v3257_v43  ;;  %vm576_vm7 = vweird.f32 %v3255_v15  ;;  %v3259_v24 = vpop.eup %3258 }
 0x17e   :  { %v4025_v37 = vadd.f32 %v627_v6, %v625_v47  ;;  %v572_v38 = vsub.f32 1.0, %v571_v49  ;;  %v535_v39 = vmul.f32 %v3253_v25, %v534_v10  ;;  %v599_v56 = vadd.f32 %v4010_v13, %v598_v22  ;;  %vm539_vm13 = vmor %vm537_vm4, %vm538_vm5 }
 0x17f   :  { %v604_v23 = vand.u32 2147483647, %v3972_v52  ;;  %v544_v10 = vor.u32 1.1754944e-38, %v543_v11  ;;  %vm542_vm0 = vcmp.eq.f32.partialorder %v541_v26, 8.507059e+37  ;;  %v1932_v40 = vsel %vm1918_vm10, %v3894_v51, %v3989_v14  ;;  %vm577_vm1 = vmor %vm575_vm15, %vm576_vm7 }
 0x180   :  { %5542 = vst [vmem:[#allocation28_spill] sm:$0xff] %v4025_v37  ;;  %3260 = vtanh.f32 %v4025_v37  ;;  %v573_v62 = vmul.f32 %v3255_v15, %v572_v38  ;;  %v536_v18 = vadd.f32 %v3253_v25, %v535_v39  ;;  %v603_v52 = vsel %vm4038_vm14, %v4010_v13, %v599_v56 }
 0x181   :  { %3262 = vrcp.f32 %v4030_v1  ;;  %v582_v30 = vor.u32 1.1754944e-38, %v581_v20  ;;  %v607_v6 = vor.u32 1.1754944e-38, %v606_v9  ;;  %vm580_vm2 = vcmp.eq.f32.partialorder %v579_v0, 8.507059e+37 }
 0x182   :  { %v540_v48 = vsel %vm539_vm13, %v3253_v25, %v536_v18  ;;  %v574_v63 = vadd.f32 %v3255_v15, %v573_v62  ;;  %v5545_v36 = vpack.i.b16 %v3948_v35, %v3948_v35  ;;  %vm605_vm3 = vcmp.eq.f32.partialorder %v604_v23, 8.507059e+37 }
 0x183   :  { %v545_v19 = vsel %vm542_vm0, %v544_v10, %v540_v48  ;;  %v5546_v13 = vpack.i.b16 %v3955_v55, %v3955_v55  ;;  %v4062_v9 = vrot.slane %v4003_v5, 1  ;;  %v4070_v35 = vsel %vm1905_vm11, %v3894_v51, %v3989_v14 }
 0x184   :  { %v578_v47 = vsel %vm577_vm1, %v3255_v15, %v574_v63  ;;  %v628_v49 = vmul.f32 %v3259_v24, %v545_v19  ;;  %v4054_v43 = vperm.slane %v5545_v36, 0  ;;  %v608_v15 = vsel %vm605_vm3, %v607_v6, %v603_v52 }
 0x185   :  { %v583_v26 = vsel %vm580_vm2, %v582_v30, %v578_v47  ;;  %v4059_v38 = vperm.slane %v5546_v13, 0  ;;  %v4073_v56 = vrot.slane %v4008_v27, 2  ;;  %v4075_v0 = vrot.slane %v1932_v40, 3 }
 0x186   :  { %v3261_v11 = vpop.eup %3260  ;;  %v626_v20 = vmul.f32 %v583_v26, %v3880_v29  ;;  %v2280_v62 = vperm.slane %v3974_v44, 0  ;;  %v5547_v5 = vpack.i.b16 %v3957_v59, %v3957_v59  ;;  %v2282_v51 = vperm.slane %v3982_v50, 0 }
 0x187   :  { %v4065_v39 = vpop.eup %3262  ;;  %v633_v55 = vmul.f32 %v3261_v11, %v608_v15  ;;  %v2284_v14 = vperm.slane %v3984_v61, 0  ;;  %v619_v23 = vand.u32 2147483647, %v4030_v1  ;;  %v1944_v44 = vunpack.i.h.s16 %v4070_v35 }
 0x188   :  { %v4081_v18 = vperm.slane %v5547_v5, 0  ;;  %v4083_v29 = vadd.f32 %v628_v49, %v626_v20  ;;  %v611_v24 = vmul.f32 %v4065_v39, %v4030_v1  ;;  %v1946_v10 = vunpack.i.h.s16 %v4062_v9 }
 0x189   :  { %v4089_v27 = vpack.c.bf16 %v633_v55, %v633_v55  ;;  %v1948_v48 = vunpack.i.h.s16 %v4073_v56  ;;  %v1950_v63 = vunpack.i.h.s16 %v4075_v0  ;;  %v621_v61 = vand.u32 2147483648, %v4030_v1 }
 0x18a   :  { %5548 = vst [vmem:[#allocation29_spill] sm:$0xff] %v4083_v29  ;;  %v612_v22 = vsub.f32 1.0, %v611_v24  ;;  %vm2598_vm4 = vsmask.f32 256  ;;  %3264 = vtanh.f32 %v4083_v29  ;;  %vm615_vm5 = vweird.f32 %v4030_v1 }
 0x18b   :  { %v1951_v50 = vrot.slane %v4089_v27, 3  ;;  %vm4111_vm6 = vcmp.eq.f32.partialorder %v619_v23, 8.507059e+37  ;;  %vm616_vm7 = vweird.f32 %v4065_v39  ;;  %v622_v20 = vor.u32 1.1754944e-38, %v621_v61  ;;  %vm4119_vm12 = vmand %vm1905_vm11, %vm2598_vm4  ;;  %v5585_v23 = vld [vmem:[#allocation8_spill] sm:$0xff] }
 0x18c   :  { %v613_v40 = vmul.f32 %v4065_v39, %v612_v22  ;;  %vm617_vm13 = vmor %vm615_vm5, %vm616_vm7 }
 0x18d   :  { %v1955_v52 = vsel %vm1905_vm11, %v4089_v27, %v1951_v50  ;;  %v1957_v30 = vsel %vm1910_vm8, %v4089_v27, %v1951_v50  ;;  %v1960_v19 = vsel %vm1914_vm9, %v4089_v27, %v1951_v50  ;;  %v1963_v6 = vsel %vm1918_vm10, %v4089_v27, %v1951_v50 }
 0x18e   :  { %v1959_v49 = vrot.slane %v1957_v30, 1  ;;  %v1962_v36 = vrot.slane %v1960_v19, 2  ;;  %v1965_v26 = vrot.slane %v1963_v6, 3  ;;  %v1980_v11 = vunpack.i.h.s16 %v1955_v52 }
 0x18f   :  { %v3107_v13 = vpack.i.b16 %v1955_v52, %v1955_v52  ;;  %v614_v15 = vadd.f32 %v4065_v39, %v613_v40 }
 0x190   :  { %v1982_v55 = vunpack.i.h.s16 %v1959_v49  ;;  %v1984_v5 = vunpack.i.h.s16 %v1962_v36  ;;  %v1986_v24 = vunpack.i.h.s16 %v1965_v26  ;;  %v2310_v22 = vpack.i.b16 %v1980_v11, %v1980_v11  ;;  %v3265_v52 = vpop.eup %3264 }
 0x191   :  { %v3108_v50 = vpack.i.b16 %v1959_v49, %v1959_v49  ;;  %v3109_v30 = vpack.i.b16 %v1962_v36, %v1962_v36  ;;  %v3110_v19 = vpack.i.b16 %v1965_v26, %v1965_v26  ;;  %v4123_v6 = vperm.slane %v3107_v13, 0 }
 0x192   :  { %v2312_v40 = vpack.i.b16 %v1982_v55, %v1982_v55  ;;  %v2314_v59 = vpack.i.b16 %v1984_v5, %v1984_v5  ;;  %v2316_v25 = vpack.i.b16 %v1986_v24, %v1986_v24  ;;  %v2326_v61 = vperm.slane %v2310_v22, 0 }
 0x193   :  { %v4125_v29 = vperm.slane %v3108_v50, 0  ;;  %v4127_v37 = vperm.slane %v3109_v30, 0  ;;  %v4129_v11 = vperm.slane %v3110_v19, 0  ;;  %v618_v31 = vsel %vm617_vm13, %v4065_v39, %v614_v15 }
 0x194   :  { %v2328_v36 = vperm.slane %v2312_v40, 0  ;;  %v2330_v26 = vperm.slane %v2314_v59, 0  ;;  %v2332_v13 = vperm.slane %v2316_v25, 0  ;;  %v4139_v55 = vsel %vm4119_vm12, %v5553_v2, %v2326_v61 }
 0x195   :  { %v623_v22 = vsel %vm4111_vm6, %v622_v20, %v618_v31  ;;  %v2270_v50 = vpack.i.b16 %v1944_v44, %v1944_v44  ;;  %v3104_v30 = vpack.i.b16 %v4062_v9, %v4062_v9  ;;  %v2272_v15 = vpack.i.b16 %v1946_v10, %v1946_v10 }
 0x196   :  { %v4160_v1 = vsel %vm4119_vm12, %v2280_v62, %v2328_v36  ;;  %v4164_v59 = vsel %vm4119_vm12, %v2282_v51, %v2330_v26  ;;  %v4168_v24 = vsel %vm4119_vm12, %v2284_v14, %v2332_v13  ;;  %v634_v39 = vmul.f32 %v3265_v52, %v623_v22 }
 0x197   :  { %5554 = vst [vmem:[#allocation30_spill] sm:$0xff] %v4168_v24  ;;  %v3105_v62 = vpack.i.b16 %v4073_v56, %v4073_v56  ;;  %v3106_v51 = vpack.i.b16 %v4075_v0, %v4075_v0  ;;  %v2274_v40 = vpack.i.b16 %v1948_v48, %v1948_v48  ;;  %v2276_v61 = vpack.i.b16 %v1950_v63, %v1950_v63 }
 0x198   :  { %v636_v19 = vpack.c.bf16 %v634_v39, %v634_v39  ;;  %v5555_v14 = vpack.i.b16 %v4070_v35, %v4070_v35  ;;  %v2286_v44 = vperm.slane %v2270_v50, 0  ;;  %v4183_v20 = vperm.slane %v3104_v30, 0 }
 0x199   :  { %v2288_v10 = vperm.slane %v2272_v15, 0  ;;  %v4185_v36 = vperm.slane %v3105_v62, 0  ;;  %v4187_v56 = vperm.slane %v3106_v51, 0  ;;  %v652_v0 = vunpack.c.l.b16 %v4089_v27 }
 0x19a   :  { %v4181_v47 = vperm.slane %v5555_v14, 0  ;;  %v1952_v9 = vrot.slane %v636_v19, 3  ;;  %v653_v52 = vunpack.c.l.b16 %v636_v19  ;;  %v2290_v30 = vperm.slane %v2274_v40, 0 }
 0x19b   :  { %v2292_v39 = vperm.slane %v2276_v61, 0 }
 0x19c   :  { %v1968_v48 = vsel %vm1905_vm11, %v636_v19, %v1952_v9  ;;  %v1970_v63 = vsel %vm1910_vm8, %v636_v19, %v1952_v9  ;;  %v1973_v35 = vsel %vm1914_vm9, %v636_v19, %v1952_v9  ;;  %v1976_v26 = vsel %vm1918_vm10, %v636_v19, %v1952_v9 }
 0x19d   :  { %v1972_v13 = vrot.slane %v1970_v63, 1  ;;  %v1975_v31 = vrot.slane %v1973_v35, 2  ;;  %v1978_v22 = vrot.slane %v1976_v26, 3  ;;  %v1988_v50 = vunpack.i.h.s16 %v1968_v48 }
 0x19e   :  { %v3111_v15 = vpack.i.b16 %v1968_v48, %v1968_v48  ;;  %v654_v62 = vpack.c.b16 %v653_v52, %v652_v0  ;;  %v3040_v0 = vld [vmem:[%s5454_s0 + $0x48] sm:$0xff] }
 0x19f   :  { %v1990_v51 = vunpack.i.h.s16 %v1972_v13  ;;  %v1992_v14 = vunpack.i.h.s16 %v1975_v31  ;;  %v1994_v2 = vunpack.i.h.s16 %v1978_v22  ;;  %v2318_v27 = vpack.i.b16 %v1988_v50, %v1988_v50  ;;  %v5557_v50 = vld [vmem:[#allocation17_spill] sm:$0xff] }
 0x1a0   :  { %v3112_v25 = vpack.i.b16 %v1972_v13, %v1972_v13  ;;  %v3113_v5 = vpack.i.b16 %v1975_v31, %v1975_v31  ;;  %v3114_v49 = vpack.i.b16 %v1978_v22, %v1978_v22  ;;  %v4194_v24 = vperm.slane %v3111_v15, 0  ;;  %664 = vmatmul.bf16.vlgmr.msra.gmra.mxu0 %v654_v62  ;;  %678 = vmatmul.bf16.vlgmr.msra.gmra.mxu1 %v654_v62  ;;  %v5560_v15 = vld [vmem:[#allocation19_spill] sm:$0xff] }
 0x1a1   :  { %v2320_v19 = vpack.i.b16 %v1990_v51, %v1990_v51  ;;  %v2322_v9 = vpack.i.b16 %v1992_v14, %v1992_v14  ;;  %v2324_v63 = vpack.i.b16 %v1994_v2, %v1994_v2  ;;  %v2334_v35 = vperm.slane %v2318_v27, 0  ;;  %692 = vmatmul.bf16.vlgmr.msra.gmra.mxu2 %v654_v62  ;;  %706 = vmatmul.bf16.vlgmr.msra.gmra.mxu3 %v654_v62  ;;  %v5561_v62 = vld [vmem:[#allocation21_spill] sm:$0xff]  ;;  %v5562_v51 = vld [vmem:[#allocation24_spill] sm:$0xff]  ;;  %v5563_v14 = vld [vmem:[#allocation22_spill] sm:$0xff] }
 0x1a2   :  { %v4196_v40 = vperm.slane %v3112_v25, 0  ;;  %v4198_v61 = vperm.slane %v3113_v5, 0  ;;  %v4200_v52 = vperm.slane %v3114_v49, 0  ;;  %1078 = vmatpush.bf16.msra.mxu0 %v3483_v3  ;;  %1092 = vmatpush.bf16.msra.mxu1 %v3494_v7  ;;  %v5564_v27 = vld [vmem:[#allocation23_spill] sm:$0xff] }
 0x1a3   :  { %v2336_v48 = vperm.slane %v2320_v19, 0  ;;  %v2338_v2 = vperm.slane %v2322_v9, 0  ;;  %v2340_v26 = vperm.slane %v2324_v63, 0  ;;  %v4210_v25 = vsel %vm4119_vm12, %v2286_v44, %v2334_v35  ;;  %1106 = vmatpush.bf16.msra.mxu2 %v3534_v21  ;;  %1120 = vmatpush.bf16.msra.mxu3 %v3496_v8  ;;  %v5565_v19 = vld [vmem:[#allocation25_spill] sm:$0xff]  ;;  %v5566_v9 = vld [vmem:[#allocation27_spill] sm:$0xff]  ;;  %v5567_v63 = vld [vmem:[#allocation26_spill] sm:$0xff] }
 0x1a4   :  { %v3039_v35 = vld [vmem:[%s5454_s0 + $0x40] sm:$0xff] }
 0x1a5   :  { %v4228_v13 = vsel %vm4119_vm12, %v2288_v10, %v2336_v48  ;;  %v4232_v31 = vsel %vm4119_vm12, %v2290_v30, %v2338_v2  ;;  %v4236_v22 = vsel %vm4119_vm12, %v2292_v39, %v2340_v26  ;;  %v5556_v10 = vld [vmem:[#allocation15_spill] sm:$0xff]  ;;  %v5558_v30 = vld [vmem:[#allocation20_spill] sm:$0xff]  ;;  %v5559_v39 = vld [vmem:[#allocation18_spill] sm:$0xff]  ;;  %v642_v48 = vunpack.c.l.bf16 %v3039_v35 }
 0x1a6   :  { %1079 = vmatpush.bf16.msra.mxu0 %v3508_v12  ;;  %1093 = vmatpush.bf16.msra.mxu1 %v3521_v16  ;;  %v643_v2 = vunpack.c.h.bf16 %v3039_v35 }
 0x1a7   :  { %1107 = vmatpush.bf16.msra.mxu2 %v3573_v34  ;;  %1121 = vmatpush.bf16.msra.mxu3 %v3523_v17 }
 0x1aa   :  { %1080 = vmatpush.bf16.msra.mxu0 %v3556_v28  ;;  %1094 = vmatpush.bf16.msra.mxu1 %v3569_v32 }
 0x1ab   :  { %1108 = vmatpush.bf16.msra.mxu2 %v3597_v42  ;;  %1122 = vmatpush.bf16.msra.mxu3 %v3571_v33 }
 0x1ae   :  { %1081 = vmatpush.bf16.msra.mxu0 %v3595_v41  ;;  %1095 = vmatpush.bf16.msra.mxu1 %v3607_v45 }
 0x1af   :  { %1109 = vmatpush.bf16.msra.mxu2 %v3633_v54  ;;  %1123 = vmatpush.bf16.msra.mxu3 %v3609_v46 }
 0x1b2   :  { %1082 = vmatpush.bf16.msra.mxu0 %v3631_v53  ;;  %1096 = vmatpush.bf16.msra.mxu1 %v3643_v57 }
 0x1b3   :  { %1110 = vmatpush.bf16.msra.mxu2 %v3672_v4  ;;  %1124 = vmatpush.bf16.msra.mxu3 %v3645_v58 }
 0x1b6   :  { %1083 = vmatpush.bf16.msra.mxu0 %v5556_v10  ;;  %1097 = vmatpush.bf16.msra.mxu1 %v5557_v50 }
 0x1b7   :  { %1111 = vmatpush.bf16.msra.mxu2 %v5558_v30  ;;  %1125 = vmatpush.bf16.msra.mxu3 %v5559_v39 }
 0x1ba   :  { %1084 = vmatpush.bf16.msra.mxu0 %v5560_v15  ;;  %1098 = vmatpush.bf16.msra.mxu1 %v5561_v62 }
 0x1bb   :  { %1112 = vmatpush.bf16.msra.mxu2 %v5562_v51  ;;  %1126 = vmatpush.bf16.msra.mxu3 %v5563_v14 }
 0x1be   :  { %1085 = vmatpush.bf16.msra.mxu0 %v5564_v27  ;;  %1099 = vmatpush.bf16.msra.mxu1 %v5565_v19  ;;  %v645_v27 = vunpack.c.h.bf16 %v3040_v0 }
 0x1bf   :  { %1113 = vmatpush.bf16.msra.mxu2 %v5566_v9  ;;  %1127 = vmatpush.bf16.msra.mxu3 %v5567_v63  ;;  %v3041_v9 = vld [vmem:[%s5454_s0 + $0x50] sm:$0xff] }
 0x1c0   :  { %v646_v14 = vunpack.c.l.bf16 %v3041_v9  ;;  %v647_v51 = vunpack.c.h.bf16 %v3041_v9 }
 0x21d   :  { %v665_v26 = vpop.f32.mrf.mxu0  ;;  %v679_v44 = vpop.f32.mrf.mxu1 }
 0x21e   :  { %v712_v5 = vadd.f32 %v665_v26, %v642_v48  ;;  %v713_v49 = vadd.f32 %v679_v44, %v643_v2 }
 0x220   :  { %v3043_v19 = vmul.f32 -1.442695, %v712_v5  ;;  %v3045_v63 = vmul.f32 -1.442695, %v713_v49  ;;  %v3042_v49 = vld [vmem:[%s5454_s0 + $0x58] sm:$0xff] }
 0x221   :  { %v649_v9 = vunpack.c.h.bf16 %v3042_v49 }
 0x222   :  { %3266 = vpow2.f32 %v3043_v19  ;;  %v644_v19 = vunpack.c.l.bf16 %v3040_v0 }
 0x223   :  { %3268 = vpow2.f32 %v3045_v63 }
 0x224   :  { %v707_v35 = vpop.f32.mrf.mxu3 }
 0x225   :  { %v715_v62 = vadd.f32 %v707_v35, %v645_v27  ;;  %v667_v15 = vpop.f32.mrf.mxu0  ;;  %v681_v48 = vpop.f32.mrf.mxu1 }
 0x226   :  { %v716_v44 = vadd.f32 %v667_v15, %v646_v14  ;;  %v717_v2 = vadd.f32 %v681_v48, %v647_v51  ;;  %v693_v27 = vpop.f32.mrf.mxu2 }
 0x227   :  { %v3047_v26 = vmul.f32 -1.442695, %v715_v62  ;;  %v714_v51 = vadd.f32 %v693_v27, %v644_v19 }
 0x228   :  { %v3267_v39 = vpop.eup %3266  ;;  %v3044_v30 = vmul.f32 -1.442695, %v716_v44  ;;  %v3046_v58 = vmul.f32 -1.442695, %v717_v2 }
 0x229   :  { %v3269_v50 = vpop.eup %3268  ;;  %v726_v10 = vadd.f32 1.0, %v3267_v39  ;;  %3270 = vpow2.f32 %v3047_v26 }
 0x22a   :  { %v764_v5 = vadd.f32 1.0, %v3269_v50  ;;  %3272 = vpow2.f32 %v3044_v30  ;;  %v648_v30 = vunpack.c.l.bf16 %v3042_v49 }
 0x22b   :  { %3274 = vrcp.f32 %v726_v10  ;;  %vm733_vm0 = vweird.f32 %v726_v10 }
 0x22c   :  { %3276 = vrcp.f32 %v764_v5  ;;  %v709_v15 = vpop.f32.mrf.mxu3  ;;  %v775_v57 = vand.u32 2147483647, %v764_v5  ;;  %vm771_vm1 = vweird.f32 %v764_v5 }
 0x22d   :  { %3278 = vpow2.f32 %v3046_v58  ;;  %v719_v39 = vadd.f32 %v709_v15, %v649_v9  ;;  %v737_v9 = vand.u32 2147483647, %v726_v10  ;;  %v739_v15 = vand.u32 2147483648, %v726_v10 }
 0x22e   :  { %vm776_vm5 = vcmp.eq.f32.partialorder %v775_v57, 8.507059e+37 }
 0x22f   :  { %v3271_v62 = vpop.eup %3270  ;;  %v3048_v19 = vmul.f32 -1.442695, %v719_v39  ;;  %v740_v39 = vor.u32 1.1754944e-38, %v739_v15  ;;  %vm738_vm4 = vcmp.eq.f32.partialorder %v737_v9, 8.507059e+37 }
 0x230   :  { %v3273_v14 = vpop.eup %3272  ;;  %v4278_v63 = vadd.f32 1.0, %v3271_v62  ;;  %v777_v62 = vand.u32 2147483648, %v764_v5 }
 0x231   :  { %v3275_v35 = vpop.eup %3274  ;;  %v4280_v48 = vadd.f32 1.0, %v3273_v14  ;;  %v695_v14 = vpop.f32.mrf.mxu2 }
 0x232   :  { %v3277_v44 = vpop.eup %3276  ;;  %v729_v2 = vmul.f32 %v3275_v35, %v726_v10  ;;  %3280 = vrcp.f32 %v4278_v63  ;;  %vm734_vm14 = vweird.f32 %v3275_v35  ;;  %v778_v54 = vor.u32 1.1754944e-38, %v777_v62 }
 0x233   :  { %v3279_v50 = vpop.eup %3278  ;;  %v767_v0 = vmul.f32 %v3277_v44, %v764_v5  ;;  %3282 = vtanh.f32 %v714_v51  ;;  %vm772_vm15 = vweird.f32 %v3277_v44  ;;  %vm735_vm2 = vmor %vm733_vm0, %vm734_vm14  ;;  %v817_v15 = vand.u32 2147483648, %v4278_v63 }
 0x234   :  { %v730_v26 = vsub.f32 1.0, %v729_v2  ;;  %3284 = vrcp.f32 %v4280_v48  ;;  %v4284_v58 = vadd.f32 1.0, %v3279_v50  ;;  %v718_v2 = vadd.f32 %v695_v14, %v648_v30  ;;  %vm773_vm3 = vmor %vm771_vm1, %vm772_vm15 }
 0x235   :  { %v768_v27 = vsub.f32 1.0, %v767_v0  ;;  %vm748_vm6 = vweird.f32 %v4280_v48  ;;  %v752_v57 = vand.u32 2147483647, %v4280_v48  ;;  %vm811_vm15 = vweird.f32 %v4278_v63 }
 0x236   :  { %v731_v4 = vmul.f32 %v3275_v35, %v730_v26  ;;  %3286 = vrcp.f32 %v4284_v58 }
 0x237   :  { %v769_v53 = vmul.f32 %v3277_v44, %v768_v27  ;;  %3288 = vpow2.f32 %v3048_v19 }
 0x238   :  { %v4287_v51 = vpop.eup %3280  ;;  %v732_v49 = vadd.f32 %v3275_v35, %v731_v4  ;;  %3290 = vtanh.f32 %v718_v2  ;;  %v790_v2 = vand.u32 2147483647, %v4284_v58 }
 0x239   :  { %v3283_v50 = vpop.eup %3282  ;;  %v770_v0 = vadd.f32 %v3277_v44, %v769_v53  ;;  %v807_v26 = vmul.f32 %v4287_v51, %v4278_v63  ;;  %v5568_v53 = vld [vmem:[#allocation28_spill] sm:$0xff]  ;;  %vm812_vm13 = vweird.f32 %v4287_v51 }
 0x23a   :  { %v3285_v46 = vpop.eup %3284  ;;  %v736_v45 = vsel %vm735_vm2, %v3275_v35, %v732_v49  ;;  %vm4313_vm1 = vmor %vm811_vm15, %vm812_vm13  ;;  %vm786_vm2 = vweird.f32 %v4284_v58 }
 0x23b   :  { %v741_v27 = vsel %vm738_vm4, %v740_v39, %v736_v45  ;;  %v774_v41 = vsel %vm773_vm3, %v3277_v44, %v770_v0  ;;  %v808_v4 = vsub.f32 1.0, %v807_v26  ;;  %v744_v10 = vmul.f32 %v3285_v46, %v4280_v48 }
 0x23c   :  { %v3287_v30 = vpop.eup %3286  ;;  %v779_v19 = vsel %vm776_vm5, %v778_v54, %v774_v41  ;;  %v838_v5 = vmul.f32 %v3283_v50, %v741_v27  ;;  %v792_v45 = vand.u32 2147483648, %v4284_v58  ;;  %v754_v41 = vand.u32 2147483648, %v4280_v48 }
 0x23d   :  { %v836_v14 = vmul.f32 %v779_v19, %v5568_v53  ;;  %v809_v33 = vmul.f32 %v4287_v51, %v808_v4  ;;  %v745_v42 = vsub.f32 1.0, %v744_v10  ;;  %v782_v35 = vmul.f32 %v3287_v30, %v4284_v58  ;;  %v3289_v62 = vpop.eup %3288 }
 0x23e   :  { %vm749_vm7 = vweird.f32 %v3285_v46  ;;  %v4305_v50 = vadd.f32 1.0, %v3289_v62  ;;  %vm787_vm14 = vweird.f32 %v3287_v30  ;;  %v3291_v26 = vpop.eup %3290  ;;  %v815_v27 = vand.u32 2147483647, %v4278_v63 }
 0x23f   :  { %v4300_v54 = vadd.f32 %v838_v5, %v836_v14  ;;  %v783_v44 = vsub.f32 1.0, %v782_v35  ;;  %v746_v9 = vmul.f32 %v3285_v46, %v745_v42  ;;  %v810_v49 = vadd.f32 %v4287_v51, %v809_v33  ;;  %vm750_vm0 = vmor %vm748_vm6, %vm749_vm7 }
 0x240   :  { %v755_v33 = vor.u32 1.1754944e-38, %v754_v41  ;;  %vm753_vm3 = vcmp.eq.f32.partialorder %v752_v57, 8.507059e+37  ;;  %vm788_vm4 = vmor %vm786_vm2, %vm787_vm14  ;;  %v793_v63 = vor.u32 1.1754944e-38, %v792_v45  ;;  %v818_v5 = vor.u32 1.1754944e-38, %v817_v15 }
 0x241   :  { %5569 = vst [vmem:[#allocation28_spill] sm:$0xff] %v4300_v54  ;;  %3292 = vtanh.f32 %v4300_v54  ;;  %v784_v39 = vmul.f32 %v3287_v30, %v783_v44  ;;  %v747_v0 = vadd.f32 %v3285_v46, %v746_v9  ;;  %v814_v19 = vsel %vm4313_vm1, %v4287_v51, %v810_v49  ;;  %v5572_v44 = vld [vmem:[#allocation29_spill] sm:$0xff] }
 0x242   :  { %3294 = vrcp.f32 %v4305_v50  ;;  %vm791_vm5 = vcmp.eq.f32.partialorder %v790_v2, 8.507059e+37  ;;  %vm816_vm6 = vcmp.eq.f32.partialorder %v815_v27, 8.507059e+37  ;;  %v830_v45 = vand.u32 2147483647, %v4305_v50 }
 0x243   :  { %v751_v4 = vsel %vm750_vm0, %v3285_v46, %v747_v0  ;;  %v785_v10 = vadd.f32 %v3287_v30, %v784_v39  ;;  %v819_v41 = vsel %vm816_vm6, %v818_v5, %v814_v19  ;;  %v832_v49 = vand.u32 2147483648, %v4305_v50 }
 0x244   :  { %v756_v48 = vsel %vm753_vm3, %v755_v33, %v751_v4  ;;  %vm826_vm7 = vweird.f32 %v4305_v50  ;;  %vm4340_vm13 = vcmp.eq.f32.partialorder %v830_v45, 8.507059e+37 }
 0x245   :  { %v789_v53 = vsel %vm788_vm4, %v3287_v30, %v785_v10  ;;  %v839_v14 = vmul.f32 %v3291_v26, %v756_v48 }
 0x246   :  { %v794_v35 = vsel %vm791_vm5, %v793_v63, %v789_v53  ;;  %v833_v53 = vor.u32 1.1754944e-38, %v832_v49  ;;  %v5576_v49 = vsel %vm4119_vm12, %v3978_v60, %v4123_v6  ;;  %v5578_v6 = vsel %vm4119_vm12, %v4059_v38, %v4127_v37  ;;  %v5580_v37 = vld [vmem:[#allocation30_spill] sm:$0xff] }
 0x247   :  { %v3293_v62 = vpop.eup %3292  ;;  %v837_v58 = vmul.f32 %v794_v35, %v5572_v44 }
 0x248   :  { %v3295_v46 = vpop.eup %3294  ;;  %v844_v57 = vmul.f32 %v3293_v62, %v819_v41 }
 0x249   :  { %v4322_v9 = vadd.f32 %v839_v14, %v837_v58  ;;  %v822_v39 = vmul.f32 %v3295_v46, %v4305_v50  ;;  %vm827_vm14 = vweird.f32 %v3295_v46  ;;  %v5579_v50 = vsel %vm4119_vm12, %v4081_v18, %v4129_v11 }
 0x24a   :  { %v4325_v51 = vpack.c.bf16 %v844_v57, %v844_v57  ;;  %vm828_vm15 = vmor %vm826_vm7, %vm827_vm14 }
 0x24b   :  { %5573 = vst [vmem:[#allocation29_spill] sm:$0xff] %v4322_v9  ;;  %v823_v15 = vsub.f32 1.0, %v822_v39  ;;  %3296 = vtanh.f32 %v4322_v9 }
 0x24c   :  { %v1995_v30 = vrot.slane %v4325_v51, 3 }
 0x24d   :  { %v824_v2 = vmul.f32 %v3295_v46, %v823_v15 }
 0x24e   :  { %v1999_v0 = vsel %vm1905_vm11, %v4325_v51, %v1995_v30  ;;  %v2001_v26 = vsel %vm1910_vm8, %v4325_v51, %v1995_v30  ;;  %v2004_v27 = vsel %vm1914_vm9, %v4325_v51, %v1995_v30  ;;  %v2007_v33 = vsel %vm1918_vm10, %v4325_v51, %v1995_v30 }
 0x24f   :  { %v2003_v4 = vrot.slane %v2001_v26, 1  ;;  %v2006_v10 = vrot.slane %v2004_v27, 2  ;;  %v2009_v19 = vrot.slane %v2007_v33, 3  ;;  %v2024_v63 = vunpack.i.h.s16 %v1999_v0 }
 0x250   :  { %v3115_v48 = vpack.i.b16 %v1999_v0, %v1999_v0  ;;  %v825_v5 = vadd.f32 %v3295_v46, %v824_v2 }
 0x251   :  { %v2026_v14 = vunpack.i.h.s16 %v2003_v4  ;;  %v2028_v35 = vunpack.i.h.s16 %v2006_v10  ;;  %v2030_v62 = vunpack.i.h.s16 %v2009_v19  ;;  %v2358_v41 = vpack.i.b16 %v2024_v63, %v2024_v63  ;;  %v3297_v45 = vpop.eup %3296 }
 0x252   :  { %v3116_v44 = vpack.i.b16 %v2003_v4, %v2003_v4  ;;  %v3117_v58 = vpack.i.b16 %v2006_v10, %v2006_v10  ;;  %v3118_v57 = vpack.i.b16 %v2009_v19, %v2009_v19  ;;  %v2373_v39 = vperm.slane %v3115_v48, 0 }
 0x253   :  { %v2360_v15 = vpack.i.b16 %v2026_v14, %v2026_v14  ;;  %v2362_v30 = vpack.i.b16 %v2028_v35, %v2028_v35  ;;  %v2364_v9 = vpack.i.b16 %v2030_v62, %v2030_v62  ;;  %v2374_v26 = vperm.slane %v2358_v41, 0 }
 0x254   :  { %v2375_v27 = vperm.slane %v3116_v44, 0  ;;  %v2377_v33 = vperm.slane %v3117_v58, 0  ;;  %v2379_v54 = vperm.slane %v3118_v57, 0  ;;  %v4350_v2 = vsel %vm1905_vm11, %v5576_v49, %v2373_v39 }
 0x255   :  { %v2376_v0 = vperm.slane %v2360_v15, 0  ;;  %v2378_v4 = vperm.slane %v2362_v30, 0  ;;  %v2380_v10 = vperm.slane %v2364_v9, 0  ;;  %v4354_v19 = vsel %vm1905_vm11, %v4139_v55, %v2374_v26 }
 0x256   :  { %v5577_v63 = vsel %vm4119_vm12, %v4054_v43, %v4125_v29  ;;  %v4373_v55 = vsel %vm1905_vm11, %v5578_v6, %v2377_v33  ;;  %v4381_v9 = vsel %vm1905_vm11, %v5579_v50, %v2379_v54  ;;  %v829_v43 = vsel %vm828_vm15, %v3295_v46, %v825_v5 }
 0x257   :  { %v4365_v60 = vsel %vm1905_vm11, %v5577_v63, %v2375_v27  ;;  %v4385_v29 = vsel %vm1905_vm11, %v4160_v1, %v2376_v0  ;;  %v4389_v48 = vsel %vm1905_vm11, %v4164_v59, %v2378_v4  ;;  %v4393_v38 = vsel %vm1905_vm11, %v5580_v37, %v2380_v10 }
 0x258   :  { %v834_v14 = vsel %vm4340_vm13, %v833_v53, %v829_v43  ;;  %v863_v46 = vunpack.c.l.b16 %v4325_v51  ;;  %v5581_v43 = vsel %vm4119_vm12, %v4181_v47, %v4194_v24  ;;  %v5582_v24 = vsel %vm4119_vm12, %v4183_v20, %v4196_v40 }
 0x259   :  { %v845_v18 = vmul.f32 %v3297_v45, %v834_v14 }
 0x25b   :  { %v847_v11 = vpack.c.bf16 %v845_v18, %v845_v18 }
 0x25d   :  { %v1996_v54 = vrot.slane %v847_v11, 3  ;;  %v864_v35 = vunpack.c.l.b16 %v847_v11 }
 0x25f   :  { %v2012_v1 = vsel %vm1905_vm11, %v847_v11, %v1996_v54  ;;  %v2014_v5 = vsel %vm1910_vm8, %v847_v11, %v1996_v54  ;;  %v2017_v59 = vsel %vm1914_vm9, %v847_v11, %v1996_v54  ;;  %v2020_v62 = vsel %vm1918_vm10, %v847_v11, %v1996_v54 }
 0x260   :  { %v2016_v41 = vrot.slane %v2014_v5, 1  ;;  %v2019_v44 = vrot.slane %v2017_v59, 2  ;;  %v2022_v58 = vrot.slane %v2020_v62, 3  ;;  %v2032_v57 = vunpack.i.h.s16 %v2012_v1  ;;  %v5592_v5 = vld [vmem:[#allocation13_spill] sm:$0xff]  ;;  %v5593_v59 = vld [vmem:[#allocation16_spill] sm:$0xff]  ;;  %v5594_v62 = vld [vmem:[#allocation14_spill] sm:$0xff] }
 0x261   :  { %v3119_v42 = vpack.i.b16 %v2012_v1, %v2012_v1  ;;  %v865_v53 = vpack.c.b16 %v864_v35, %v863_v46  ;;  %v5583_v35 = vsel %vm4119_vm12, %v4185_v36, %v4198_v61  ;;  %v5584_v46 = vsel %vm4119_vm12, %v4187_v56, %v4200_v52  ;;  %v5586_v56 = vld [vmem:[#allocation6_spill] sm:$0xff]  ;;  %v5587_v61 = vld [vmem:[#allocation7_spill] sm:$0xff]  ;;  %v5588_v52 = vld [vmem:[#allocation9_spill] sm:$0xff] }
 0x262   :  { %v2034_v39 = vunpack.i.h.s16 %v2016_v41  ;;  %v2036_v45 = vunpack.i.h.s16 %v2019_v44  ;;  %v2038_v15 = vunpack.i.h.s16 %v2022_v58  ;;  %v2366_v30 = vpack.i.b16 %v2032_v57, %v2032_v57  ;;  %v5598_v57 = vld [vmem:[#allocation18_spill] sm:$0xff] }
 0x263   :  { %v3120_v26 = vpack.i.b16 %v2016_v41, %v2016_v41  ;;  %v3121_v51 = vpack.i.b16 %v2019_v44, %v2019_v44  ;;  %v3122_v27 = vpack.i.b16 %v2022_v58, %v2022_v58  ;;  %v2381_v33 = vperm.slane %v3119_v42, 0  ;;  %875 = vmatmul.bf16.vlgmr.msrb.gmra.mxu0 %v865_v53  ;;  %889 = vmatmul.bf16.vlgmr.msrb.gmra.mxu1 %v865_v53  ;;  %v5595_v41 = vld [vmem:[#allocation15_spill] sm:$0xff]  ;;  %v5596_v44 = vld [vmem:[#allocation17_spill] sm:$0xff]  ;;  %v5597_v58 = vld [vmem:[#allocation20_spill] sm:$0xff] }
 0x264   :  { %v2368_v49 = vpack.i.b16 %v2034_v39, %v2034_v39  ;;  %v2370_v0 = vpack.i.b16 %v2036_v45, %v2036_v45  ;;  %v2372_v4 = vpack.i.b16 %v2038_v15, %v2038_v15  ;;  %v2382_v10 = vperm.slane %v2366_v30, 0  ;;  %903 = vmatmul.bf16.vlgmr.msrb.gmra.mxu2 %v865_v53  ;;  %917 = vmatmul.bf16.vlgmr.msrb.gmra.mxu3 %v865_v53  ;;  %v5599_v42 = vld [vmem:[#allocation19_spill] sm:$0xff]  ;;  %v5600_v53 = vld [vmem:[#allocation21_spill] sm:$0xff]  ;;  %v5601_v39 = vld [vmem:[#allocation24_spill] sm:$0xff] }
 0x265   :  { %v2383_v63 = vperm.slane %v3120_v26, 0  ;;  %v2385_v6 = vperm.slane %v3121_v51, 0  ;;  %v2387_v50 = vperm.slane %v3122_v27, 0  ;;  %v4408_v37 = vsel %vm1905_vm11, %v5581_v43, %v2381_v33  ;;  %1289 = vmatpush.bf16.msrb.mxu0 %v3483_v3  ;;  %1303 = vmatpush.bf16.msrb.mxu1 %v3494_v7  ;;  %v5602_v45 = vld [vmem:[#allocation22_spill] sm:$0xff]  ;;  %v5603_v15 = vld [vmem:[#allocation23_spill] sm:$0xff]  ;;  %v5604_v30 = vld [vmem:[#allocation25_spill] sm:$0xff] }
 0x266   :  { %v2384_v14 = vperm.slane %v2368_v49, 0  ;;  %v2386_v18 = vperm.slane %v2370_v0, 0  ;;  %v2388_v11 = vperm.slane %v2372_v4, 0  ;;  %v4414_v54 = vsel %vm1905_vm11, %v4210_v25, %v2382_v10  ;;  %1317 = vmatpush.bf16.msrb.mxu2 %v3534_v21  ;;  %1331 = vmatpush.bf16.msrb.mxu3 %v3496_v8  ;;  %v5605_v26 = vld [vmem:[#allocation27_spill] sm:$0xff]  ;;  %v5606_v51 = vld [vmem:[#allocation26_spill] sm:$0xff] }
 0x267   :  { %v4424_v47 = vsel %vm1905_vm11, %v5582_v24, %v2383_v63  ;;  %v4432_v25 = vsel %vm1905_vm11, %v5583_v35, %v2385_v6  ;;  %v4440_v1 = vsel %vm1905_vm11, %v5584_v46, %v2387_v50  ;;  %v3049_v27 = vld [vmem:[%s5454_s0 + $0x60] sm:$0xff]  ;;  %v3050_v6 = vld [vmem:[%s5454_s0 + $0x68] sm:$0xff]  ;;  %v3051_v50 = vld [vmem:[%s5454_s0 + $0x70] sm:$0xff] }
 0x268   :  { %v4444_v20 = vsel %vm1905_vm11, %v4228_v13, %v2384_v14  ;;  %v4448_v40 = vsel %vm1905_vm11, %v4232_v31, %v2386_v18  ;;  %v4452_v36 = vsel %vm1905_vm11, %v4236_v22, %v2388_v11  ;;  %v5589_v13 = vld [vmem:[#allocation12_spill] sm:$0xff]  ;;  %v5590_v31 = vld [vmem:[#allocation10_spill] sm:$0xff]  ;;  %v5591_v22 = vld [vmem:[#allocation11_spill] sm:$0xff]  ;;  %v853_v33 = vunpack.c.l.bf16 %v3049_v27 }
 0x269   :  { %1290 = vmatpush.bf16.msrb.mxu0 %v3508_v12  ;;  %1304 = vmatpush.bf16.msrb.mxu1 %v3521_v16  ;;  %v854_v49 = vunpack.c.h.bf16 %v3049_v27  ;;  %v856_v18 = vunpack.c.h.bf16 %v3050_v6  ;;  %v857_v11 = vunpack.c.l.bf16 %v3051_v50  ;;  %v858_v24 = vunpack.c.h.bf16 %v3051_v50  ;;  %v3052_v50 = vld [vmem:[%s5454_s0 + $0x78] sm:$0xff] }
 0x26a   :  { %1318 = vmatpush.bf16.msrb.mxu2 %v3573_v34  ;;  %1332 = vmatpush.bf16.msrb.mxu3 %v3523_v17 }
 0x26d   :  { %1291 = vmatpush.bf16.msrb.mxu0 %v3556_v28  ;;  %1305 = vmatpush.bf16.msrb.mxu1 %v3569_v32 }
 0x26e   :  { %1319 = vmatpush.bf16.msrb.mxu2 %v5585_v23  ;;  %1333 = vmatpush.bf16.msrb.mxu3 %v5586_v56 }
 0x271   :  { %1292 = vmatpush.bf16.msrb.mxu0 %v5587_v61  ;;  %1306 = vmatpush.bf16.msrb.mxu1 %v5588_v52 }
 0x272   :  { %1320 = vmatpush.bf16.msrb.mxu2 %v5589_v13  ;;  %1334 = vmatpush.bf16.msrb.mxu3 %v5590_v31 }
 0x275   :  { %1293 = vmatpush.bf16.msrb.mxu0 %v5591_v22  ;;  %1307 = vmatpush.bf16.msrb.mxu1 %v5592_v5 }
 0x276   :  { %1321 = vmatpush.bf16.msrb.mxu2 %v5593_v59  ;;  %1335 = vmatpush.bf16.msrb.mxu3 %v5594_v62 }
 0x279   :  { %1294 = vmatpush.bf16.msrb.mxu0 %v5595_v41  ;;  %1308 = vmatpush.bf16.msrb.mxu1 %v5596_v44 }
 0x27a   :  { %1322 = vmatpush.bf16.msrb.mxu2 %v5597_v58  ;;  %1336 = vmatpush.bf16.msrb.mxu3 %v5598_v57 }
 0x27d   :  { %1295 = vmatpush.bf16.msrb.mxu0 %v5599_v42  ;;  %1309 = vmatpush.bf16.msrb.mxu1 %v5600_v53 }
 0x27e   :  { %1323 = vmatpush.bf16.msrb.mxu2 %v5601_v39  ;;  %1337 = vmatpush.bf16.msrb.mxu3 %v5602_v45 }
 0x281   :  { %1296 = vmatpush.bf16.msrb.mxu0 %v5603_v15  ;;  %1310 = vmatpush.bf16.msrb.mxu1 %v5604_v30 }
 0x282   :  { %1324 = vmatpush.bf16.msrb.mxu2 %v5605_v26  ;;  %1338 = vmatpush.bf16.msrb.mxu3 %v5606_v51 }
 0x2e0   :  { %v876_v0 = vpop.f32.mrf.mxu0  ;;  %v890_v4 = vpop.f32.mrf.mxu1 }
 0x2e1   :  { %v923_v10 = vadd.f32 %v876_v0, %v853_v33  ;;  %v924_v63 = vadd.f32 %v890_v4, %v854_v49 }
 0x2e3   :  { %v3053_v43 = vmul.f32 -1.442695, %v923_v10  ;;  %v3055_v14 = vmul.f32 -1.442695, %v924_v63  ;;  %v855_v63 = vunpack.c.l.bf16 %v3050_v6 }
 0x2e5   :  { %3298 = vpow2.f32 %v3053_v43 }
 0x2e6   :  { %3300 = vpow2.f32 %v3055_v14  ;;  %v860_v14 = vunpack.c.h.bf16 %v3052_v50 }
 0x2e7   :  { %v918_v35 = vpop.f32.mrf.mxu3  ;;  %v904_v43 = vpop.f32.mrf.mxu2 }
 0x2e8   :  { %v926_v46 = vadd.f32 %v918_v35, %v856_v18  ;;  %v878_v27 = vpop.f32.mrf.mxu0  ;;  %v892_v33 = vpop.f32.mrf.mxu1 }
 0x2e9   :  { %v927_v49 = vadd.f32 %v878_v27, %v857_v11  ;;  %v928_v0 = vadd.f32 %v892_v33, %v858_v24  ;;  %v925_v11 = vadd.f32 %v904_v43, %v855_v63 }
 0x2ea   :  { %v3057_v4 = vmul.f32 -1.442695, %v926_v46 }
 0x2eb   :  { %v3299_v51 = vpop.eup %3298  ;;  %v3054_v26 = vmul.f32 -1.442695, %v927_v49  ;;  %v3056_v45 = vmul.f32 -1.442695, %v928_v0 }
 0x2ec   :  { %v3301_v30 = vpop.eup %3300  ;;  %v937_v15 = vadd.f32 1.0, %v3299_v51  ;;  %3302 = vpow2.f32 %v3057_v4  ;;  %v859_v4 = vunpack.c.l.bf16 %v3052_v50 }
 0x2ed   :  { %v975_v10 = vadd.f32 1.0, %v3301_v30  ;;  %3304 = vpow2.f32 %v3054_v26 }
 0x2ee   :  { %3306 = vrcp.f32 %v937_v15  ;;  %vm944_vm2 = vweird.f32 %v937_v15 }
 0x2ef   :  { %3308 = vrcp.f32 %v975_v10  ;;  %v920_v24 = vpop.f32.mrf.mxu3  ;;  %v988_v43 = vand.u32 2147483648, %v975_v10  ;;  %v986_v53 = vand.u32 2147483647, %v975_v10  ;;  %v906_v42 = vpop.f32.mrf.mxu2  ;;  %vm982_vm1 = vweird.f32 %v975_v10 }
 0x2f0   :  { %3310 = vpow2.f32 %v3056_v45  ;;  %v930_v6 = vadd.f32 %v920_v24, %v860_v14  ;;  %v948_v45 = vand.u32 2147483647, %v937_v15 }
 0x2f1   :  { %vm987_vm6 = vcmp.eq.f32.partialorder %v986_v53, 8.507059e+37 }
 0x2f2   :  { %v3303_v18 = vpop.eup %3302  ;;  %v3058_v57 = vmul.f32 -1.442695, %v930_v6  ;;  %vm949_vm3 = vcmp.eq.f32.partialorder %v948_v45, 8.507059e+37  ;;  %v989_v6 = vor.u32 1.1754944e-38, %v988_v43 }
 0x2f3   :  { %v3305_v35 = vpop.eup %3304  ;;  %v4494_v46 = vadd.f32 1.0, %v3303_v18  ;;  %v950_v18 = vand.u32 2147483648, %v937_v15 }
 0x2f4   :  { %v3307_v51 = vpop.eup %3306  ;;  %v4496_v27 = vadd.f32 1.0, %v3305_v35 }
 0x2f5   :  { %v3309_v30 = vpop.eup %3308  ;;  %v940_v26 = vmul.f32 %v3307_v51, %v937_v15  ;;  %3312 = vrcp.f32 %v4494_v46  ;;  %vm945_vm12 = vweird.f32 %v3307_v51  ;;  %v951_v24 = vor.u32 1.1754944e-38, %v950_v18  ;;  %v5607_v18 = vld [vmem:[#allocation28_spill] sm:$0xff] }
 0x2f6   :  { %v3311_v33 = vpop.eup %3310  ;;  %v978_v49 = vmul.f32 %v3309_v30, %v975_v10  ;;  %3314 = vtanh.f32 %v925_v11  ;;  %vm983_vm0 = vweird.f32 %v3309_v30  ;;  %vm946_vm4 = vmor %vm944_vm2, %vm945_vm12  ;;  %vm1022_vm7 = vweird.f32 %v4494_v46 }
 0x2f7   :  { %v941_v0 = vsub.f32 1.0, %v940_v26  ;;  %3316 = vrcp.f32 %v4496_v27  ;;  %v4500_v39 = vadd.f32 1.0, %v3311_v33  ;;  %vm984_vm5 = vmor %vm982_vm1, %vm983_vm0  ;;  %vm959_vm13 = vweird.f32 %v4496_v27 }
 0x2f8   :  { %v979_v63 = vsub.f32 1.0, %v978_v49  ;;  %v929_v49 = vadd.f32 %v906_v42, %v859_v4  ;;  %v1028_v42 = vand.u32 2147483648, %v4494_v46  ;;  %v963_v43 = vand.u32 2147483647, %v4496_v27 }
 0x2f9   :  { %v942_v35 = vmul.f32 %v3307_v51, %v941_v0  ;;  %3318 = vrcp.f32 %v4500_v39  ;;  %vm997_vm2 = vweird.f32 %v4500_v39 }
 0x2fa   :  { %v980_v58 = vmul.f32 %v3309_v30, %v979_v63  ;;  %3320 = vpow2.f32 %v3058_v57 }
 0x2fb   :  { %v4503_v14 = vpop.eup %3312  ;;  %v943_v11 = vadd.f32 %v3307_v51, %v942_v35  ;;  %3322 = vtanh.f32 %v929_v49 }
 0x2fc   :  { %v3315_v50 = vpop.eup %3314  ;;  %v981_v26 = vadd.f32 %v3309_v30, %v980_v58  ;;  %v1018_v33 = vmul.f32 %v4503_v14, %v4494_v46  ;;  %vm1023_vm15 = vweird.f32 %v4503_v14 }
 0x2fd   :  { %v3317_v0 = vpop.eup %3316  ;;  %v947_v63 = vsel %vm946_vm4, %v3307_v51, %v943_v11  ;;  %v1003_v11 = vand.u32 2147483648, %v4500_v39  ;;  %vm4530_vm1 = vmor %vm1022_vm7, %vm1023_vm15  ;;  %vm2680_vm7 = vcmask 1041408  }
 0x2fe   :  { %v952_v44 = vsel %vm949_vm3, %v951_v24, %v947_v63  ;;  %v985_v41 = vsel %vm984_vm5, %v3309_v30, %v981_v26  ;;  %v1019_v10 = vsub.f32 1.0, %v1018_v33  ;;  %v955_v15 = vmul.f32 %v3317_v0, %v4496_v27 }
 0x2ff   :  { %v990_v45 = vsel %vm987_vm6, %v989_v6, %v985_v41  ;;  %v1049_v35 = vmul.f32 %v3315_v50, %v952_v44  ;;  %v3319_v62 = vpop.eup %3318  ;;  %vm960_vm14 = vweird.f32 %v3317_v0  ;;  %v965_v41 = vand.u32 2147483648, %v4496_v27 }
 0x300   :  { %v1047_v58 = vmul.f32 %v990_v45, %v5607_v18  ;;  %v1020_v59 = vmul.f32 %v4503_v14, %v1019_v10  ;;  %v956_v5 = vsub.f32 1.0, %v955_v15  ;;  %v993_v57 = vmul.f32 %v3319_v62, %v4500_v39  ;;  %v3321_v44 = vpop.eup %3320  ;;  %vm961_vm0 = vmor %vm959_vm13, %vm960_vm14 }
 0x301   :  { %v4522_v24 = vadd.f32 1.0, %v3321_v44  ;;  %vm998_vm12 = vweird.f32 %v3319_v62  ;;  %v3323_v33 = vpop.eup %3322  ;;  %v966_v63 = vor.u32 1.1754944e-38, %v965_v41  ;;  %vm964_vm3 = vcmp.eq.f32.partialorder %v963_v43, 8.507059e+37 }
 0x302   :  { %v4514_v53 = vadd.f32 %v1049_v35, %v1047_v58  ;;  %v957_v51 = vmul.f32 %v3317_v0, %v956_v5  ;;  %v1021_v30 = vadd.f32 %v4503_v14, %v1020_v59  ;;  %v994_v4 = vsub.f32 1.0, %v993_v57  ;;  %vm999_vm4 = vmor %vm997_vm2, %vm998_vm12 }
 0x303   :  { %v1026_v5 = vand.u32 2147483647, %v4494_v46  ;;  %v1001_v59 = vand.u32 2147483647, %v4500_v39  ;;  %v1029_v15 = vor.u32 1.1754944e-38, %v1028_v42  ;;  %v1004_v45 = vor.u32 1.1754944e-38, %v1003_v11 }
 0x304   :  { %3324 = vtanh.f32 %v4514_v53  ;;  %v958_v50 = vadd.f32 %v3317_v0, %v957_v51  ;;  %v995_v26 = vmul.f32 %v3319_v62, %v994_v4  ;;  %v1025_v10 = vsel %vm4530_vm1, %v4503_v14, %v1021_v30  ;;  %v5610_v51 = vld [vmem:[#allocation29_spill] sm:$0xff] }
 0x305   :  { %3326 = vrcp.f32 %v4522_v24  ;;  %vm1027_vm5 = vcmp.eq.f32.partialorder %v1026_v5, 8.507059e+37  ;;  %vm1002_vm6 = vcmp.eq.f32.partialorder %v1001_v59, 8.507059e+37  ;;  %vm2681_vm13 = vsmask.f32 1280 }
 0x306   :  { %v962_v6 = vsel %vm961_vm0, %v3317_v0, %v958_v50  ;;  %v996_v27 = vadd.f32 %v3319_v62, %v995_v26  ;;  %v1030_v0 = vsel %vm1027_vm5, %v1029_v15, %v1025_v10  ;;  %v1043_v11 = vand.u32 2147483648, %v4522_v24  ;;  %vm4560_vm12 = vmand %vm2680_vm7, %vm2681_vm13 }
 0x307   :  { %v967_v46 = vsel %vm964_vm3, %v966_v63, %v962_v6  ;;  %vm1037_vm14 = vweird.f32 %v4522_v24 }
 0x308   :  { %v1000_v35 = vsel %vm999_vm4, %v3319_v62, %v996_v27  ;;  %v1050_v44 = vmul.f32 %v3323_v33, %v967_v46  ;;  %v1041_v62 = vand.u32 2147483647, %v4522_v24 }
 0x309   :  { %v1005_v58 = vsel %vm1002_vm6, %v1004_v45, %v1000_v35 }
 0x30a   :  { %v3325_v18 = vpop.eup %3324  ;;  %v1048_v41 = vmul.f32 %v1005_v58, %v5610_v51  ;;  %vm1042_vm1 = vcmp.eq.f32.partialorder %v1041_v62, 8.507059e+37 }
 0x30b   :  { %v1055_v57 = vmul.f32 %v3325_v18, %v1030_v0  ;;  %v3327_v4 = vpop.eup %3326  ;;  %v5642_v18 = vld [vmem:[#allocation5_spill] sm:$0xff] }
 0x30c   :  { %v1033_v39 = vmul.f32 %v3327_v4, %v4522_v24  ;;  %v4544_v30 = vadd.f32 %v1050_v44, %v1048_v41  ;;  %vm1038_vm15 = vweird.f32 %v3327_v4 }
 0x30d   :  { %v4540_v14 = vpack.c.bf16 %v1055_v57, %v1055_v57  ;;  %vm1039_vm0 = vmor %vm1037_vm14, %vm1038_vm15 }
 0x30e   :  { %v1034_v43 = vsub.f32 1.0, %v1033_v39  ;;  %3328 = vtanh.f32 %v4544_v30 }
 0x30f   :  { %v2039_v42 = vrot.slane %v4540_v14, 3 }
 0x310   :  { %v1035_v27 = vmul.f32 %v3327_v4, %v1034_v43 }
 0x311   :  { %v2043_v50 = vsel %vm1905_vm11, %v4540_v14, %v2039_v42  ;;  %v2045_v5 = vsel %vm1910_vm8, %v4540_v14, %v2039_v42  ;;  %v2048_v26 = vsel %vm1914_vm9, %v4540_v14, %v2039_v42  ;;  %v2051_v59 = vsel %vm1918_vm10, %v4540_v14, %v2039_v42 }
 0x312   :  { %v2047_v33 = vrot.slane %v2045_v5, 1  ;;  %v2050_v49 = vrot.slane %v2048_v26, 2  ;;  %v2053_v6 = vrot.slane %v2051_v59, 3  ;;  %v2068_v63 = vunpack.i.h.s16 %v2043_v50 }
 0x313   :  { %v3123_v10 = vpack.i.b16 %v2043_v50, %v2043_v50 }
 0x314   :  { %v2070_v15 = vunpack.i.h.s16 %v2047_v33  ;;  %v2072_v45 = vunpack.i.h.s16 %v2050_v49  ;;  %v2074_v46 = vunpack.i.h.s16 %v2053_v6  ;;  %v2390_v35 = vpack.i.b16 %v2068_v63, %v2068_v63  ;;  %v3329_v63 = vpop.eup %3328 }
 0x315   :  { %v3124_v0 = vpack.i.b16 %v2047_v33, %v2047_v33  ;;  %v3125_v58 = vpack.i.b16 %v2050_v49, %v2050_v49  ;;  %v3126_v57 = vpack.i.b16 %v2053_v6, %v2053_v6  ;;  %v4564_v51 = vperm.slane %v3123_v10, 0 }
 0x316   :  { %v2392_v41 = vpack.i.b16 %v2070_v15, %v2070_v15  ;;  %v2394_v44 = vpack.i.b16 %v2072_v45, %v2072_v45  ;;  %v2396_v39 = vpack.i.b16 %v2074_v46, %v2074_v46  ;;  %v2406_v42 = vperm.slane %v2390_v35, 0 }
 0x317   :  { %v4566_v43 = vperm.slane %v3124_v0, 0  ;;  %v4568_v50 = vperm.slane %v3125_v58, 0  ;;  %v4570_v5 = vperm.slane %v3126_v57, 0  ;;  %v1036_v46 = vadd.f32 %v3327_v4, %v1035_v27 }
 0x318   :  { %v2408_v59 = vperm.slane %v2392_v41, 0  ;;  %v2410_v33 = vperm.slane %v2394_v44, 0  ;;  %v2412_v49 = vperm.slane %v2396_v39, 0  ;;  %v4579_v6 = vsel %vm4560_vm12, %v4354_v19, %v2406_v42 }
 0x319   :  { %v1044_v27 = vor.u32 1.1754944e-38, %v1043_v11  ;;  %v1040_v58 = vsel %vm1039_vm0, %v3327_v4, %v1036_v46 }
 0x31a   :  { %v4596_v19 = vsel %vm4560_vm12, %v4385_v29, %v2408_v59  ;;  %v4601_v35 = vsel %vm4560_vm12, %v4389_v48, %v2410_v33  ;;  %v4606_v0 = vsel %vm4560_vm12, %v4393_v38, %v2412_v49  ;;  %v1074_v48 = vunpack.c.l.b16 %v4540_v14 }
 0x31b   :  { %v1045_v57 = vsel %vm1042_vm1, %v1044_v27, %v1040_v58 }
 0x31c   :  { %v1056_v29 = vmul.f32 %v3329_v63, %v1045_v57 }
 0x31e   :  { %v1058_v41 = vpack.c.bf16 %v1056_v29, %v1056_v29 }
 0x320   :  { %v2040_v44 = vrot.slane %v1058_v41, 3  ;;  %v1075_v39 = vunpack.c.l.b16 %v1058_v41 }
 0x322   :  { %v2056_v42 = vsel %vm1905_vm11, %v1058_v41, %v2040_v44  ;;  %v2058_v59 = vsel %vm1910_vm8, %v1058_v41, %v2040_v44  ;;  %v2061_v38 = vsel %vm1914_vm9, %v1058_v41, %v2040_v44  ;;  %v2064_v33 = vsel %vm1918_vm10, %v1058_v41, %v2040_v44 }
 0x323   :  { %v2060_v24 = vrot.slane %v2058_v59, 1  ;;  %v2063_v49 = vrot.slane %v2061_v38, 2  ;;  %v2066_v11 = vrot.slane %v2064_v33, 3  ;;  %v2076_v4 = vunpack.i.h.s16 %v2056_v42 }
 0x324   :  { %v3127_v62 = vpack.i.b16 %v2056_v42, %v2056_v42  ;;  %v1076_v46 = vpack.c.b16 %v1075_v39, %v1074_v48 }
 0x325   :  { %v2078_v63 = vunpack.i.h.s16 %v2060_v24  ;;  %v2080_v27 = vunpack.i.h.s16 %v2063_v49  ;;  %v2082_v58 = vunpack.i.h.s16 %v2066_v11  ;;  %v2398_v57 = vpack.i.b16 %v2076_v4, %v2076_v4 }
 0x326   :  { %v3128_v29 = vpack.i.b16 %v2060_v24, %v2060_v24  ;;  %v3129_v14 = vpack.i.b16 %v2063_v49, %v2063_v49  ;;  %v3130_v45 = vpack.i.b16 %v2066_v11, %v2066_v11  ;;  %v4616_v15 = vperm.slane %v3127_v62, 0  ;;  %1086 = vmatmul.bf16.vlgmr.msra.gmra.mxu0 %v1076_v46  ;;  %1100 = vmatmul.bf16.vlgmr.msra.gmra.mxu1 %v1076_v46  ;;  %v5616_v62 = vld [vmem:[#allocation15_spill] sm:$0xff] }
 0x327   :  { %v2400_v10 = vpack.i.b16 %v2078_v63, %v2078_v63  ;;  %v2402_v26 = vpack.i.b16 %v2080_v27, %v2080_v27  ;;  %v2404_v41 = vpack.i.b16 %v2082_v58, %v2082_v58  ;;  %v2414_v44 = vperm.slane %v2398_v57, 0  ;;  %1114 = vmatmul.bf16.vlgmr.msra.gmra.mxu2 %v1076_v46  ;;  %1128 = vmatmul.bf16.vlgmr.msra.gmra.mxu3 %v1076_v46  ;;  %v5617_v46 = vld [vmem:[#allocation17_spill] sm:$0xff]  ;;  %v5618_v63 = vld [vmem:[#allocation20_spill] sm:$0xff]  ;;  %v5619_v27 = vld [vmem:[#allocation18_spill] sm:$0xff] }
 0x328   :  { %v4618_v59 = vperm.slane %v3128_v29, 0  ;;  %v4620_v39 = vperm.slane %v3129_v14, 0  ;;  %v4622_v48 = vperm.slane %v3130_v45, 0  ;;  %1500 = vmatpush.bf16.msra.mxu0 %v3483_v3  ;;  %1514 = vmatpush.bf16.msra.mxu1 %v3494_v7  ;;  %v5620_v58 = vld [vmem:[#allocation19_spill] sm:$0xff]  ;;  %v5621_v57 = vld [vmem:[#allocation21_spill] sm:$0xff]  ;;  %v5622_v29 = vld [vmem:[#allocation24_spill] sm:$0xff] }
 0x329   :  { %v2416_v38 = vperm.slane %v2400_v10, 0  ;;  %v2418_v33 = vperm.slane %v2402_v26, 0  ;;  %v2420_v24 = vperm.slane %v2404_v41, 0  ;;  %v4633_v49 = vsel %vm4560_vm12, %v4414_v54, %v2414_v44  ;;  %1528 = vmatpush.bf16.msra.mxu2 %v3534_v21  ;;  %1542 = vmatpush.bf16.msra.mxu3 %v3496_v8  ;;  %v5623_v14 = vld [vmem:[#allocation22_spill] sm:$0xff]  ;;  %v5624_v41 = vld [vmem:[#allocation23_spill] sm:$0xff]  ;;  %v5625_v44 = vld [vmem:[#allocation25_spill] sm:$0xff] }
 0x32b   :  { %v4652_v10 = vsel %vm4560_vm12, %v4444_v20, %v2416_v38  ;;  %v4657_v11 = vsel %vm4560_vm12, %v4448_v40, %v2418_v33  ;;  %v4662_v4 = vsel %vm4560_vm12, %v4452_v36, %v2420_v24  ;;  %v5613_v20 = vld [vmem:[#allocation13_spill] sm:$0xff]  ;;  %v5614_v40 = vld [vmem:[#allocation16_spill] sm:$0xff]  ;;  %v5615_v36 = vld [vmem:[#allocation14_spill] sm:$0xff] }
 0x32c   :  { %1501 = vmatpush.bf16.msra.mxu0 %v3508_v12  ;;  %1515 = vmatpush.bf16.msra.mxu1 %v3521_v16  ;;  %v5626_v38 = vld [vmem:[#allocation27_spill] sm:$0xff]  ;;  %v5627_v33 = vld [vmem:[#allocation26_spill] sm:$0xff] }
 0x32d   :  { %1529 = vmatpush.bf16.msra.mxu2 %v3573_v34  ;;  %1543 = vmatpush.bf16.msra.mxu3 %v3523_v17  ;;  %v3059_v24 = vld [vmem:[%s5454_s0 + $0x80] sm:$0xff] }
 0x32e   :  { %v1064_v54 = vunpack.c.l.bf16 %v3059_v24  ;;  %v1065_v26 = vunpack.c.h.bf16 %v3059_v24 }
 0x330   :  { %1502 = vmatpush.bf16.msra.mxu0 %v3556_v28  ;;  %1516 = vmatpush.bf16.msra.mxu1 %v3569_v32 }
 0x331   :  { %1530 = vmatpush.bf16.msra.mxu2 %v5585_v23  ;;  %1544 = vmatpush.bf16.msra.mxu3 %v5586_v56 }
 0x334   :  { %1503 = vmatpush.bf16.msra.mxu0 %v5587_v61  ;;  %1517 = vmatpush.bf16.msra.mxu1 %v5588_v52 }
 0x335   :  { %1531 = vmatpush.bf16.msra.mxu2 %v5589_v13  ;;  %1545 = vmatpush.bf16.msra.mxu3 %v5590_v31 }
 0x338   :  { %1504 = vmatpush.bf16.msra.mxu0 %v5591_v22  ;;  %1518 = vmatpush.bf16.msra.mxu1 %v5613_v20 }
 0x339   :  { %1532 = vmatpush.bf16.msra.mxu2 %v5614_v40  ;;  %1546 = vmatpush.bf16.msra.mxu3 %v5615_v36 }
 0x33c   :  { %1505 = vmatpush.bf16.msra.mxu0 %v5616_v62  ;;  %1519 = vmatpush.bf16.msra.mxu1 %v5617_v46 }
 0x33d   :  { %1533 = vmatpush.bf16.msra.mxu2 %v5618_v63  ;;  %1547 = vmatpush.bf16.msra.mxu3 %v5619_v27 }
 0x340   :  { %1506 = vmatpush.bf16.msra.mxu0 %v5620_v58  ;;  %1520 = vmatpush.bf16.msra.mxu1 %v5621_v57 }
 0x341   :  { %1534 = vmatpush.bf16.msra.mxu2 %v5622_v29  ;;  %1548 = vmatpush.bf16.msra.mxu3 %v5623_v14 }
 0x344   :  { %1507 = vmatpush.bf16.msra.mxu0 %v5624_v41  ;;  %1521 = vmatpush.bf16.msra.mxu1 %v5625_v44  ;;  %v3060_v41 = vld [vmem:[%s5454_s0 + $0x88] sm:$0xff] }
 0x345   :  { %1535 = vmatpush.bf16.msra.mxu2 %v5626_v38  ;;  %1549 = vmatpush.bf16.msra.mxu3 %v5627_v33  ;;  %v3061_v38 = vld [vmem:[%s5454_s0 + $0x90] sm:$0xff]  ;;  %v1067_v14 = vunpack.c.h.bf16 %v3060_v41 }
 0x346   :  { %v1068_v58 = vunpack.c.l.bf16 %v3061_v38  ;;  %v1069_v27 = vunpack.c.h.bf16 %v3061_v38 }
 0x3a3   :  { %v1087_v45 = vpop.f32.mrf.mxu0  ;;  %v1101_v42 = vpop.f32.mrf.mxu1 }
 0x3a4   :  { %v1134_v57 = vadd.f32 %v1087_v45, %v1064_v54  ;;  %v1135_v29 = vadd.f32 %v1101_v42, %v1065_v26 }
 0x3a6   :  { %v3063_v44 = vmul.f32 -1.442695, %v1134_v57  ;;  %v3065_v33 = vmul.f32 -1.442695, %v1135_v29  ;;  %v3062_v57 = vld [vmem:[%s5454_s0 + $0x98] sm:$0xff] }
 0x3a7   :  { %v1071_v38 = vunpack.c.h.bf16 %v3062_v57 }
 0x3a8   :  { %3330 = vpow2.f32 %v3063_v44  ;;  %v1066_v44 = vunpack.c.l.bf16 %v3060_v41  ;;  %v1070_v41 = vunpack.c.l.bf16 %v3062_v57 }
 0x3a9   :  { %3332 = vpow2.f32 %v3065_v33 }
 0x3aa   :  { %v1129_v24 = vpop.f32.mrf.mxu3 }
 0x3ab   :  { %v1137_v63 = vadd.f32 %v1129_v24, %v1067_v14  ;;  %v1089_v46 = vpop.f32.mrf.mxu0  ;;  %v1103_v45 = vpop.f32.mrf.mxu1 }
 0x3ac   :  { %v1138_v42 = vadd.f32 %v1089_v46, %v1068_v58  ;;  %v1139_v26 = vadd.f32 %v1103_v45, %v1069_v27  ;;  %v1115_v14 = vpop.f32.mrf.mxu2 }
 0x3ad   :  { %v3067_v54 = vmul.f32 -1.442695, %v1137_v63  ;;  %v1136_v27 = vadd.f32 %v1115_v14, %v1066_v44 }
 0x3ae   :  { %v3331_v62 = vpop.eup %3330  ;;  %v3064_v36 = vmul.f32 -1.442695, %v1138_v42  ;;  %v3066_v22 = vmul.f32 -1.442695, %v1139_v26 }
 0x3af   :  { %v3333_v40 = vpop.eup %3332  ;;  %v1148_v20 = vadd.f32 1.0, %v3331_v62  ;;  %3334 = vpow2.f32 %v3067_v54 }
 0x3b0   :  { %v1186_v29 = vadd.f32 1.0, %v3333_v40  ;;  %3336 = vpow2.f32 %v3064_v36 }
 0x3b1   :  { %3338 = vrcp.f32 %v1148_v20  ;;  %vm1155_vm4 = vweird.f32 %v1148_v20 }
 0x3b2   :  { %3340 = vrcp.f32 %v1186_v29  ;;  %v1131_v46 = vpop.f32.mrf.mxu3  ;;  %v1197_v13 = vand.u32 2147483647, %v1186_v29  ;;  %vm1193_vm5 = vweird.f32 %v1186_v29 }
 0x3b3   :  { %3342 = vpow2.f32 %v3066_v22  ;;  %v1141_v62 = vadd.f32 %v1131_v46, %v1071_v38  ;;  %v1159_v38 = vand.u32 2147483647, %v1148_v20  ;;  %v1161_v46 = vand.u32 2147483648, %v1148_v20 }
 0x3b4   :  { %vm1198_vm15 = vcmp.eq.f32.partialorder %v1197_v13, 8.507059e+37 }
 0x3b5   :  { %v3335_v63 = vpop.eup %3334  ;;  %v3068_v44 = vmul.f32 -1.442695, %v1141_v62  ;;  %v1162_v62 = vor.u32 1.1754944e-38, %v1161_v46  ;;  %vm1160_vm14 = vcmp.eq.f32.partialorder %v1159_v38, 8.507059e+37 }
 0x3b6   :  { %v3337_v58 = vpop.eup %3336  ;;  %v4704_v33 = vadd.f32 1.0, %v3335_v63  ;;  %v1199_v63 = vand.u32 2147483648, %v1186_v29 }
 0x3b7   :  { %v3339_v24 = vpop.eup %3338  ;;  %v4706_v45 = vadd.f32 1.0, %v3337_v58  ;;  %v1117_v58 = vpop.f32.mrf.mxu2 }
 0x3b8   :  { %v3341_v42 = vpop.eup %3340  ;;  %v1151_v26 = vmul.f32 %v3339_v24, %v1148_v20  ;;  %3344 = vrcp.f32 %v4704_v33  ;;  %vm1156_vm2 = vweird.f32 %v3339_v24  ;;  %v1200_v56 = vor.u32 1.1754944e-38, %v1199_v63 }
 0x3b9   :  { %v3343_v40 = vpop.eup %3342  ;;  %v1189_v36 = vmul.f32 %v3341_v42, %v1186_v29  ;;  %3346 = vtanh.f32 %v1136_v27  ;;  %vm1194_vm3 = vweird.f32 %v3341_v42  ;;  %vm1157_vm6 = vmor %vm1155_vm4, %vm1156_vm2  ;;  %v1239_v46 = vand.u32 2147483648, %v4704_v33 }
 0x3ba   :  { %v1152_v54 = vsub.f32 1.0, %v1151_v26  ;;  %3348 = vrcp.f32 %v4706_v45  ;;  %v4710_v22 = vadd.f32 1.0, %v3343_v40  ;;  %v1140_v26 = vadd.f32 %v1117_v58, %v1070_v41  ;;  %vm1195_vm13 = vmor %vm1193_vm5, %vm1194_vm3 }
 0x3bb   :  { %v1190_v14 = vsub.f32 1.0, %v1189_v36  ;;  %vm1170_vm0 = vweird.f32 %v4706_v45  ;;  %v1174_v13 = vand.u32 2147483647, %v4706_v45  ;;  %vm1233_vm4 = vweird.f32 %v4704_v33 }
 0x3bc   :  { %v1153_v31 = vmul.f32 %v3339_v24, %v1152_v54  ;;  %3350 = vrcp.f32 %v4710_v22 }
 0x3bd   :  { %v1191_v52 = vmul.f32 %v3341_v42, %v1190_v14  ;;  %3352 = vpow2.f32 %v3068_v44 }
 0x3be   :  { %v4713_v27 = vpop.eup %3344  ;;  %v1154_v57 = vadd.f32 %v3339_v24, %v1153_v31  ;;  %3354 = vtanh.f32 %v1140_v26 }
 0x3bf   :  { %v3347_v40 = vpop.eup %3346  ;;  %v1192_v36 = vadd.f32 %v3341_v42, %v1191_v52  ;;  %v1229_v54 = vmul.f32 %v4713_v27, %v4704_v33  ;;  %vm1234_vm2 = vweird.f32 %v4713_v27 }
 0x3c0   :  { %v3349_v61 = vpop.eup %3348  ;;  %v1158_v23 = vsel %vm1157_vm6, %v3339_v24, %v1154_v57  ;;  %v1212_v57 = vand.u32 2147483647, %v4710_v22  ;;  %vm4739_vm6 = vmor %vm1233_vm4, %vm1234_vm2 }
 0x3c1   :  { %v1163_v14 = vsel %vm1160_vm14, %v1162_v62, %v1158_v23  ;;  %v1196_v32 = vsel %vm1195_vm13, %v3341_v42, %v1192_v36  ;;  %v1230_v31 = vsub.f32 1.0, %v1229_v54  ;;  %v1166_v20 = vmul.f32 %v3349_v61, %v4706_v45 }
 0x3c2   :  { %v3351_v41 = vpop.eup %3350  ;;  %v1201_v44 = vsel %vm1198_vm15, %v1200_v56, %v1196_v32  ;;  %v1260_v29 = vmul.f32 %v3347_v40, %v1163_v14  ;;  %v1214_v23 = vand.u32 2147483648, %v4710_v22  ;;  %v1176_v32 = vand.u32 2147483648, %v4706_v45 }
 0x3c3   :  { %v1258_v52 = vmul.f32 %v1201_v44, %v4514_v53  ;;  %v1231_v58 = vmul.f32 %v4713_v27, %v1230_v31  ;;  %v1167_v28 = vsub.f32 1.0, %v1166_v20  ;;  %v1204_v24 = vmul.f32 %v3351_v41, %v4710_v22  ;;  %v3353_v63 = vpop.eup %3352 }
 0x3c4   :  { %vm1171_vm1 = vweird.f32 %v3349_v61  ;;  %v4731_v26 = vadd.f32 1.0, %v3353_v63  ;;  %vm1209_vm3 = vweird.f32 %v3351_v41  ;;  %v3355_v36 = vpop.eup %3354  ;;  %v1237_v54 = vand.u32 2147483647, %v4704_v33 }
 0x3c5   :  { %v4726_v56 = vadd.f32 %v1260_v29, %v1258_v52  ;;  %v1205_v42 = vsub.f32 1.0, %v1204_v24  ;;  %v1168_v38 = vmul.f32 %v3349_v61, %v1167_v28  ;;  %v1232_v53 = vadd.f32 %v4713_v27, %v1231_v58  ;;  %vm1172_vm5 = vmor %vm1170_vm0, %vm1171_vm1 }
 0x3c6   :  { %v1177_v28 = vor.u32 1.1754944e-38, %v1176_v32  ;;  %vm1208_vm13 = vweird.f32 %v4710_v22  ;;  %vm1175_vm14 = vcmp.eq.f32.partialorder %v1174_v13, 8.507059e+37  ;;  %v1215_v33 = vor.u32 1.1754944e-38, %v1214_v23 }
 0x3c7   :  { %3356 = vtanh.f32 %v4726_v56  ;;  %v1206_v40 = vmul.f32 %v3351_v41, %v1205_v42  ;;  %v1169_v62 = vadd.f32 %v3349_v61, %v1168_v38  ;;  %v1236_v44 = vsel %vm4739_vm6, %v4713_v27, %v1232_v53  ;;  %vm1210_vm15 = vmor %vm1208_vm13, %vm1209_vm3 }
 0x3c8   :  { %3358 = vrcp.f32 %v4731_v26  ;;  %v1240_v29 = vor.u32 1.1754944e-38, %v1239_v46  ;;  %vm1213_vm0 = vcmp.eq.f32.partialorder %v1212_v57, 8.507059e+37  ;;  %vm1238_vm1 = vcmp.eq.f32.partialorder %v1237_v54, 8.507059e+37 }
 0x3c9   :  { %v1173_v31 = vsel %vm1172_vm5, %v3349_v61, %v1169_v62  ;;  %v1207_v20 = vadd.f32 %v3351_v41, %v1206_v40  ;;  %v1252_v23 = vand.u32 2147483647, %v4731_v26  ;;  %v1254_v53 = vand.u32 2147483648, %v4731_v26 }
 0x3ca   :  { %v1178_v45 = vsel %vm1175_vm14, %v1177_v28, %v1173_v31  ;;  %v1241_v32 = vsel %vm1238_vm1, %v1240_v29, %v1236_v44  ;;  %vm1248_vm2 = vweird.f32 %v4731_v26 }
 0x3cb   :  { %v1211_v52 = vsel %vm1210_vm15, %v3351_v41, %v1207_v20  ;;  %v1261_v58 = vmul.f32 %v3355_v36, %v1178_v45  ;;  %vm4766_vm3 = vcmp.eq.f32.partialorder %v1252_v23, 8.507059e+37  ;;  %v1255_v45 = vor.u32 1.1754944e-38, %v1254_v53 }
 0x3cc   :  { %v1216_v24 = vsel %vm1213_vm0, %v1215_v33, %v1211_v52  ;;  %v5633_v53 = vsel %vm4560_vm12, %v4350_v2, %v4564_v51  ;;  %v5635_v51 = vsel %vm4560_vm12, %v4373_v55, %v4568_v50 }
 0x3cd   :  { %v3357_v63 = vpop.eup %3356  ;;  %v1259_v22 = vmul.f32 %v1216_v24, %v4544_v30 }
 0x3ce   :  { %v3359_v61 = vpop.eup %3358  ;;  %v1266_v13 = vmul.f32 %v3357_v63, %v1241_v32 }
 0x3cf   :  { %v4748_v42 = vadd.f32 %v1261_v58, %v1259_v22  ;;  %v1244_v38 = vmul.f32 %v3359_v61, %v4731_v26  ;;  %vm1249_vm4 = vweird.f32 %v3359_v61  ;;  %v5636_v26 = vsel %vm4560_vm12, %v4381_v9, %v4570_v5 }
 0x3d0   :  { %v4751_v27 = vpack.c.bf16 %v1266_v13, %v1266_v13  ;;  %vm1250_vm5 = vmor %vm1248_vm2, %vm1249_vm4 }
 0x3d1   :  { %5630 = vst [vmem:[#allocation30_spill] sm:$0xff] %v4748_v42  ;;  %v1245_v46 = vsub.f32 1.0, %v1244_v38  ;;  %3360 = vtanh.f32 %v4748_v42 }
 0x3d2   :  { %v2083_v41 = vrot.slane %v4751_v27, 3 }
 0x3d3   :  { %v1246_v57 = vmul.f32 %v3359_v61, %v1245_v46 }
 0x3d4   :  { %v2087_v30 = vsel %vm1905_vm11, %v4751_v27, %v2083_v41  ;;  %v2089_v40 = vsel %vm1910_vm8, %v4751_v27, %v2083_v41  ;;  %v2092_v62 = vsel %vm1914_vm9, %v4751_v27, %v2083_v41  ;;  %v2095_v36 = vsel %vm1918_vm10, %v4751_v27, %v2083_v41 }
 0x3d5   :  { %v2091_v28 = vrot.slane %v2089_v40, 1  ;;  %v2094_v14 = vrot.slane %v2092_v62, 2  ;;  %v2097_v31 = vrot.slane %v2095_v36, 3  ;;  %v2112_v20 = vunpack.i.h.s16 %v2087_v30 }
 0x3d6   :  { %v3131_v44 = vpack.i.b16 %v2087_v30, %v2087_v30  ;;  %v1247_v33 = vadd.f32 %v3359_v61, %v1246_v57 }
 0x3d7   :  { %v2114_v29 = vunpack.i.h.s16 %v2091_v28  ;;  %v2116_v52 = vunpack.i.h.s16 %v2094_v14  ;;  %v2118_v58 = vunpack.i.h.s16 %v2097_v31  ;;  %v2438_v24 = vpack.i.b16 %v2112_v20, %v2112_v20  ;;  %v3361_v38 = vpop.eup %3360 }
 0x3d8   :  { %v3132_v63 = vpack.i.b16 %v2091_v28, %v2091_v28  ;;  %v3133_v32 = vpack.i.b16 %v2094_v14, %v2094_v14  ;;  %v3134_v22 = vpack.i.b16 %v2097_v31, %v2097_v31  ;;  %v2453_v13 = vperm.slane %v3131_v44, 0 }
 0x3d9   :  { %v2440_v23 = vpack.i.b16 %v2114_v29, %v2114_v29  ;;  %v2442_v46 = vpack.i.b16 %v2116_v52, %v2116_v52  ;;  %v2444_v41 = vpack.i.b16 %v2118_v58, %v2118_v58  ;;  %v2454_v40 = vperm.slane %v2438_v24, 0 }
 0x3da   :  { %v2455_v62 = vperm.slane %v3132_v63, 0  ;;  %v2457_v36 = vperm.slane %v3133_v32, 0  ;;  %v2459_v42 = vperm.slane %v3134_v22, 0  ;;  %v4776_v57 = vsel %vm2680_vm7, %v5633_v53, %v2453_v13 }
 0x3db   :  { %v2456_v30 = vperm.slane %v2440_v23, 0  ;;  %v2458_v28 = vperm.slane %v2442_v46, 0  ;;  %v2460_v14 = vperm.slane %v2444_v41, 0  ;;  %v4780_v31 = vsel %vm2680_vm7, %v4579_v6, %v2454_v40 }
 0x3dc   :  { %v5634_v20 = vsel %vm4560_vm12, %v4365_v60, %v4566_v43  ;;  %v4799_v6 = vsel %vm2680_vm7, %v5635_v51, %v2457_v36  ;;  %v4807_v44 = vsel %vm2680_vm7, %v5636_v26, %v2459_v42  ;;  %v1251_v60 = vsel %vm1250_vm5, %v3359_v61, %v1247_v33 }
 0x3dd   :  { %v4791_v2 = vsel %vm2680_vm7, %v5634_v20, %v2455_v62  ;;  %v4811_v43 = vsel %vm2680_vm7, %v4596_v19, %v2456_v30  ;;  %v4815_v29 = vsel %vm2680_vm7, %v4601_v35, %v2458_v28  ;;  %v4819_v55 = vsel %vm2680_vm7, %v4606_v0, %v2460_v14 }
 0x3de   :  { %v1256_v50 = vsel %vm4766_vm3, %v1255_v45, %v1251_v60  ;;  %v1285_v61 = vunpack.c.l.b16 %v4751_v27  ;;  %v5637_v51 = vsel %vm4560_vm12, %v4408_v37, %v4616_v15  ;;  %v5638_v37 = vsel %vm4560_vm12, %v4424_v47, %v4618_v59 }
 0x3df   :  { %v1267_v9 = vmul.f32 %v3361_v38, %v1256_v50 }
 0x3e1   :  { %v1269_v5 = vpack.c.bf16 %v1267_v9, %v1267_v9 }
 0x3e3   :  { %v2084_v42 = vrot.slane %v1269_v5, 3  ;;  %v1286_v52 = vunpack.c.l.b16 %v1269_v5 }
 0x3e5   :  { %v2100_v19 = vsel %vm1905_vm11, %v1269_v5, %v2084_v42  ;;  %v2102_v33 = vsel %vm1910_vm8, %v1269_v5, %v2084_v42  ;;  %v2105_v35 = vsel %vm1914_vm9, %v1269_v5, %v2084_v42  ;;  %v2108_v58 = vsel %vm1918_vm10, %v1269_v5, %v2084_v42  ;;  %v5653_v42 = vld [vmem:[#allocation15_spill] sm:$0xff] }
 0x3e6   :  { %v2104_v24 = vrot.slane %v2102_v33, 1  ;;  %v2107_v0 = vrot.slane %v2105_v35, 2  ;;  %v2110_v63 = vrot.slane %v2108_v58, 3  ;;  %v2120_v32 = vunpack.i.h.s16 %v2100_v19  ;;  %v5657_v33 = vld [vmem:[#allocation19_spill] sm:$0xff]  ;;  %v5658_v35 = vld [vmem:[#allocation21_spill] sm:$0xff]  ;;  %v5659_v58 = vld [vmem:[#allocation24_spill] sm:$0xff] }
 0x3e7   :  { %v3135_v54 = vpack.i.b16 %v2100_v19, %v2100_v19  ;;  %v1287_v45 = vpack.c.b16 %v1286_v52, %v1285_v61  ;;  %v5654_v52 = vld [vmem:[#allocation17_spill] sm:$0xff]  ;;  %v5655_v61 = vld [vmem:[#allocation20_spill] sm:$0xff]  ;;  %v5656_v19 = vld [vmem:[#allocation18_spill] sm:$0xff] }
 0x3e8   :  { %v2122_v22 = vunpack.i.h.s16 %v2104_v24  ;;  %v2124_v13 = vunpack.i.h.s16 %v2107_v0  ;;  %v2126_v38 = vunpack.i.h.s16 %v2110_v63  ;;  %v2446_v23 = vpack.i.b16 %v2120_v32, %v2120_v32  ;;  %v5663_v32 = vld [vmem:[#allocation27_spill] sm:$0xff] }
 0x3e9   :  { %v3136_v46 = vpack.i.b16 %v2104_v24, %v2104_v24  ;;  %v3137_v27 = vpack.i.b16 %v2107_v0, %v2107_v0  ;;  %v3138_v41 = vpack.i.b16 %v2110_v63, %v2110_v63  ;;  %v2461_v40 = vperm.slane %v3135_v54, 0  ;;  %1297 = vmatmul.bf16.vlgmr.msrb.gmra.mxu0 %v1287_v45  ;;  %1311 = vmatmul.bf16.vlgmr.msrb.gmra.mxu1 %v1287_v45  ;;  %v5660_v24 = vld [vmem:[#allocation22_spill] sm:$0xff]  ;;  %v5661_v0 = vld [vmem:[#allocation23_spill] sm:$0xff]  ;;  %v5662_v63 = vld [vmem:[#allocation25_spill] sm:$0xff] }
 0x3ea   :  { %v2448_v62 = vpack.i.b16 %v2122_v22, %v2122_v22  ;;  %v2450_v36 = vpack.i.b16 %v2124_v13, %v2124_v13  ;;  %v2452_v53 = vpack.i.b16 %v2126_v38, %v2126_v38  ;;  %v2462_v30 = vperm.slane %v2446_v23, 0  ;;  %1325 = vmatmul.bf16.vlgmr.msrb.gmra.mxu2 %v1287_v45  ;;  %1339 = vmatmul.bf16.vlgmr.msrb.gmra.mxu3 %v1287_v45  ;;  %v5664_v54 = vld [vmem:[#allocation26_spill] sm:$0xff]  ;;  %v3069_v45 = vld [vmem:[%s5454_s0 + $0xa0] sm:$0xff] }
 0x3eb   :  { %v2463_v28 = vperm.slane %v3136_v46, 0  ;;  %v2465_v14 = vperm.slane %v3137_v27, 0  ;;  %v2467_v20 = vperm.slane %v3138_v41, 0  ;;  %v4834_v26 = vsel %vm2680_vm7, %v5637_v51, %v2461_v40  ;;  %1711 = vmatpush.bf16.msrb.mxu0 %v3483_v3  ;;  %1725 = vmatpush.bf16.msrb.mxu1 %v3494_v7  ;;  %v3070_v41 = vld [vmem:[%s5454_s0 + $0xa8] sm:$0xff]  ;;  %v3071_v40 = vld [vmem:[%s5454_s0 + $0xb0] sm:$0xff] }
 0x3ec   :  { %v2464_v60 = vperm.slane %v2448_v62, 0  ;;  %v2466_v50 = vperm.slane %v2450_v36, 0  ;;  %v2468_v9 = vperm.slane %v2452_v53, 0  ;;  %v4840_v5 = vsel %vm2680_vm7, %v4633_v49, %v2462_v30  ;;  %1739 = vmatpush.bf16.msrb.mxu2 %v3534_v21  ;;  %1753 = vmatpush.bf16.msrb.mxu3 %v3496_v8  ;;  %v5645_v49 = vld [vmem:[#allocation7_spill] sm:$0xff] }
 0x3ed   :  { %v4850_v3 = vsel %vm2680_vm7, %v5638_v37, %v2463_v28  ;;  %v5639_v7 = vsel %vm4560_vm12, %v4432_v25, %v4620_v39  ;;  %v5640_v8 = vsel %vm4560_vm12, %v4440_v1, %v4622_v48  ;;  %v5641_v1 = vld [vmem:[#allocation4_spill] sm:$0xff]  ;;  %v5644_v48 = vld [vmem:[#allocation6_spill] sm:$0xff]  ;;  %v1275_v22 = vunpack.c.l.bf16 %v3069_v45 }
 0x3ee   :  { %v4858_v15 = vsel %vm2680_vm7, %v5639_v7, %v2465_v14  ;;  %v4866_v21 = vsel %vm2680_vm7, %v5640_v8, %v2467_v20  ;;  %v4870_v47 = vsel %vm2680_vm7, %v4652_v10, %v2464_v60  ;;  %v4874_v59 = vsel %vm2680_vm7, %v4657_v11, %v2466_v50  ;;  %v5643_v39 = vld [vmem:[#allocation8_spill] sm:$0xff]  ;;  %v5646_v10 = vld [vmem:[#allocation9_spill] sm:$0xff] }
 0x3ef   :  { %v4878_v25 = vsel %vm2680_vm7, %v4662_v4, %v2468_v9  ;;  %1712 = vmatpush.bf16.msrb.mxu0 %v3508_v12  ;;  %1726 = vmatpush.bf16.msrb.mxu1 %v3521_v16  ;;  %v5647_v11 = vld [vmem:[#allocation12_spill] sm:$0xff]  ;;  %v5648_v12 = vld [vmem:[#allocation10_spill] sm:$0xff]  ;;  %v5649_v16 = vld [vmem:[#allocation11_spill] sm:$0xff]  ;;  %v1276_v13 = vunpack.c.h.bf16 %v3069_v45  ;;  %v1278_v53 = vunpack.c.h.bf16 %v3070_v41  ;;  %v1279_v30 = vunpack.c.l.bf16 %v3071_v40 }
 0x3f0   :  { %1740 = vmatpush.bf16.msrb.mxu2 %v3573_v34  ;;  %1754 = vmatpush.bf16.msrb.mxu3 %v3523_v17  ;;  %v5650_v34 = vld [vmem:[#allocation13_spill] sm:$0xff]  ;;  %v5651_v17 = vld [vmem:[#allocation16_spill] sm:$0xff]  ;;  %v5652_v4 = vld [vmem:[#allocation14_spill] sm:$0xff]  ;;  %v1280_v28 = vunpack.c.h.bf16 %v3071_v40 }
 0x3f3   :  { %1713 = vmatpush.bf16.msrb.mxu0 %v5641_v1  ;;  %1727 = vmatpush.bf16.msrb.mxu1 %v5642_v18 }
 0x3f4   :  { %1741 = vmatpush.bf16.msrb.mxu2 %v5643_v39  ;;  %1755 = vmatpush.bf16.msrb.mxu3 %v5644_v48 }
 0x3f7   :  { %1714 = vmatpush.bf16.msrb.mxu0 %v5645_v49  ;;  %1728 = vmatpush.bf16.msrb.mxu1 %v5646_v10  ;;  %v1277_v49 = vunpack.c.l.bf16 %v3070_v41  ;;  %v3072_v10 = vld [vmem:[%s5454_s0 + $0xb8] sm:$0xff] }
 0x3f8   :  { %1742 = vmatpush.bf16.msrb.mxu2 %v5647_v11  ;;  %1756 = vmatpush.bf16.msrb.mxu3 %v5648_v12  ;;  %v1282_v12 = vunpack.c.h.bf16 %v3072_v10 }
 0x3fb   :  { %1715 = vmatpush.bf16.msrb.mxu0 %v5649_v16  ;;  %1729 = vmatpush.bf16.msrb.mxu1 %v5650_v34 }
 0x3fc   :  { %1743 = vmatpush.bf16.msrb.mxu2 %v5651_v17  ;;  %1757 = vmatpush.bf16.msrb.mxu3 %v5652_v4 }
 0x3ff   :  { %1716 = vmatpush.bf16.msrb.mxu0 %v5653_v42  ;;  %1730 = vmatpush.bf16.msrb.mxu1 %v5654_v52 }
 0x400   :  { %1744 = vmatpush.bf16.msrb.mxu2 %v5655_v61  ;;  %1758 = vmatpush.bf16.msrb.mxu3 %v5656_v19 }
 0x403   :  { %1717 = vmatpush.bf16.msrb.mxu0 %v5657_v33  ;;  %1731 = vmatpush.bf16.msrb.mxu1 %v5658_v35 }
 0x404   :  { %1745 = vmatpush.bf16.msrb.mxu2 %v5659_v58  ;;  %1759 = vmatpush.bf16.msrb.mxu3 %v5660_v24 }
 0x407   :  { %1718 = vmatpush.bf16.msrb.mxu0 %v5661_v0  ;;  %1732 = vmatpush.bf16.msrb.mxu1 %v5662_v63 }
 0x408   :  { %1746 = vmatpush.bf16.msrb.mxu2 %v5663_v32  ;;  %1760 = vmatpush.bf16.msrb.mxu3 %v5664_v54  ;;  %v1281_v32 = vunpack.c.l.bf16 %v3072_v10 }
 0x466   :  { %v1298_v38 = vpop.f32.mrf.mxu0  ;;  %v1312_v23 = vpop.f32.mrf.mxu1 }
 0x467   :  { %v1345_v46 = vadd.f32 %v1298_v38, %v1275_v22  ;;  %v1346_v27 = vadd.f32 %v1312_v23, %v1276_v13 }
 0x469   :  { %v3073_v62 = vmul.f32 -1.442695, %v1345_v46  ;;  %v3075_v36 = vmul.f32 -1.442695, %v1346_v27 }
 0x46b   :  { %3362 = vpow2.f32 %v3073_v62 }
 0x46c   :  { %3364 = vpow2.f32 %v3075_v36 }
 0x46d   :  { %v1340_v14 = vpop.f32.mrf.mxu3  ;;  %v1326_v11 = vpop.f32.mrf.mxu2 }
 0x46e   :  { %v1348_v20 = vadd.f32 %v1340_v14, %v1278_v53  ;;  %v1300_v51 = vpop.f32.mrf.mxu0  ;;  %v1314_v60 = vpop.f32.mrf.mxu1  ;;  %v1347_v34 = vadd.f32 %v1326_v11, %v1277_v49 }
 0x46f   :  { %v1349_v50 = vadd.f32 %v1300_v51, %v1279_v30  ;;  %v1350_v9 = vadd.f32 %v1314_v60, %v1280_v28 }
 0x470   :  { %v3077_v37 = vmul.f32 -1.442695, %v1348_v20 }
 0x471   :  { %v3363_v7 = vpop.eup %3362  ;;  %v3074_v8 = vmul.f32 -1.442695, %v1349_v50  ;;  %v3076_v39 = vmul.f32 -1.442695, %v1350_v9 }
 0x472   :  { %v3365_v1 = vpop.eup %3364  ;;  %v1359_v18 = vadd.f32 1.0, %v3363_v7  ;;  %3366 = vpow2.f32 %v3077_v37 }
 0x473   :  { %v1397_v48 = vadd.f32 1.0, %v3365_v1  ;;  %3368 = vpow2.f32 %v3074_v8 }
 0x474   :  { %3370 = vrcp.f32 %v1359_v18  ;;  %v1370_v63 = vand.u32 2147483647, %v1359_v18  ;;  %v1372_v22 = vand.u32 2147483648, %v1359_v18  ;;  %vm1366_vm13 = vweird.f32 %v1359_v18 }
 0x475   :  { %3372 = vrcp.f32 %v1397_v48  ;;  %v1342_v17 = vpop.f32.mrf.mxu3  ;;  %v1410_v45 = vand.u32 2147483648, %v1397_v48  ;;  %v1408_v23 = vand.u32 2147483647, %v1397_v48  ;;  %v1328_v46 = vpop.f32.mrf.mxu2  ;;  %vm1404_vm6 = vweird.f32 %v1397_v48 }
 0x476   :  { %3374 = vpow2.f32 %v3076_v39  ;;  %v1352_v35 = vadd.f32 %v1342_v17, %v1282_v12  ;;  %vm1371_vm14 = vcmp.eq.f32.partialorder %v1370_v63, 8.507059e+37  ;;  %v1373_v53 = vor.u32 1.1754944e-38, %v1372_v22 }
 0x477   :  { %v1351_v14 = vadd.f32 %v1328_v46, %v1281_v32  ;;  %v1411_v51 = vor.u32 1.1754944e-38, %v1410_v45  ;;  %vm1409_vm1 = vcmp.eq.f32.partialorder %v1408_v23, 8.507059e+37 }
 0x478   :  { %v3367_v16 = vpop.eup %3366  ;;  %v3078_v27 = vmul.f32 -1.442695, %v1352_v35 }
 0x479   :  { %v3369_v4 = vpop.eup %3368  ;;  %v4920_v42 = vadd.f32 1.0, %v3367_v16 }
 0x47a   :  { %v3371_v52 = vpop.eup %3370  ;;  %v4922_v61 = vadd.f32 1.0, %v3369_v4 }
 0x47b   :  { %v3373_v19 = vpop.eup %3372  ;;  %v1362_v33 = vmul.f32 %v3371_v52, %v1359_v18  ;;  %3376 = vrcp.f32 %v4920_v42  ;;  %vm1367_vm7 = vweird.f32 %v3371_v52  ;;  %vm1444_vm2 = vweird.f32 %v4920_v42 }
 0x47c   :  { %v3375_v58 = vpop.eup %3374  ;;  %v1400_v24 = vmul.f32 %v3373_v19, %v1397_v48  ;;  %3378 = vtanh.f32 %v1347_v34  ;;  %vm1405_vm12 = vweird.f32 %v3373_v19  ;;  %vm1368_vm15 = vmor %vm1366_vm13, %vm1367_vm7  ;;  %v1450_v10 = vand.u32 2147483648, %v4920_v42 }
 0x47d   :  { %v1363_v0 = vsub.f32 1.0, %v1362_v33  ;;  %3380 = vrcp.f32 %v4922_v61  ;;  %v4926_v13 = vadd.f32 1.0, %v3375_v58  ;;  %vm1406_vm0 = vmor %vm1404_vm6, %vm1405_vm12  ;;  %vm1381_vm3 = vweird.f32 %v4922_v61 }
 0x47e   :  { %v1401_v54 = vsub.f32 1.0, %v1400_v24  ;;  %v1387_v34 = vand.u32 2147483648, %v4922_v61  ;;  %v1448_v58 = vand.u32 2147483647, %v4920_v42 }
 0x47f   :  { %v1364_v38 = vmul.f32 %v3371_v52, %v1363_v0  ;;  %3382 = vrcp.f32 %v4926_v13  ;;  %v1423_v0 = vand.u32 2147483647, %v4926_v13  ;;  %vm1419_vm13 = vweird.f32 %v4926_v13 }
 0x480   :  { %v1402_v41 = vmul.f32 %v3373_v19, %v1401_v54  ;;  %3384 = vpow2.f32 %v3078_v27  ;;  %v1388_v45 = vor.u32 1.1754944e-38, %v1387_v34 }
 0x481   :  { %v4929_v40 = vpop.eup %3376  ;;  %v1365_v62 = vadd.f32 %v3371_v52, %v1364_v38  ;;  %3386 = vtanh.f32 %v1351_v14  ;;  %v1451_v38 = vor.u32 1.1754944e-38, %v1450_v10 }
 0x482   :  { %v3379_v36 = vpop.eup %3378  ;;  %v1403_v30 = vadd.f32 %v3373_v19, %v1402_v41  ;;  %v1440_v28 = vmul.f32 %v4929_v40, %v4920_v42  ;;  %vm1445_vm5 = vweird.f32 %v4929_v40 }
 0x483   :  { %v3381_v20 = vpop.eup %3380  ;;  %v1369_v60 = vsel %vm1368_vm15, %v3371_v52, %v1365_v62  ;;  %v1385_v52 = vand.u32 2147483647, %v4922_v61  ;;  %vm4956_vm6 = vmor %vm1444_vm2, %vm1445_vm5  ;;  %vm2764_vm2 = vcmask 1042432  }
 0x484   :  { %v1374_v50 = vsel %vm1371_vm14, %v1373_v53, %v1369_v60  ;;  %v1407_v9 = vsel %vm1406_vm0, %v3373_v19, %v1403_v30  ;;  %v1441_v37 = vsub.f32 1.0, %v1440_v28  ;;  %v1377_v7 = vmul.f32 %v3381_v20, %v4922_v61  ;;  %v5667_v53 = vld [vmem:[#allocation30_spill] sm:$0xff] }
 0x485   :  { %v1412_v8 = vsel %vm1409_vm1, %v1411_v51, %v1407_v9  ;;  %v1471_v1 = vmul.f32 %v3379_v36, %v1374_v50  ;;  %v3383_v18 = vpop.eup %3382  ;;  %vm1382_vm4 = vweird.f32 %v3381_v20  ;;  %v1425_v19 = vand.u32 2147483648, %v4926_v13 }
 0x486   :  { %v1469_v39 = vmul.f32 %v1412_v8, %v4726_v56  ;;  %v1442_v48 = vmul.f32 %v4929_v40, %v1441_v37  ;;  %v1378_v49 = vsub.f32 1.0, %v1377_v7  ;;  %v1415_v11 = vmul.f32 %v3383_v18, %v4926_v13  ;;  %v3385_v17 = vpop.eup %3384  ;;  %vm1383_vm12 = vmor %vm1381_vm3, %vm1382_vm4 }
 0x487   :  { %v4948_v35 = vadd.f32 1.0, %v3385_v17  ;;  %vm1420_vm7 = vweird.f32 %v3383_v18  ;;  %v3387_v63 = vpop.eup %3386  ;;  %vm1386_vm14 = vcmp.eq.f32.partialorder %v1385_v52, 8.507059e+37  ;;  %v1426_v23 = vor.u32 1.1754944e-38, %v1425_v19 }
 0x488   :  { %v4940_v12 = vadd.f32 %v1471_v1, %v1469_v39  ;;  %v1379_v16 = vmul.f32 %v3381_v20, %v1378_v49  ;;  %v1443_v56 = vadd.f32 %v4929_v40, %v1442_v48  ;;  %v1416_v4 = vsub.f32 1.0, %v1415_v11  ;;  %vm1421_vm15 = vmor %vm1419_vm13, %vm1420_vm7 }
 0x489   :  { %vm1449_vm0 = vcmp.eq.f32.partialorder %v1448_v58, 8.507059e+37  ;;  %vm1424_vm1 = vcmp.eq.f32.partialorder %v1423_v0, 8.507059e+37  ;;  %vm2765_vm3 = vsmask.f32 2304  ;;  %v1463_v50 = vand.u32 2147483647, %v4948_v35 }
 0x48a   :  { %3388 = vtanh.f32 %v4940_v12  ;;  %v1380_v33 = vadd.f32 %v3381_v20, %v1379_v16  ;;  %v1417_v24 = vmul.f32 %v3383_v18, %v1416_v4  ;;  %v1447_v22 = vsel %vm4956_vm6, %v4929_v40, %v1443_v56  ;;  %vm4986_vm7 = vmand %vm2764_vm2, %vm2765_vm3  ;;  %v3089_v4 = vld [vmem:[%s5454_s0 + $0xe0] sm:$0xff] }
 0x48b   :  { %3390 = vrcp.f32 %v4948_v35  ;;  %v1452_v41 = vsel %vm1449_vm0, %v1451_v38, %v1447_v22  ;;  %v1465_v9 = vand.u32 2147483648, %v4948_v35  ;;  %vm1459_vm4 = vweird.f32 %v4948_v35 }
 0x48c   :  { %v1384_v54 = vsel %vm1383_vm12, %v3381_v20, %v1380_v33  ;;  %v1418_v61 = vadd.f32 %v3383_v18, %v1417_v24  ;;  %vm1464_vm6 = vcmp.eq.f32.partialorder %v1463_v50, 8.507059e+37 }
 0x48d   :  { %v1389_v42 = vsel %vm1386_vm14, %v1388_v45, %v1384_v54 }
 0x48e   :  { %v1422_v46 = vsel %vm1421_vm15, %v3383_v18, %v1418_v61  ;;  %v1472_v28 = vmul.f32 %v3387_v63, %v1389_v42 }
 0x48f   :  { %v1427_v62 = vsel %vm1424_vm1, %v1426_v23, %v1422_v46 }
 0x490   :  { %v3389_v27 = vpop.eup %3388  ;;  %v1470_v30 = vmul.f32 %v1427_v62, %v5667_v53 }
 0x491   :  { %v1477_v36 = vmul.f32 %v3389_v27, %v1452_v41  ;;  %v3391_v14 = vpop.eup %3390 }
 0x492   :  { %v1455_v13 = vmul.f32 %v3391_v14, %v4948_v35  ;;  %v4970_v51 = vadd.f32 %v1472_v28, %v1470_v30  ;;  %vm1460_vm5 = vweird.f32 %v3391_v14 }
 0x493   :  { %v4966_v40 = vpack.c.bf16 %v1477_v36, %v1477_v36  ;;  %vm1461_vm12 = vmor %vm1459_vm4, %vm1460_vm5 }
 0x494   :  { %v1456_v60 = vsub.f32 1.0, %v1455_v13  ;;  %3392 = vtanh.f32 %v4970_v51  ;;  %v1466_v13 = vor.u32 1.1754944e-38, %v1465_v9 }
 0x495   :  { %v2127_v20 = vrot.slane %v4966_v40, 3 }
 0x496   :  { %v1457_v11 = vmul.f32 %v3391_v14, %v1456_v60 }
 0x497   :  { %v2131_v37 = vsel %vm1905_vm11, %v4966_v40, %v2127_v20  ;;  %v2133_v7 = vsel %vm1910_vm8, %v4966_v40, %v2127_v20  ;;  %v2136_v8 = vsel %vm1914_vm9, %v4966_v40, %v2127_v20  ;;  %v2139_v1 = vsel %vm1918_vm10, %v4966_v40, %v2127_v20 }
 0x498   :  { %v2135_v18 = vrot.slane %v2133_v7, 1  ;;  %v2138_v39 = vrot.slane %v2136_v8, 2  ;;  %v2141_v48 = vrot.slane %v2139_v1, 3  ;;  %v2156_v49 = vunpack.i.h.s16 %v2131_v37 }
 0x499   :  { %v3139_v10 = vpack.i.b16 %v2131_v37, %v2131_v37  ;;  %v1458_v53 = vadd.f32 %v3391_v14, %v1457_v11 }
 0x49a   :  { %v2158_v16 = vunpack.i.h.s16 %v2135_v18  ;;  %v2160_v34 = vunpack.i.h.s16 %v2138_v39  ;;  %v2162_v17 = vunpack.i.h.s16 %v2141_v48  ;;  %v2470_v56 = vpack.i.b16 %v2156_v49, %v2156_v49  ;;  %v3393_v27 = vpop.eup %3392 }
 0x49b   :  { %v3140_v52 = vpack.i.b16 %v2135_v18, %v2135_v18  ;;  %v3141_v19 = vpack.i.b16 %v2138_v39, %v2138_v39  ;;  %v3142_v33 = vpack.i.b16 %v2141_v48, %v2141_v48  ;;  %v4990_v58 = vperm.slane %v3139_v10, 0 }
 0x49c   :  { %v2472_v24 = vpack.i.b16 %v2158_v16, %v2158_v16  ;;  %v2474_v0 = vpack.i.b16 %v2160_v34, %v2160_v34  ;;  %v2476_v63 = vpack.i.b16 %v2162_v17, %v2162_v17  ;;  %v2486_v32 = vperm.slane %v2470_v56, 0 }
 0x49d   :  { %v4992_v54 = vperm.slane %v3140_v52, 0  ;;  %v4994_v45 = vperm.slane %v3141_v19, 0  ;;  %v4996_v22 = vperm.slane %v3142_v33, 0  ;;  %v2767_v61 = vsel %vm4986_vm7, %v4776_v57, %v4990_v58 }
 0x49e   :  { %v2488_v38 = vperm.slane %v2472_v24, 0  ;;  %v2490_v23 = vperm.slane %v2474_v0, 0  ;;  %v2492_v42 = vperm.slane %v2476_v63, 0  ;;  %v5005_v46 = vsel %vm4986_vm7, %v4780_v31, %v2486_v32 }
 0x49f   :  { %v2769_v41 = vsel %vm4986_vm7, %v4791_v2, %v4992_v54  ;;  %v2771_v62 = vsel %vm4986_vm7, %v4799_v6, %v4994_v45  ;;  %v2773_v36 = vsel %vm4986_vm7, %v4807_v44, %v4996_v22  ;;  %v1462_v20 = vsel %vm1461_vm12, %v3391_v14, %v1458_v53 }
 0x4a0   :  { %v5022_v31 = vsel %vm4986_vm7, %v4811_v43, %v2488_v38  ;;  %v5027_v30 = vsel %vm4986_vm7, %v4815_v29, %v2490_v23  ;;  %v5032_v28 = vsel %vm4986_vm7, %v4819_v55, %v2492_v42  ;;  %v1467_v60 = vsel %vm1464_vm6, %v1466_v13, %v1462_v20 }
 0x4a1   :  { %v1478_v43 = vmul.f32 %v3393_v27, %v1467_v60  ;;  %v1496_v29 = vunpack.c.l.b16 %v4966_v40 }
 0x4a3   :  { %v1480_v37 = vpack.c.bf16 %v1478_v43, %v1478_v43 }
 0x4a5   :  { %v2128_v7 = vrot.slane %v1480_v37, 3  ;;  %v1497_v8 = vunpack.c.l.b16 %v1480_v37 }
 0x4a7   :  { %v2144_v1 = vsel %vm1905_vm11, %v1480_v37, %v2128_v7  ;;  %v2146_v18 = vsel %vm1910_vm8, %v1480_v37, %v2128_v7  ;;  %v2149_v55 = vsel %vm1914_vm9, %v1480_v37, %v2128_v7  ;;  %v2152_v39 = vsel %vm1918_vm10, %v1480_v37, %v2128_v7 }
 0x4a8   :  { %v2148_v35 = vrot.slane %v2146_v18, 1  ;;  %v2151_v48 = vrot.slane %v2149_v55, 2  ;;  %v2154_v9 = vrot.slane %v2152_v39, 3  ;;  %v2164_v14 = vunpack.i.h.s16 %v2144_v1 }
 0x4a9   :  { %v3143_v50 = vpack.i.b16 %v2144_v1, %v2144_v1  ;;  %v1498_v49 = vpack.c.b16 %v1497_v8, %v1496_v29  ;;  %v3079_v8 = vld [vmem:[%s5454_s0 + $0xc0] sm:$0xff] }
 0x4aa   :  { %v2166_v10 = vunpack.i.h.s16 %v2148_v35  ;;  %v2168_v11 = vunpack.i.h.s16 %v2151_v48  ;;  %v2170_v16 = vunpack.i.h.s16 %v2154_v9  ;;  %v2478_v34 = vpack.i.b16 %v2164_v14, %v2164_v14 }
 0x4ab   :  { %v3144_v17 = vpack.i.b16 %v2148_v35, %v2148_v35  ;;  %v3145_v40 = vpack.i.b16 %v2151_v48, %v2151_v48  ;;  %v3146_v56 = vpack.i.b16 %v2154_v9, %v2154_v9  ;;  %v5042_v52 = vperm.slane %v3143_v50, 0  ;;  %1508 = vmatmul.bf16.vlgmr.msra.gmra.mxu0 %v1498_v49  ;;  %1522 = vmatmul.bf16.vlgmr.msra.gmra.mxu1 %v1498_v49  ;;  %v3081_v35 = vld [vmem:[%s5454_s0 + $0xd0] sm:$0xff] }
 0x4ac   :  { %v2480_v19 = vpack.i.b16 %v2166_v10, %v2166_v10  ;;  %v2482_v33 = vpack.i.b16 %v2168_v11, %v2168_v11  ;;  %v2484_v24 = vpack.i.b16 %v2170_v16, %v2170_v16  ;;  %v2494_v0 = vperm.slane %v2478_v34, 0  ;;  %1536 = vmatmul.bf16.vlgmr.msra.gmra.mxu2 %v1498_v49  ;;  %1550 = vmatmul.bf16.vlgmr.msra.gmra.mxu3 %v1498_v49 }
 0x4ad   :  { %v5044_v63 = vperm.slane %v3144_v17, 0  ;;  %v5046_v32 = vperm.slane %v3145_v40, 0  ;;  %v5048_v38 = vperm.slane %v3146_v56, 0  ;;  %v2775_v23 = vsel %vm4986_vm7, %v4834_v26, %v5042_v52 }
 0x4ae   :  { %v2496_v42 = vperm.slane %v2480_v19, 0  ;;  %v2498_v27 = vperm.slane %v2482_v33, 0  ;;  %v2500_v53 = vperm.slane %v2484_v24, 0  ;;  %v5057_v13 = vsel %vm4986_vm7, %v4840_v5, %v2494_v0 }
 0x4af   :  { %v2777_v20 = vsel %vm4986_vm7, %v4850_v3, %v5044_v63  ;;  %v2779_v60 = vsel %vm4986_vm7, %v4858_v15, %v5046_v32  ;;  %v1486_v29 = vunpack.c.l.bf16 %v3079_v8  ;;  %v1487_v1 = vunpack.c.h.bf16 %v3079_v8 }
 0x4b0   :  { %v5074_v5 = vsel %vm4986_vm7, %v4870_v47, %v2496_v42  ;;  %v5079_v37 = vsel %vm4986_vm7, %v4874_v59, %v2498_v27  ;;  %v5084_v7 = vsel %vm4986_vm7, %v4878_v25, %v2500_v53  ;;  %v3080_v59 = vld [vmem:[%s5454_s0 + $0xc8] sm:$0xff]  ;;  %v1490_v14 = vunpack.c.l.bf16 %v3081_v35  ;;  %v3082_v42 = vld [vmem:[%s5454_s0 + $0xd8] sm:$0xff] }
 0x4b1   :  { %v1489_v9 = vunpack.c.h.bf16 %v3080_v59  ;;  %v1491_v50 = vunpack.c.h.bf16 %v3081_v35  ;;  %v1488_v53 = vunpack.c.l.bf16 %v3080_v59  ;;  %v5674_v52 = vsel %vm4986_vm7, %v4866_v21, %v5048_v38 }
 0x4b2   :  { %v1697_v21 = vunpack.c.l.bf16 %v3089_v4  ;;  %v1698_v32 = vunpack.c.h.bf16 %v3089_v4 }
 0x528   :  { %v1509_v18 = vpop.f32.mrf.mxu0  ;;  %v1523_v55 = vpop.f32.mrf.mxu1 }
 0x529   :  { %v1556_v47 = vadd.f32 %v1509_v18, %v1486_v29  ;;  %v1557_v39 = vadd.f32 %v1523_v55, %v1487_v1  ;;  %v1493_v29 = vunpack.c.h.bf16 %v3082_v42 }
 0x52b   :  { %v3083_v25 = vmul.f32 -1.442695, %v1556_v47  ;;  %v3085_v48 = vmul.f32 -1.442695, %v1557_v39 }
 0x52d   :  { %3394 = vpow2.f32 %v3083_v25 }
 0x52e   :  { %3396 = vpow2.f32 %v3085_v48 }
 0x52f   :  { %v1551_v49 = vpop.f32.mrf.mxu3  ;;  %v1537_v8 = vpop.f32.mrf.mxu2 }
 0x530   :  { %v1559_v10 = vadd.f32 %v1551_v49, %v1489_v9  ;;  %v1511_v11 = vpop.f32.mrf.mxu0  ;;  %v1525_v16 = vpop.f32.mrf.mxu1  ;;  %v1558_v55 = vadd.f32 %v1537_v8, %v1488_v53  ;;  %v1492_v49 = vunpack.c.l.bf16 %v3082_v42 }
 0x531   :  { %v1560_v34 = vadd.f32 %v1511_v11, %v1490_v14  ;;  %v1561_v17 = vadd.f32 %v1525_v16, %v1491_v50 }
 0x532   :  { %v3087_v40 = vmul.f32 -1.442695, %v1559_v10 }
 0x533   :  { %v3395_v56 = vpop.eup %3394  ;;  %v3084_v19 = vmul.f32 -1.442695, %v1560_v34  ;;  %v3086_v0 = vmul.f32 -1.442695, %v1561_v17 }
 0x534   :  { %v3397_v33 = vpop.eup %3396  ;;  %v1570_v24 = vadd.f32 1.0, %v3395_v56  ;;  %3398 = vpow2.f32 %v3087_v40 }
 0x535   :  { %v1608_v27 = vadd.f32 1.0, %v3397_v33  ;;  %3400 = vpow2.f32 %v3084_v19 }
 0x536   :  { %3402 = vrcp.f32 %v1570_v24  ;;  %v1581_v40 = vand.u32 2147483647, %v1570_v24  ;;  %v1583_v56 = vand.u32 2147483648, %v1570_v24  ;;  %vm1577_vm15 = vweird.f32 %v1570_v24 }
 0x537   :  { %3404 = vrcp.f32 %v1608_v27  ;;  %v1553_v1 = vpop.f32.mrf.mxu3  ;;  %v1621_v17 = vand.u32 2147483648, %v1608_v27  ;;  %v1539_v19 = vpop.f32.mrf.mxu2  ;;  %vm1615_vm0 = vweird.f32 %v1608_v27 }
 0x538   :  { %3406 = vpow2.f32 %v3086_v0  ;;  %v1563_v35 = vadd.f32 %v1553_v1, %v1493_v29  ;;  %v1619_v0 = vand.u32 2147483647, %v1608_v27  ;;  %v1562_v29 = vadd.f32 %v1539_v19, %v1492_v49 }
 0x539   :  { %vm1582_vm4 = vcmp.eq.f32.partialorder %v1581_v40, 8.507059e+37 }
 0x53a   :  { %v3399_v18 = vpop.eup %3398  ;;  %v3088_v16 = vmul.f32 -1.442695, %v1563_v35  ;;  %vm1620_vm5 = vcmp.eq.f32.partialorder %v1619_v0, 8.507059e+37 }
 0x53b   :  { %v3401_v47 = vpop.eup %3400  ;;  %v5098_v39 = vadd.f32 1.0, %v3399_v18  ;;  %v1584_v18 = vor.u32 1.1754944e-38, %v1583_v56 }
 0x53c   :  { %v3403_v25 = vpop.eup %3402  ;;  %v5100_v48 = vadd.f32 1.0, %v3401_v47 }
 0x53d   :  { %v3405_v9 = vpop.eup %3404  ;;  %v1573_v14 = vmul.f32 %v3403_v25, %v1570_v24  ;;  %3408 = vrcp.f32 %v5098_v39  ;;  %vm1578_vm13 = vweird.f32 %v3403_v25  ;;  %v1661_v56 = vand.u32 2147483648, %v5098_v39 }
 0x53e   :  { %v3407_v50 = vpop.eup %3406  ;;  %v1611_v59 = vmul.f32 %v3405_v9, %v1608_v27  ;;  %3410 = vtanh.f32 %v1558_v55  ;;  %vm1616_vm14 = vweird.f32 %v3405_v9  ;;  %vm1579_vm1 = vmor %vm1577_vm15, %vm1578_vm13  ;;  %vm1592_vm12 = vweird.f32 %v5100_v48 }
 0x53f   :  { %v1574_v10 = vsub.f32 1.0, %v1573_v14  ;;  %3412 = vrcp.f32 %v5100_v48  ;;  %v5104_v11 = vadd.f32 1.0, %v3407_v50  ;;  %vm1617_vm3 = vmor %vm1615_vm0, %vm1616_vm14  ;;  %v1622_v14 = vor.u32 1.1754944e-38, %v1621_v17 }
 0x540   :  { %v1612_v34 = vsub.f32 1.0, %v1611_v59  ;;  %v1598_v0 = vand.u32 2147483648, %v5100_v48  ;;  %vm1655_vm15 = vweird.f32 %v5098_v39 }
 0x541   :  { %v1575_v33 = vmul.f32 %v3403_v25, %v1574_v10  ;;  %3414 = vrcp.f32 %v5104_v11  ;;  %v1636_v40 = vand.u32 2147483648, %v5104_v11 }
 0x542   :  { %v1613_v53 = vmul.f32 %v3405_v9, %v1612_v34  ;;  %3416 = vpow2.f32 %v3088_v16 }
 0x543   :  { %v5107_v8 = vpop.eup %3408  ;;  %v1576_v42 = vadd.f32 %v3403_v25, %v1575_v33  ;;  %3418 = vtanh.f32 %v1562_v29 }
 0x544   :  { %v3411_v1 = vpop.eup %3410  ;;  %v1614_v55 = vadd.f32 %v3405_v9, %v1613_v53  ;;  %v1651_v47 = vmul.f32 %v5107_v8, %v5098_v39  ;;  %vm1656_vm13 = vweird.f32 %v5107_v8 }
 0x545   :  { %v3413_v35 = vpop.eup %3412  ;;  %v1580_v50 = vsel %vm1579_vm1, %v3403_v25, %v1576_v42  ;;  %vm5133_vm1 = vmor %vm1655_vm15, %vm1656_vm13 }
 0x546   :  { %v1585_v59 = vsel %vm1582_vm4, %v1584_v18, %v1580_v50  ;;  %v1618_v10 = vsel %vm1617_vm3, %v3405_v9, %v1614_v55  ;;  %v1652_v34 = vsub.f32 1.0, %v1651_v47  ;;  %v1588_v24 = vmul.f32 %v3413_v35, %v5100_v48 }
 0x547   :  { %v3415_v49 = vpop.eup %3414  ;;  %v1623_v16 = vsel %vm1620_vm5, %v1622_v14, %v1618_v10  ;;  %v1682_v27 = vmul.f32 %v3411_v1, %v1585_v59  ;;  %v1596_v9 = vand.u32 2147483647, %v5100_v48  ;;  %vm1593_vm6 = vweird.f32 %v3413_v35 }
 0x548   :  { %v1680_v19 = vmul.f32 %v1623_v16, %v4940_v12  ;;  %v1653_v33 = vmul.f32 %v5107_v8, %v1652_v34  ;;  %v1589_v53 = vsub.f32 1.0, %v1588_v24  ;;  %v1626_v25 = vmul.f32 %v3415_v49, %v5104_v11  ;;  %v3417_v17 = vpop.eup %3416  ;;  %vm1594_vm0 = vmor %vm1592_vm12, %vm1593_vm6 }
 0x549   :  { %v1634_v18 = vand.u32 2147483647, %v5104_v11  ;;  %v5125_v55 = vadd.f32 1.0, %v3417_v17  ;;  %vm1631_vm14 = vweird.f32 %v3415_v49  ;;  %v3419_v50 = vpop.eup %3418  ;;  %v1659_v59 = vand.u32 2147483647, %v5098_v39 }
 0x54a   :  { %v5120_v42 = vadd.f32 %v1682_v27, %v1680_v19  ;;  %v1627_v1 = vsub.f32 1.0, %v1626_v25  ;;  %v1590_v29 = vmul.f32 %v3413_v35, %v1589_v53  ;;  %v1654_v12 = vadd.f32 %v5107_v8, %v1653_v33 }
 0x54b   :  { %v1599_v10 = vor.u32 1.1754944e-38, %v1598_v0  ;;  %vm1630_vm3 = vweird.f32 %v5104_v11  ;;  %vm1597_vm4 = vcmp.eq.f32.partialorder %v1596_v9, 8.507059e+37  ;;  %v1637_v39 = vor.u32 1.1754944e-38, %v1636_v40 }
 0x54c   :  { %3420 = vtanh.f32 %v5120_v42  ;;  %v1628_v47 = vmul.f32 %v3415_v49, %v1627_v1  ;;  %v1591_v14 = vadd.f32 %v3413_v35, %v1590_v29  ;;  %v1658_v27 = vsel %vm5133_vm1, %v5107_v8, %v1654_v12  ;;  %vm1632_vm5 = vmor %vm1630_vm3, %vm1631_vm14 }
 0x54d   :  { %3422 = vrcp.f32 %v5125_v55  ;;  %v1662_v19 = vor.u32 1.1754944e-38, %v1661_v56  ;;  %vm1635_vm12 = vcmp.eq.f32.partialorder %v1634_v18, 8.507059e+37  ;;  %vm1660_vm6 = vcmp.eq.f32.partialorder %v1659_v59, 8.507059e+37 }
 0x54e   :  { %v1595_v24 = vsel %vm1594_vm0, %v3413_v35, %v1591_v14  ;;  %v1629_v16 = vadd.f32 %v3415_v49, %v1628_v47  ;;  %v1674_v8 = vand.u32 2147483647, %v5125_v55  ;;  %v1676_v12 = vand.u32 2147483648, %v5125_v55 }
 0x54f   :  { %v1600_v48 = vsel %vm1597_vm4, %v1599_v10, %v1595_v24  ;;  %v1663_v0 = vsel %vm1660_vm6, %v1662_v19, %v1658_v27  ;;  %vm1670_vm13 = vweird.f32 %v5125_v55 }
 0x550   :  { %v1633_v33 = vsel %vm1632_vm5, %v3415_v49, %v1629_v16  ;;  %v1683_v53 = vmul.f32 %v3419_v50, %v1600_v48  ;;  %vm5152_vm14 = vcmp.eq.f32.partialorder %v1674_v8, 8.507059e+37  ;;  %v1677_v48 = vor.u32 1.1754944e-38, %v1676_v12 }
 0x551   :  { %v1638_v25 = vsel %vm1635_vm12, %v1637_v39, %v1633_v33 }
 0x552   :  { %v3421_v17 = vpop.eup %3420  ;;  %v1681_v11 = vmul.f32 %v1638_v25, %v4970_v51 }
 0x553   :  { %v3423_v35 = vpop.eup %3422  ;;  %v1688_v9 = vmul.f32 %v3421_v17, %v1663_v0 }
 0x554   :  { %v5142_v1 = vadd.f32 %v1683_v53, %v1681_v11  ;;  %v1666_v29 = vmul.f32 %v3423_v35, %v5125_v55  ;;  %vm1671_vm15 = vweird.f32 %v3423_v35 }
 0x555   :  { %v5146_v40 = vpack.c.bf16 %v1688_v9, %v1688_v9  ;;  %vm1672_vm0 = vmor %vm1670_vm13, %vm1671_vm15 }
 0x556   :  { %v1667_v56 = vsub.f32 1.0, %v1666_v29  ;;  %3424 = vtanh.f32 %v5142_v1 }
 0x557   :  { %v2171_v49 = vrot.slane %v5146_v40, 3 }
 0x558   :  { %v1668_v18 = vmul.f32 %v3423_v35, %v1667_v56 }
 0x559   :  { %v2175_v47 = vsel %vm1905_vm11, %v5146_v40, %v2171_v49  ;;  %v2177_v14 = vsel %vm1910_vm8, %v5146_v40, %v2171_v49  ;;  %v2180_v50 = vsel %vm1914_vm9, %v5146_v40, %v2171_v49  ;;  %v2183_v59 = vsel %vm1918_vm10, %v5146_v40, %v2171_v49 }
 0x55a   :  { %v2179_v10 = vrot.slane %v2177_v14, 1  ;;  %v2182_v34 = vrot.slane %v2180_v50, 2  ;;  %v2185_v24 = vrot.slane %v2183_v59, 3  ;;  %v2200_v16 = vunpack.i.h.s16 %v2175_v47 }
 0x55b   :  { %v3147_v27 = vpack.i.b16 %v2175_v47, %v2175_v47  ;;  %v1669_v39 = vadd.f32 %v3423_v35, %v1668_v18 }
 0x55c   :  { %v2202_v19 = vunpack.i.h.s16 %v2179_v10  ;;  %v2204_v33 = vunpack.i.h.s16 %v2182_v34  ;;  %v2206_v53 = vunpack.i.h.s16 %v2185_v24  ;;  %v2518_v25 = vpack.i.b16 %v2200_v16, %v2200_v16  ;;  %v3425_v29 = vpop.eup %3424 }
 0x55d   :  { %v3148_v17 = vpack.i.b16 %v2179_v10, %v2179_v10  ;;  %v3149_v0 = vpack.i.b16 %v2182_v34, %v2182_v34  ;;  %v3150_v11 = vpack.i.b16 %v2185_v24, %v2185_v24  ;;  %v2533_v9 = vperm.slane %v3147_v27, 0 }
 0x55e   :  { %v2520_v8 = vpack.i.b16 %v2202_v19, %v2202_v19  ;;  %v2522_v56 = vpack.i.b16 %v2204_v33, %v2204_v33  ;;  %v2524_v49 = vpack.i.b16 %v2206_v53, %v2206_v53  ;;  %v2534_v14 = vperm.slane %v2518_v25, 0 }
 0x55f   :  { %v2535_v18 = vperm.slane %v3148_v17, 0  ;;  %v2537_v47 = vperm.slane %v3149_v0, 0  ;;  %v2539_v12 = vperm.slane %v3150_v11, 0  ;;  %v1673_v50 = vsel %vm1672_vm0, %v3423_v35, %v1669_v39 }
 0x560   :  { %v2536_v59 = vperm.slane %v2520_v8, 0  ;;  %v2538_v43 = vperm.slane %v2522_v56, 0  ;;  %v2540_v16 = vperm.slane %v2524_v49, 0  ;;  %v1678_v10 = vsel %vm5152_vm14, %v1677_v48, %v1673_v50 }
 0x561   :  { %v1689_v34 = vmul.f32 %v3425_v29, %v1678_v10  ;;  %v5175_v24 = vsel %vm2764_vm2, %v2767_v61, %v2533_v9  ;;  %v5179_v55 = vsel %vm2764_vm2, %v5005_v46, %v2534_v14  ;;  %v5187_v35 = vsel %vm2764_vm2, %v2769_v41, %v2535_v18 }
 0x562   :  { %v5191_v51 = vsel %vm2764_vm2, %v5022_v31, %v2536_v59  ;;  %v5199_v57 = vsel %vm2764_vm2, %v2771_v62, %v2537_v47  ;;  %v5203_v58 = vsel %vm2764_vm2, %v5027_v30, %v2538_v43  ;;  %v5211_v2 = vsel %vm2764_vm2, %v2773_v36, %v2539_v12 }
 0x563   :  { %v1691_v54 = vpack.c.bf16 %v1689_v34, %v1689_v34  ;;  %v5215_v61 = vsel %vm2764_vm2, %v5032_v28, %v2540_v16  ;;  %v1707_v46 = vunpack.c.l.b16 %v5146_v40 }
 0x565   :  { %v2172_v6 = vrot.slane %v1691_v54, 3  ;;  %v1708_v45 = vunpack.c.l.b16 %v1691_v54 }
 0x567   :  { %v2188_v41 = vsel %vm1905_vm11, %v1691_v54, %v2172_v6  ;;  %v2190_v62 = vsel %vm1910_vm8, %v1691_v54, %v2172_v6  ;;  %v2193_v31 = vsel %vm1914_vm9, %v1691_v54, %v2172_v6  ;;  %v2196_v44 = vsel %vm1918_vm10, %v1691_v54, %v2172_v6 }
 0x568   :  { %v2192_v22 = vrot.slane %v2190_v62, 1  ;;  %v2195_v36 = vrot.slane %v2193_v31, 2  ;;  %v2198_v30 = vrot.slane %v2196_v44, 3  ;;  %v2208_v43 = vunpack.i.h.s16 %v2188_v41 }
 0x569   :  { %v3151_v27 = vpack.i.b16 %v2188_v41, %v2188_v41  ;;  %v1709_v39 = vpack.c.b16 %v1708_v45, %v1707_v46 }
 0x56a   :  { %v2210_v28 = vunpack.i.h.s16 %v2192_v22  ;;  %v2212_v48 = vunpack.i.h.s16 %v2195_v36  ;;  %v2214_v19 = vunpack.i.h.s16 %v2198_v30  ;;  %v2526_v33 = vpack.i.b16 %v2208_v43, %v2208_v43 }
 0x56b   :  { %v3152_v53 = vpack.i.b16 %v2192_v22, %v2192_v22  ;;  %v3153_v40 = vpack.i.b16 %v2195_v36, %v2195_v36  ;;  %v3154_v25 = vpack.i.b16 %v2198_v30, %v2198_v30  ;;  %v2541_v17 = vperm.slane %v3151_v27, 0  ;;  %1719 = vmatmul.bf16.vlgmr.msrb.gmra.mxu0 %v1709_v39  ;;  %1733 = vmatmul.bf16.vlgmr.msrb.gmra.mxu1 %v1709_v39 }
 0x56c   :  { %v2528_v0 = vpack.i.b16 %v2210_v28, %v2210_v28  ;;  %v2530_v11 = vpack.i.b16 %v2212_v48, %v2212_v48  ;;  %v2532_v9 = vpack.i.b16 %v2214_v19, %v2214_v19  ;;  %v2542_v29 = vperm.slane %v2526_v33, 0  ;;  %1747 = vmatmul.bf16.vlgmr.msrb.gmra.mxu2 %v1709_v39  ;;  %1761 = vmatmul.bf16.vlgmr.msrb.gmra.mxu3 %v1709_v39  ;;  %v3092_v48 = vld [vmem:[%s5454_s0 + $0xf8] sm:$0xff] }
 0x56d   :  { %v2543_v8 = vperm.slane %v3152_v53, 0  ;;  %v2545_v56 = vperm.slane %v3153_v40, 0  ;;  %v2547_v49 = vperm.slane %v3154_v25, 0  ;;  %v5228_v14 = vsel %vm2764_vm2, %v2775_v23, %v2541_v17 }
 0x56e   :  { %v2544_v18 = vperm.slane %v2528_v0, 0  ;;  %v2546_v47 = vperm.slane %v2530_v11, 0  ;;  %v2548_v12 = vperm.slane %v2532_v9, 0  ;;  %v5232_v50 = vsel %vm2764_vm2, %v5057_v13, %v2542_v29 }
 0x56f   :  { %v5240_v59 = vsel %vm2764_vm2, %v2777_v20, %v2543_v8  ;;  %v5248_v26 = vsel %vm2764_vm2, %v2779_v60, %v2545_v56  ;;  %v5256_v23 = vsel %vm2764_vm2, %v5674_v52, %v2547_v49  ;;  %v1704_v33 = vunpack.c.h.bf16 %v3092_v48 }
 0x570   :  { %v5260_v3 = vsel %vm2764_vm2, %v5074_v5, %v2544_v18  ;;  %v5264_v63 = vsel %vm2764_vm2, %v5079_v37, %v2546_v47  ;;  %v5268_v15 = vsel %vm2764_vm2, %v5084_v7, %v2548_v12  ;;  %v3090_v5 = vld [vmem:[%s5454_s0 + $0xe8] sm:$0xff]  ;;  %v3091_v37 = vld [vmem:[%s5454_s0 + $0xf0] sm:$0xff]  ;;  %v1703_v52 = vunpack.c.l.bf16 %v3092_v48 }
 0x571   :  { %v1700_v10 = vunpack.c.h.bf16 %v3090_v5  ;;  %v1701_v34 = vunpack.c.l.bf16 %v3091_v37  ;;  %v1702_v54 = vunpack.c.h.bf16 %v3091_v37  ;;  %v1699_v28 = vunpack.c.l.bf16 %v3090_v5 }
 0x5e8   :  { %v1720_v38 = vpop.f32.mrf.mxu0  ;;  %v1734_v13 = vpop.f32.mrf.mxu1 }
 0x5e9   :  { %v1767_v20 = vadd.f32 %v1720_v38, %v1697_v21  ;;  %v1768_v60 = vadd.f32 %v1734_v13, %v1698_v32 }
 0x5eb   :  { %v3093_v7 = vmul.f32 -1.442695, %v1767_v20  ;;  %v3095_v16 = vmul.f32 -1.442695, %v1768_v60 }
 0x5ed   :  { %3426 = vpow2.f32 %v3093_v7 }
 0x5ee   :  { %3428 = vpow2.f32 %v3095_v16 }
 0x5ef   :  { %v1762_v6 = vpop.f32.mrf.mxu3  ;;  %v1748_v19 = vpop.f32.mrf.mxu2 }
 0x5f0   :  { %v1770_v45 = vadd.f32 %v1762_v6, %v1700_v10  ;;  %v1722_v46 = vpop.f32.mrf.mxu0  ;;  %v1736_v41 = vpop.f32.mrf.mxu1  ;;  %v1769_v40 = vadd.f32 %v1748_v19, %v1699_v28 }
 0x5f1   :  { %v1771_v62 = vadd.f32 %v1722_v46, %v1701_v34  ;;  %v1772_v31 = vadd.f32 %v1736_v41, %v1702_v54 }
 0x5f2   :  { %v3097_v44 = vmul.f32 -1.442695, %v1770_v45 }
 0x5f3   :  { %v3427_v22 = vpop.eup %3426  ;;  %v3094_v36 = vmul.f32 -1.442695, %v1771_v62  ;;  %v3096_v27 = vmul.f32 -1.442695, %v1772_v31 }
 0x5f4   :  { %v3429_v30 = vpop.eup %3428  ;;  %v1781_v43 = vadd.f32 1.0, %v3427_v22  ;;  %3430 = vpow2.f32 %v3097_v44 }
 0x5f5   :  { %v1819_v39 = vadd.f32 1.0, %v3429_v30  ;;  %3432 = vpow2.f32 %v3094_v36 }
 0x5f6   :  { %3434 = vrcp.f32 %v1781_v43  ;;  %v1792_v12 = vand.u32 2147483647, %v1781_v43  ;;  %v1794_v32 = vand.u32 2147483648, %v1781_v43  ;;  %vm1788_vm3 = vweird.f32 %v1781_v43 }
 0x5f7   :  { %3436 = vrcp.f32 %v1819_v39  ;;  %v1764_v25 = vpop.f32.mrf.mxu3  ;;  %v1832_v21 = vand.u32 2147483648, %v1819_v39  ;;  %v1830_v20 = vand.u32 2147483647, %v1819_v39  ;;  %v1750_v60 = vpop.f32.mrf.mxu2  ;;  %vm1826_vm1 = vweird.f32 %v1819_v39 }
 0x5f8   :  { %3438 = vpow2.f32 %v3096_v27  ;;  %v1774_v56 = vadd.f32 %v1764_v25, %v1704_v33  ;;  %vm1793_vm4 = vcmp.eq.f32.partialorder %v1792_v12, 8.507059e+37  ;;  %v1795_v34 = vor.u32 1.1754944e-38, %v1794_v32 }
 0x5f9   :  { %v1773_v45 = vadd.f32 %v1750_v60, %v1703_v52  ;;  %v1833_v41 = vor.u32 1.1754944e-38, %v1832_v21  ;;  %vm1831_vm6 = vcmp.eq.f32.partialorder %v1830_v20, 8.507059e+37 }
 0x5fa   :  { %v3431_v53 = vpop.eup %3430  ;;  %v3098_v5 = vmul.f32 -1.442695, %v1774_v56 }
 0x5fb   :  { %v3433_v17 = vpop.eup %3432  ;;  %v5282_v0 = vadd.f32 1.0, %v3431_v53 }
 0x5fc   :  { %v3435_v11 = vpop.eup %3434  ;;  %v5284_v9 = vadd.f32 1.0, %v3433_v17 }
 0x5fd   :  { %v3437_v29 = vpop.eup %3436  ;;  %v1784_v8 = vmul.f32 %v3435_v11, %v1781_v43  ;;  %3440 = vrcp.f32 %v5282_v0  ;;  %vm1789_vm2 = vweird.f32 %v3435_v11  ;;  %vm1866_vm13 = vweird.f32 %v5282_v0 }
 0x5fe   :  { %v3439_v49 = vpop.eup %3438  ;;  %v1822_v18 = vmul.f32 %v3437_v29, %v1819_v39  ;;  %3442 = vtanh.f32 %v1769_v40  ;;  %vm1827_vm7 = vweird.f32 %v3437_v29  ;;  %vm1790_vm5 = vmor %vm1788_vm3, %vm1789_vm2  ;;  %v1872_v19 = vand.u32 2147483648, %v5282_v0 }
 0x5ff   :  { %v1785_v47 = vsub.f32 1.0, %v1784_v8  ;;  %3444 = vrcp.f32 %v5284_v9  ;;  %v5288_v38 = vadd.f32 1.0, %v3439_v49  ;;  %vm1828_vm12 = vmor %vm1826_vm1, %vm1827_vm7  ;;  %vm1803_vm14 = vweird.f32 %v5284_v9 }
 0x600   :  { %v1823_v4 = vsub.f32 1.0, %v1822_v18  ;;  %v1809_v25 = vand.u32 2147483648, %v5284_v9  ;;  %v1870_v18 = vand.u32 2147483647, %v5282_v0  ;;  %v1873_v20 = vor.u32 1.1754944e-38, %v1872_v19 }
 0x601   :  { %v1786_v13 = vmul.f32 %v3435_v11, %v1785_v47  ;;  %3446 = vrcp.f32 %v5288_v38  ;;  %v1847_v8 = vand.u32 2147483648, %v5288_v38  ;;  %v1845_v12 = vand.u32 2147483647, %v5288_v38 }
 0x602   :  { %v1824_v37 = vmul.f32 %v3437_v29, %v1823_v4  ;;  %3448 = vpow2.f32 %v3098_v5  ;;  %v1810_v32 = vor.u32 1.1754944e-38, %v1809_v25  ;;  %vm1841_vm3 = vweird.f32 %v5288_v38 }
 0x603   :  { %v5291_v7 = vpop.eup %3440  ;;  %v1787_v16 = vadd.f32 %v3435_v11, %v1786_v13  ;;  %3450 = vtanh.f32 %v1773_v45  ;;  %v1848_v60 = vor.u32 1.1754944e-38, %v1847_v8 }
 0x604   :  { %v3443_v10 = vpop.eup %3442  ;;  %v1825_v54 = vadd.f32 %v3437_v29, %v1824_v37  ;;  %v1862_v6 = vmul.f32 %v5291_v7, %v5282_v0  ;;  %vm1867_vm0 = vweird.f32 %v5291_v7 }
 0x605   :  { %v3445_v46 = vpop.eup %3444  ;;  %v1791_v62 = vsel %vm1790_vm5, %v3435_v11, %v1787_v16  ;;  %vm5315_vm1 = vmor %vm1866_vm13, %vm1867_vm0  ;;  %vm2848_vm13 = vcmask 1043456  }
 0x606   :  { %v1796_v31 = vsel %vm1793_vm4, %v1795_v34, %v1791_v62  ;;  %v1829_v44 = vsel %vm1828_vm12, %v3437_v29, %v1825_v54  ;;  %v1863_v22 = vsub.f32 1.0, %v1862_v6  ;;  %v1799_v36 = vmul.f32 %v3445_v46, %v5284_v9 }
 0x607   :  { %v1834_v30 = vsel %vm1831_vm6, %v1833_v41, %v1829_v44  ;;  %v1893_v43 = vmul.f32 %v3443_v10, %v1796_v31  ;;  %v3447_v27 = vpop.eup %3446  ;;  %vm1804_vm15 = vweird.f32 %v3445_v46  ;;  %v1807_v29 = vand.u32 2147483647, %v5284_v9 }
 0x608   :  { %v1891_v39 = vmul.f32 %v1834_v30, %v5120_v42  ;;  %v1864_v28 = vmul.f32 %v5291_v7, %v1863_v22  ;;  %v1800_v48 = vsub.f32 1.0, %v1799_v36  ;;  %v1837_v33 = vmul.f32 %v3447_v27, %v5288_v38  ;;  %v3449_v17 = vpop.eup %3448  ;;  %vm1805_vm7 = vmor %vm1803_vm14, %vm1804_vm15 }
 0x609   :  { %v5307_v49 = vadd.f32 1.0, %v3449_v17  ;;  %vm1842_vm2 = vweird.f32 %v3447_v27  ;;  %v3451_v52 = vpop.eup %3450  ;;  %vm1808_vm4 = vcmp.eq.f32.partialorder %v1807_v29, 8.507059e+37  ;;  %vm1871_vm12 = vcmp.eq.f32.partialorder %v1870_v18, 8.507059e+37 }
 0x60a   :  { %v1895_v53 = vadd.f32 %v1893_v43, %v1891_v39  ;;  %v1801_v40 = vmul.f32 %v3445_v46, %v1800_v48  ;;  %v1865_v42 = vadd.f32 %v5291_v7, %v1864_v28  ;;  %v1838_v11 = vsub.f32 1.0, %v1837_v33  ;;  %vm1843_vm5 = vmor %vm1841_vm3, %vm1842_vm2 }
 0x60b   :  { %vm1846_vm6 = vcmp.eq.f32.partialorder %v1845_v12, 8.507059e+37  ;;  %vm2849_vm14 = vsmask.f32 3328  ;;  %v1885_v31 = vand.u32 2147483647, %v5307_v49  ;;  %v1887_v44 = vand.u32 2147483648, %v5307_v49 }
 0x60c   :  { %3452 = vtanh.f32 %v1895_v53  ;;  %v1802_v56 = vadd.f32 %v3445_v46, %v1801_v40  ;;  %v1839_v47 = vmul.f32 %v3447_v27, %v1838_v11  ;;  %v1869_v13 = vsel %vm5315_vm1, %v5291_v7, %v1865_v42  ;;  %vm5343_vm0 = vmand %vm2848_vm13, %vm2849_vm14 }
 0x60d   :  { %3454 = vrcp.f32 %v5307_v49  ;;  %v1874_v16 = vsel %vm1871_vm12, %v1873_v20, %v1869_v13  ;;  %vm1881_vm2 = vweird.f32 %v5307_v49  ;;  %vm1886_vm1 = vcmp.eq.f32.partialorder %v1885_v31, 8.507059e+37 }
 0x60e   :  { %v1806_v21 = vsel %vm1805_vm7, %v3445_v46, %v1802_v56  ;;  %v1840_v9 = vadd.f32 %v3447_v27, %v1839_v47 }
 0x60f   :  { %v1811_v0 = vsel %vm1808_vm4, %v1810_v32, %v1806_v21 }
 0x610   :  { %v1844_v5 = vsel %vm1843_vm5, %v3447_v27, %v1840_v9  ;;  %v1894_v6 = vmul.f32 %v3451_v52, %v1811_v0 }
 0x611   :  { %v1849_v10 = vsel %vm1846_vm6, %v1848_v60, %v1844_v5 }
 0x612   :  { %v3453_v37 = vpop.eup %3452  ;;  %v1892_v54 = vmul.f32 %v1849_v10, %v5142_v1 }
 0x613   :  { %v5324_v34 = vmul.f32 %v3453_v37, %v1874_v16  ;;  %v5327_v7 = vpop.eup %3454 }
 0x614   :  { %v1877_v45 = vmul.f32 %v5327_v7, %v5307_v49  ;;  %v1896_v41 = vadd.f32 %v1894_v6, %v1892_v54  ;;  %vm1882_vm15 = vweird.f32 %v5327_v7 }
 0x615   :  { %v1901_v38 = vpack.c.bf16 %v5324_v34, %v5324_v34  ;;  %vm1883_vm7 = vmor %vm1881_vm2, %vm1882_vm15 }
 0x616   :  { %v1878_v62 = vsub.f32 1.0, %v1877_v45  ;;  %3456 = vtanh.f32 %v1896_v41 }
 0x617   :  { %v2217_v46 = vrot.slane %v1901_v38, 3 }
 0x618   :  { %v1879_v19 = vmul.f32 %v5327_v7, %v1878_v62 }
 0x619   :  { %v2221_v1 = vsel %vm1905_vm11, %v1901_v38, %v2217_v46  ;;  %v2223_v22 = vsel %vm1910_vm8, %v1901_v38, %v2217_v46  ;;  %v2226_v36 = vsel %vm1914_vm9, %v1901_v38, %v2217_v46  ;;  %v2229_v30 = vsel %vm1918_vm10, %v1901_v38, %v2217_v46 }
 0x61a   :  { %v2225_v43 = vrot.slane %v2223_v22, 1  ;;  %v2228_v27 = vrot.slane %v2226_v36, 2  ;;  %v2231_v39 = vrot.slane %v2229_v30, 3  ;;  %v2246_v28 = vunpack.i.h.s16 %v2221_v1 }
 0x61b   :  { %v3155_v48 = vpack.i.b16 %v2221_v1, %v2221_v1  ;;  %v1880_v37 = vadd.f32 %v5327_v7, %v1879_v19 }
 0x61c   :  { %v2248_v33 = vunpack.i.h.s16 %v2225_v43  ;;  %v2250_v53 = vunpack.i.h.s16 %v2228_v27  ;;  %v2252_v40 = vunpack.i.h.s16 %v2231_v39  ;;  %v2550_v25 = vpack.i.b16 %v2246_v28, %v2246_v28  ;;  %v3457_v0 = vpop.eup %3456 }
 0x61d   :  { %v3156_v42 = vpack.i.b16 %v2225_v43, %v2225_v43  ;;  %v3157_v11 = vpack.i.b16 %v2228_v27, %v2228_v27  ;;  %v3158_v29 = vpack.i.b16 %v2231_v39, %v2231_v39  ;;  %v2565_v8 = vperm.slane %v3155_v48, 0 }
 0x61e   :  { %v2552_v56 = vpack.i.b16 %v2248_v33, %v2248_v33  ;;  %v2554_v18 = vpack.i.b16 %v2250_v53, %v2250_v53  ;;  %v2556_v47 = vpack.i.b16 %v2252_v40, %v2252_v40  ;;  %v2566_v12 = vperm.slane %v2550_v25, 0 }
 0x61f   :  { %v2567_v52 = vperm.slane %v3156_v42, 0  ;;  %v2569_v4 = vperm.slane %v3157_v11, 0  ;;  %v2571_v21 = vperm.slane %v3158_v29, 0  ;;  %v2851_v32 = vsel %vm5343_vm0, %v5175_v24, %v2565_v8 }
 0x620   :  { %v2568_v13 = vperm.slane %v2552_v56, 0  ;;  %v2570_v9 = vperm.slane %v2554_v18, 0  ;;  %v2572_v20 = vperm.slane %v2556_v47, 0  ;;  %v2852_v60 = vsel %vm5343_vm0, %v5179_v55, %v2566_v12  ;;  %2867 = vst [vmem:[%s5455_s2] sm:$0xf] %v2851_v32 }
 0x621   :  { %v2853_v5 = vsel %vm5343_vm0, %v5187_v35, %v2567_v52  ;;  %v2855_v24 = vsel %vm5343_vm0, %v5199_v57, %v2569_v4  ;;  %2868 = vst [vmem:[%s5455_s2 + $0x4] sm:$0xf] %v2852_v60  ;;  %v1888_v57 = vor.u32 1.1754944e-38, %v1887_v44  ;;  %v2857_v49 = vsel %vm5343_vm0, %v5211_v2, %v2571_v21 }
 0x622   :  { %v2854_v55 = vsel %vm5343_vm0, %v5191_v51, %v2568_v13  ;;  %v2856_v35 = vsel %vm5343_vm0, %v5203_v58, %v2570_v9  ;;  %2869 = vst [vmem:[%s5455_s2 + $0x8] sm:$0xf] %v2853_v5  ;;  %v1884_v51 = vsel %vm1883_vm7, %v5327_v7, %v1880_v37  ;;  %v2858_v58 = vsel %vm5343_vm0, %v5215_v61, %v2572_v20 }
 0x623   :  { %2870 = vst [vmem:[%s5455_s2 + $0xc] sm:$0xf] %v2854_v55  ;;  %v1889_v16 = vsel %vm1886_vm1, %v1888_v57, %v1884_v51 }
 0x624   :  { %2871 = vst [vmem:[%s5455_s2 + $0x10] sm:$0xf] %v2855_v24  ;;  %v1900_v2 = vmul.f32 %v3457_v0, %v1889_v16 }
 0x625   :  { %2872 = vst [vmem:[%s5455_s2 + $0x14] sm:$0xf] %v2856_v35 }
 0x626   :  { %2873 = vst [vmem:[%s5455_s2 + $0x18] sm:$0xf] %v2857_v49  ;;  %v1902_v10 = vpack.c.bf16 %v1900_v2, %v1900_v2  ;;  %v3199_v61 = vpack.c.bf16 %v1900_v2, %v5324_v34 }
 0x627   :  { %2874 = vst [vmem:[%s5455_s2 + $0x1c] sm:$0xf] %v2858_v58 }
 0x628   :  { %v2218_v54 = vrot.slane %v1902_v10, 3  ;;  %3200 = vst [vmem:[#allocation2] sm:$0xff] %v3199_v61  }
 0x62a   :  { %v2234_v6 = vsel %vm1905_vm11, %v1902_v10, %v2218_v54  ;;  %v2236_v7 = vsel %vm1910_vm8, %v1902_v10, %v2218_v54  ;;  %v2239_v38 = vsel %vm1914_vm9, %v1902_v10, %v2218_v54  ;;  %v2242_v45 = vsel %vm1918_vm10, %v1902_v10, %v2218_v54 }
 0x62b   :  { %v2238_v46 = vrot.slane %v2236_v7, 1  ;;  %v2241_v41 = vrot.slane %v2239_v38, 2  ;;  %v2244_v62 = vrot.slane %v2242_v45, 3  ;;  %v2254_v31 = vunpack.i.h.s16 %v2234_v6 }
 0x62c   :  { %v3159_v44 = vpack.i.b16 %v2234_v6, %v2234_v6 }
 0x62d   :  { %v2256_v1 = vunpack.i.h.s16 %v2238_v46  ;;  %v2258_v22 = vunpack.i.h.s16 %v2241_v41  ;;  %v2260_v36 = vunpack.i.h.s16 %v2244_v62  ;;  %v2558_v30 = vpack.i.b16 %v2254_v31, %v2254_v31 }
 0x62e   :  { %v3160_v34 = vpack.i.b16 %v2238_v46, %v2238_v46  ;;  %v3161_v43 = vpack.i.b16 %v2241_v41, %v2241_v41  ;;  %v3162_v27 = vpack.i.b16 %v2244_v62, %v2244_v62  ;;  %v2573_v39 = vperm.slane %v3159_v44, 0 }
 0x62f   :  { %v2560_v28 = vpack.i.b16 %v2256_v1, %v2256_v1  ;;  %v2562_v48 = vpack.i.b16 %v2258_v22, %v2258_v22  ;;  %v2564_v19 = vpack.i.b16 %v2260_v36, %v2260_v36  ;;  %v2574_v33 = vperm.slane %v2558_v30, 0 }
 0x630   :  { %v2575_v53 = vperm.slane %v3160_v34, 0  ;;  %v2577_v40 = vperm.slane %v3161_v43, 0  ;;  %v2579_v25 = vperm.slane %v3162_v27, 0  ;;  %v2859_v42 = vsel %vm5343_vm0, %v5228_v14, %v2573_v39 }
 0x631   :  { %v2576_v11 = vperm.slane %v2560_v28, 0  ;;  %v2578_v29 = vperm.slane %v2562_v48, 0  ;;  %v2580_v8 = vperm.slane %v2564_v19, 0  ;;  %v2860_v56 = vsel %vm5343_vm0, %v5232_v50, %v2574_v33  ;;  %2875 = vst [vmem:[%s5455_s2 + $0x20] sm:$0xf] %v2859_v42 }
 0x632   :  { %v2861_v18 = vsel %vm5343_vm0, %v5240_v59, %v2575_v53  ;;  %v2863_v47 = vsel %vm5343_vm0, %v5248_v26, %v2577_v40  ;;  %2876 = vst [vmem:[%s5455_s2 + $0x24] sm:$0xf] %v2860_v56  ;;  %v2865_v59 = vsel %vm5343_vm0, %v5256_v23, %v2579_v25 }
 0x633   :  { %v2862_v14 = vsel %vm5343_vm0, %v5260_v3, %v2576_v11  ;;  %v2864_v50 = vsel %vm5343_vm0, %v5264_v63, %v2578_v29  ;;  %2877 = vst [vmem:[%s5455_s2 + $0x28] sm:$0xf] %v2861_v18  ;;  %v2866_v26 = vsel %vm5343_vm0, %v5268_v15, %v2580_v8 }
 0x634   :  { %2878 = vst [vmem:[%s5455_s2 + $0x2c] sm:$0xf] %v2862_v14 }
 0x635   :  { %2879 = vst [vmem:[%s5455_s2 + $0x30] sm:$0xf] %v2863_v47 }
 0x636   :  { %2880 = vst [vmem:[%s5455_s2 + $0x34] sm:$0xf] %v2864_v50 }
 0x637   :  { %2881 = vst [vmem:[%s5455_s2 + $0x38] sm:$0xf] %v2865_v59 }
 0x638   :  { %2882 = vst [vmem:[%s5455_s2 + $0x3c] sm:$0xf] %v2866_v26 }

</bundles_post_ra>
